<compile_context>
chip_gen: v7x
topology: tpu7x:2x2x1
jax: 0.10.0
libtpu: 0.0.40
codegen_flags: <defaults>
</compile_context>

<pallas_src>
import functools

import jax
import jax.numpy as jnp
import numpy as np
from jax.experimental import pallas as pl
from jax.experimental.pallas import tpu as pltpu

NEG_INF = -1e10


def _softmax_last(x):
    """Softmax over the last (lane) axis; the divide runs on the EUP slot."""
    m = jnp.max(x, axis=-1, keepdims=True)
    e = jnp.exp(x - m)
    s = jnp.sum(e, axis=-1, keepdims=True)
    return e * pl.reciprocal(s, approx=True)


def _topic_kernel(q_embT_ref, q_emb_ref, a_emb_ref, side_ref, encw_ref, const_ref,
                  out_ref, *, TN, al):
    f32, bf16 = jnp.float32, jnp.bfloat16
    NB, ql, n_e = q_emb_ref.shape
    Kp = a_emb_ref.shape[1]            # TN*al padded up to a multiple of 8
    n_h = encw_ref.shape[1]
    out_w = out_ref.shape[-1]

    q_emb = q_emb_ref[...]             # (NB, ql, n_e)  bf16
    q_embT = q_embT_ref[...]           # (NB, n_e, ql)  bf16 (pre-transposed rhs)
    a_emb = a_emb_ref[...]             # (NB, Kp, n_e)  bf16
    a_f32 = a_emb.astype(f32)

    side = side_ref[...]               # (NB, Kp + 3, L) f32
    q_mask = side[:, 0:1, 0:ql]        # 0/1 query-token mask           (NB, 1, ql)
    feat_bias = side[:, 1:2, 0:TN]     # feat.cls_w[:4]+cls_b+ql_b*cls4 (NB, 1, TN)
    m2 = side[:, 2:3, 0:TN]            # 0/1 topic-valid mask           (NB, 1, TN)
    row_bias = side[:, 3:3 + Kp, 0:1]  # sum_e a*sw0 + sim_b            (NB, Kp, 1)
    a_mask = side[:, 3:3 + Kp, 1:2]    # 0/1 alias-token mask           (NB, Kp, 1)

    consts = const_ref[...]            # consolidated f32 constants
    sw1 = consts[0:1, 0:n_e]           # similar() weights on q_emb
    sw2 = consts[1:2, 0:n_e]           # similar() weights on alia_emb * q_emb
    enc_b = consts[2:3, 0:n_h]         # q_encoder bias
    qlin_fold = consts[3:4, 0:n_h]     # q_linear weight * classifier weight[4]
    pool_sum = consts[4:4 + Kp, 0:TN]  # 0/1 per-topic pooling matrix (zero pad rows)

    # similar(cat([w, v, w*v], -1)) decomposed: the q-side (sw1) term folds into the
    # MXU contraction; the alias-only term + bias arrive precomputed per row.
    lhs = (a_f32 * sw2 + sw1).astype(bf16)
    atten = jnp.einsum('bke,beq->bkq', lhs, q_embT, preferred_element_type=f32)
    atten = atten + row_bias
    # exact NEG_INF masking (masks are strictly 0/1), identical to the reference
    atten = jnp.where(q_mask != 0.0, atten, NEG_INF)
    atten_m = jnp.where(a_mask != 0.0, atten, NEG_INF)          # (NB, Kp, ql)

    # softmax over query tokens; align query to every alias row
    atten1 = _softmax_last(atten_m)
    alig = jnp.einsum('bkq,bqe->bke', atten1.astype(bf16), q_emb,
                      preferred_element_type=f32)               # (NB, Kp, n_e)

    # q_encoder: ReLU(Linear(cat([alig, alia_emb], -1))) as two 2D dots with batch
    # folded into M.  Kp % 8 == 0, so these reshapes are aligned sublane merges
    # (no relayout) and the weight is never broadcast.
    encw = encw_ref[...]                                        # (2*n_e, n_h) bf16
    x2d = alig.reshape(NB * Kp, n_e).astype(bf16)
    a2d = a_f32.reshape(NB * Kp, n_e).astype(bf16)
    enc2d = (jnp.dot(x2d, encw[0:n_e, :], preferred_element_type=f32) +
             jnp.dot(a2d, encw[n_e:2 * n_e, :], preferred_element_type=f32))
    enc2d = jnp.maximum(enc2d + enc_b, 0.0)                     # (NB*Kp, n_h)

    # q_linear folded with the classifier weight on alia_score, then per-topic sum
    # via a 0/1 pooling matrix (padded alias rows have zero pooling columns).
    score2d = jnp.sum(enc2d * qlin_fold, axis=-1, keepdims=True)   # (NB*Kp, 1)
    score = score2d.reshape(NB, Kp, 1)                             # aligned split
    alia = jnp.sum(score * pool_sum, axis=1, keepdims=True)        # (NB, 1, TN)

    logits = feat_bias + alia
    mask_logits = jnp.where(m2 != 0.0, logits, NEG_INF)            # (NB, 1, TN)

    # per-topic group max of the masked atten via static sublane slices (no 4D
    # select intermediate, no extra pooling-mask operand).
    parts = [jnp.max(atten_m[:, t * al:(t + 1) * al, :], axis=1, keepdims=True)
             for t in range(TN)]
    max_atten = jnp.concatenate(parts, axis=1)                     # (NB, TN, ql)

    p = _softmax_last(mask_logits)                                 # (NB, 1, TN)
    weighted = jnp.einsum('bot,btq->boq', p, max_atten,
                          preferred_element_type=f32)              # (NB, 1, ql)
    atten_out = _softmax_last(weighted)

    # one dense (NB, out_w) store: lane-concat [logits | atten | zero pad], then
    # collapse the size-1 sublane axis (reduction over a unit dim == squeeze).
    pieces = [mask_logits, atten_out]
    pad = out_w - TN - ql
    if pad > 0:
        pieces.append(jnp.zeros((NB, 1, pad), f32))
    row3 = jnp.concatenate(pieces, axis=-1)                        # (NB, 1, out_w)
    out_ref[...] = jnp.sum(row3, axis=1)                           # (NB, out_w)


def _num_tensorcores(default=1):
    """Best-effort TensorCores-per-chip query (v5e/v6e: 1, v7x: 2). Safe fallback 1."""
    try:
        info = pltpu.get_tpu_info()
        for attr in ("num_cores", "core_count", "num_tensorcores", "tensorcore_count"):
            v = getattr(info, attr, None)
            if isinstance(v, int) and v > 0:
                return v
    except Exception:
        pass
    try:
        kind = jax.local_devices()[0].device_kind.lower()
        if "v7" in kind or "7x" in kind:
            return 2
    except Exception:
        pass
    return default


def _pick_nb(batch, num_cores):
    """Batch rows per grid step.

    Single-TC chips (v5e/v6e): a single grid step (NB = batch); splitting only adds
    ~0.35us/step + DMA setup and shrinks every MXU M.  Multi-TC chips (v7x): split
    across cores only when each block keeps a sublane-aligned (multiple-of-8) batch
    slab, so the dense (NB, 128) output tile stays legal and each core has real work.
    """
    if num_cores <= 1 or batch <= 8:
        return batch
    for steps in range(num_cores, batch + 1):
        if batch % steps == 0 and (batch // steps) % 8 == 0:
            return batch // steps
    return batch


def init_params(key, vocab, n_e, n_h):
    ks = jax.random.split(key, 5)

    def lin(k, out_d, in_d):
        kw, kb = jax.random.split(k)
        bound = 1.0 / np.sqrt(in_d)
        w = jax.random.uniform(kw, (out_d, in_d), jnp.float32, -bound, bound)
        b = jax.random.uniform(kb, (out_d,), jnp.float32, -bound, bound)
        return w, b

    emb = jax.random.normal(ks[0], (vocab, n_e), jnp.float32)
    sim_w, sim_b = lin(ks[1], 1, 3 * n_e)      # nn.Linear(3*n_e, 1)
    enc_w, enc_b = lin(ks[2], n_h, 2 * n_e)    # q_encoder Linear(2*n_e, n_h)
    qlin_w, qlin_b = lin(ks[3], 1, n_h)        # q_linear Linear(n_h, 1)
    cls_w, cls_b = lin(ks[4], 1, 5)            # classifier Linear(5, 1)
    return dict(emb=emb, sim_w=sim_w, sim_b=sim_b, enc_w=enc_w, enc_b=enc_b,
                qlin_w=qlin_w, qlin_b=qlin_b, cls_w=cls_w, cls_b=cls_b)


def topic_generator_forward(params, q, els, elo, cate, alia, *, num_cores=None):
    B, ql = q.shape
    _, TN, al = alia.shape
    TNal = TN * al
    Kp = ((TNal + 7) // 8) * 8                 # alias rows padded to a sublane multiple
    emb_w = params["emb"]
    _, n_e = emb_w.shape
    n_h = params["enc_w"].shape[0]
    f32, bf16 = jnp.float32, jnp.bfloat16

    # --- XLA glue: embedding renorm (F.normalize p=2, dim=1; row 0 zeroed) + gather
    norm = jnp.sqrt(jnp.sum(emb_w * emb_w, axis=1, keepdims=True))
    emb_n = emb_w / jnp.maximum(norm, 1e-12)
    emb_n = emb_n.at[0, :].set(0.0)
    q_emb_f = jnp.take(emb_n, q, axis=0)                           # (B, ql, n_e)
    a_ids = alia.reshape(B, TNal)
    a_emb_f = jnp.take(emb_n, a_ids, axis=0)                       # (B, TNal, n_e)

    q_emb = q_emb_f.astype(bf16)
    q_embT = jnp.swapaxes(q_emb, 1, 2)                             # (B, n_e, ql)
    a_emb = jnp.zeros((B, Kp, n_e), bf16).at[:, :TNal, :].set(a_emb_f.astype(bf16))

    # --- folded scalars / per-batch side rows (padded alias rows stay 0 -> masked)
    cls_w = params["cls_w"].reshape(5)
    cls_b = params["cls_b"].reshape(())
    ql_b = params["qlin_b"].reshape(())
    sim_w = params["sim_w"].reshape(3, n_e).astype(f32)            # rows: [w, v, w*v]
    sim_b = params["sim_b"].reshape(())

    q_mask = (q != 0).astype(f32)                                  # (B, ql)
    a_mask = (a_ids != 0).astype(f32)                              # (B, TNal)
    row_bias = jnp.einsum('bke,e->bk', a_emb_f, sim_w[0]) + sim_b  # alias term + bias
    feat = jnp.concatenate([elo[..., None], els[..., None], cate], axis=-1)
    feat_bias = (jnp.einsum('btf,f->bt', feat.astype(f32), cls_w[:4])
                 + cls_b + ql_b * cls_w[4])
    m2 = ((els + elo) != 0).astype(f32)

    L = max(ql, TN, 2)
    side = jnp.zeros((B, Kp + 3, L), f32)
    side = side.at[:, 0, :ql].set(q_mask)
    side = side.at[:, 1, :TN].set(feat_bias)
    side = side.at[:, 2, :TN].set(m2)
    side = side.at[:, 3:3 + TNal, 0].set(row_bias)
    side = side.at[:, 3:3 + TNal, 1].set(a_mask)

    # --- constants: encoder weight (bf16) + one consolidated f32 block
    enc_w = params["enc_w"].T.astype(bf16)                         # (2*n_e, n_h)
    qlin_fold = params["qlin_w"].reshape(n_h).astype(f32) * cls_w[4]
    topic_of = jnp.arange(TNal) // al
    pool_sum = (topic_of[:, None] == jnp.arange(TN)[None, :]).astype(f32)  # (TNal, TN)

    Lc = max(n_e, n_h, TN)
    consts = jnp.zeros((4 + Kp, Lc), f32)
    consts = consts.at[0, :n_e].set(sim_w[1])
    consts = consts.at[1, :n_e].set(sim_w[2])
    consts = consts.at[2, :n_h].set(params["enc_b"].astype(f32))
    consts = consts.at[3, :n_h].set(qlin_fold)
    consts = consts.at[4:4 + TNal, :TN].set(pool_sum)

    # --- grid / block choice (generation-aware)
    if num_cores is None:
        num_cores = _num_tensorcores()
    NB = _pick_nb(B, num_cores)
    # v7x has 64 MiB VMEM (vs 128 on v5e/v6e) and a ~32 MiB default scoped limit; keep
    # double-buffered per-batch blocks far below that when scaling shapes up.
    per_b = (2 * ql * n_e * 2 + Kp * n_e * 2 + (Kp + 3) * max(L, 128) * 4 + 512)
    while NB > 8 and NB % 16 == 0 and 2 * NB * per_b > (8 << 20):
        NB //= 2
    out_w = pl.cdiv(TN + ql, 128) * 128

    kernel = functools.partial(_topic_kernel, TN=TN, al=al)

    def per_batch(shape):
        return pl.BlockSpec((NB,) + shape, lambda g: (g,) + (0,) * len(shape))

    def full(shape):
        return pl.BlockSpec(shape, lambda g: (0,) * len(shape))

    out = pl.pallas_call(
        kernel,
        out_shape=jax.ShapeDtypeStruct((B, out_w), f32),
        grid=(B // NB,),
        in_specs=[
            per_batch((n_e, ql)),          # q_emb pre-transposed (bf16)
            per_batch((ql, n_e)),          # q_emb (bf16)
            per_batch((Kp, n_e)),          # alia_emb, padded rows (bf16)
            per_batch((Kp + 3, L)),        # consolidated per-batch side rows (f32)
            full((2 * n_e, n_h)),          # stacked q_encoder weight (bf16)
            full((4 + Kp, Lc)),            # consolidated f32 constants
        ],
        out_specs=pl.BlockSpec((NB, out_w), lambda g: (g, 0)),
        compiler_params=pltpu.CompilerParams(dimension_semantics=("parallel",)),
    )(q_embT, q_emb, a_emb, side, enc_w, consts)

    return out[:, :TN], out[:, TN:TN + ql]


def reference_forward(params, q, els, elo, cate, alia):
    """Pure-JAX mirror of the torch CoAttention forward (for validation)."""
    B, ql = q.shape
    _, TN, al = alia.shape
    emb_w = params["emb"]
    _, n_e = emb_w.shape
    n_h = params["enc_w"].shape[0]
    norm = jnp.sqrt(jnp.sum(emb_w * emb_w, axis=1, keepdims=True))
    emb_n = emb_w / jnp.maximum(norm, 1e-12)
    emb_n = emb_n.at[0, :].set(0.0)
    q_emb = emb_n[q]
    alia_emb = emb_n[alia]                                  # (B, TN, al, n_e)
    q_mask = (q != 0).astype(jnp.float32)
    a_mask = (alia != 0).astype(jnp.float32).reshape(B, TN * al)
    mask = a_mask[:, :, None] * q_mask[:, None, :]          # (B, TN*al, ql)
    w = jnp.broadcast_to(alia_emb.reshape(B, TN * al, 1, n_e),
                         (B, TN * al, ql, n_e))
    v = jnp.broadcast_to(q_emb.reshape(B, 1, ql, n_e), (B, TN * al, ql, n_e))
    cat = jnp.concatenate([w, v, w * v], axis=-1)
    atten = jnp.einsum('bkqe,oe->bkq', cat, params["sim_w"]) + params["sim_b"][0]
    atten = mask * atten + (1 - mask) * NEG_INF
    atten4 = atten.reshape(B, TN, al, ql)
    atten1 = jax.nn.softmax(atten4, axis=3).reshape(B, TN * al, ql)
    alig_a = jnp.einsum('bkq,bqe->bke', atten1, q_emb)
    enc_in = jnp.concatenate([alig_a, alia_emb.reshape(B, TN * al, n_e)], axis=-1)
    enc = jax.nn.relu(jnp.einsum('bke,he->bkh', enc_in, params["enc_w"])
                      + params["enc_b"])
    compare = jnp.sum(enc.reshape(B, TN, al, n_h), axis=2)
    alia_score = (jnp.einsum('bth,oh->bto', compare, params["qlin_w"])
                  + params["qlin_b"])
    inp = jnp.concatenate([elo[..., None], els[..., None], cate, alia_score],
                          axis=-1)
    logits = jnp.einsum('bti,oi->bt', inp, params["cls_w"]) + params["cls_b"][0]
    m2 = ((els + elo) != 0).astype(jnp.float32)
    mask_logits = m2 * logits + (1 - m2) * NEG_INF
    max_atten = jnp.max(atten4, axis=2)
    p = jax.nn.softmax(mask_logits, axis=1)
    atten_out = jax.nn.softmax(jnp.sum(p[:, :, None] * max_atten, axis=1), axis=1)
    return mask_logits, atten_out


if __name__ == "__main__":
    B, ql, TN, al = 8, 8, 3, 4
    V, n_e, n_h = 64, 32, 32
    key = jax.random.PRNGKey(0)
    kp, kq, ka, ke1, ke2, kc = jax.random.split(key, 6)
    params = init_params(kp, V, n_e, n_h)

    q = jax.random.randint(kq, (B, ql), 1, V, dtype=jnp.int32)
    q = q.at[0, 6:].set(0).at[1, 5:].set(0)              # padded query tokens
    alia = jax.random.randint(ka, (B, TN, al), 1, V, dtype=jnp.int32)
    alia = alia.at[:, 2, 2:].set(0).at[1, 1, 3].set(0)   # padded alias tokens
    els = jax.random.uniform(ke1, (B, TN), jnp.float32, 0.1, 1.0)
    elo = jax.random.uniform(ke2, (B, TN), jnp.float32, 0.1, 1.0)
    els = els.at[1, 2].set(0.0)
    elo = elo.at[1, 2].set(0.0)                          # fully padded topic
    cate = jax.random.uniform(kc, (B, TN, 2), jnp.float32)

    fwd = jax.jit(functools.partial(topic_generator_forward, params))
    mask_logits, atten1 = fwd(q, els, elo, cate, alia)
    jax.block_until_ready((mask_logits, atten1))

    ref_logits, ref_atten = reference_forward(params, q, els, elo, cate, alia)
    assert mask_logits.shape == (B, TN) and atten1.shape == (B, ql)
    assert np.allclose(np.asarray(mask_logits), np.asarray(ref_logits),
                       rtol=5e-2, atol=5e-2)
    assert np.allclose(np.asarray(atten1), np.asarray(ref_atten),
                       rtol=5e-2, atol=5e-2)
    print("KERNEL_OK")
</pallas_src>

<mosaic_0001>
module attributes {stable_mosaic.version = 11 : i64} {
  func.func @_topic_kernel(%arg0: i32, %arg1: memref<8x32x8xbf16, #tpu.memory_space<vmem>>, %arg2: memref<8x8x32xbf16, #tpu.memory_space<vmem>>, %arg3: memref<8x16x32xbf16, #tpu.memory_space<vmem>>, %arg4: memref<8x19x8xf32, #tpu.memory_space<vmem>>, %arg5: memref<64x32xbf16, #tpu.memory_space<vmem>>, %arg6: memref<20x32xf32, #tpu.memory_space<vmem>>, %arg7: memref<8x128xf32, #tpu.memory_space<vmem>>) attributes {dimension_semantics = [#tpu.dimension_semantics<parallel>], iteration_bounds = array<i64: 1>, scalar_prefetch = 0 : i64, scratch_operands = 0 : i64, tpu.core_type = #tpu.core_type<tc>, window_params = [{transform_indices = @transform_0, window_bounds = array<i64: 8, 32, 8>}, {transform_indices = @transform_1, window_bounds = array<i64: 8, 8, 32>}, {transform_indices = @transform_2, window_bounds = array<i64: 8, 16, 32>}, {transform_indices = @transform_3, window_bounds = array<i64: 8, 19, 8>}, {pipeline_mode = #tpu.pipeline_mode<synchronous>, transform_indices = @transform_4, window_bounds = array<i64: 64, 32>}, {pipeline_mode = #tpu.pipeline_mode<synchronous>, transform_indices = @transform_5, window_bounds = array<i64: 20, 32>}, {transform_indices = @transform_6, window_bounds = array<i64: 8, 128>}]} {
    %c0 = arith.constant 0 : index
    %c0_0 = arith.constant 0 : index
    %c0_1 = arith.constant 0 : index
    %0 = vector.load %arg2[%c0, %c0_0, %c0_1] : memref<8x8x32xbf16, #tpu.memory_space<vmem>>, vector<8x8x32xbf16>
    %c0_2 = arith.constant 0 : index
    %c0_3 = arith.constant 0 : index
    %c0_4 = arith.constant 0 : index
    %1 = vector.load %arg1[%c0_2, %c0_3, %c0_4] : memref<8x32x8xbf16, #tpu.memory_space<vmem>>, vector<8x32x8xbf16>
    %c0_5 = arith.constant 0 : index
    %c0_6 = arith.constant 0 : index
    %c0_7 = arith.constant 0 : index
    %2 = vector.load %arg3[%c0_5, %c0_6, %c0_7] : memref<8x16x32xbf16, #tpu.memory_space<vmem>>, vector<8x16x32xbf16>
    %3 = arith.extf %2 : vector<8x16x32xbf16> to vector<8x16x32xf32>
    %c0_8 = arith.constant 0 : index
    %c0_9 = arith.constant 0 : index
    %c0_10 = arith.constant 0 : index
    %4 = vector.load %arg4[%c0_8, %c0_9, %c0_10] : memref<8x19x8xf32, #tpu.memory_space<vmem>>, vector<8x19x8xf32>
    %5 = vector.extract_strided_slice %4 {offsets = [0, 0, 0], sizes = [8, 1, 8], strides = [1, 1, 1]} : vector<8x19x8xf32> to vector<8x1x8xf32>
    %6 = vector.extract_strided_slice %4 {offsets = [0, 1, 0], sizes = [8, 1, 3], strides = [1, 1, 1]} : vector<8x19x8xf32> to vector<8x1x3xf32>
    %7 = vector.extract_strided_slice %4 {offsets = [0, 2, 0], sizes = [8, 1, 3], strides = [1, 1, 1]} : vector<8x19x8xf32> to vector<8x1x3xf32>
    %8 = vector.extract_strided_slice %4 {offsets = [0, 3, 0], sizes = [8, 16, 1], strides = [1, 1, 1]} : vector<8x19x8xf32> to vector<8x16x1xf32>
    %9 = vector.extract_strided_slice %4 {offsets = [0, 3, 1], sizes = [8, 16, 1], strides = [1, 1, 1]} : vector<8x19x8xf32> to vector<8x16x1xf32>
    %c0_11 = arith.constant 0 : index
    %c0_12 = arith.constant 0 : index
    %10 = vector.load %arg6[%c0_11, %c0_12] : memref<20x32xf32, #tpu.memory_space<vmem>>, vector<20x32xf32>
    %11 = vector.extract_strided_slice %10 {offsets = [0, 0], sizes = [1, 32], strides = [1, 1]} : vector<20x32xf32> to vector<1x32xf32>
    %12 = vector.extract_strided_slice %10 {offsets = [1, 0], sizes = [1, 32], strides = [1, 1]} : vector<20x32xf32> to vector<1x32xf32>
    %13 = vector.extract_strided_slice %10 {offsets = [2, 0], sizes = [1, 32], strides = [1, 1]} : vector<20x32xf32> to vector<1x32xf32>
    %14 = vector.extract_strided_slice %10 {offsets = [3, 0], sizes = [1, 32], strides = [1, 1]} : vector<20x32xf32> to vector<1x32xf32>
    %15 = vector.extract_strided_slice %10 {offsets = [4, 0], sizes = [16, 3], strides = [1, 1]} : vector<20x32xf32> to vector<16x3xf32>
    %16 = vector.shape_cast %12 : vector<1x32xf32> to vector<1x1x32xf32>
    %17 = vector.broadcast %16 : vector<1x1x32xf32> to vector<8x16x32xf32>
    %18 = arith.mulf %3, %17 : vector<8x16x32xf32>
    %19 = vector.shape_cast %11 : vector<1x32xf32> to vector<1x1x32xf32>
    %20 = vector.broadcast %19 : vector<1x1x32xf32> to vector<8x16x32xf32>
    %21 = arith.addf %18, %20 : vector<8x16x32xf32>
    %22 = arith.truncf %21 : vector<8x16x32xf32> to vector<8x16x32xbf16>
    "tpu.trace_start"() <{level = 10 : i32, message = "bke,beq->bkq"}> : () -> ()
    %cst = arith.constant dense<0.000000e+00> : vector<8x16x8xf32>
    %23 = tpu.matmul %22, %1, %cst {dimension_numbers = #tpu.dot_dimension_numbers<[2], [1], [1], [2], [0, 0, 0, 1, 1, 2], [0], [0]>} : vector<8x16x32xbf16>, vector<8x32x8xbf16>, vector<8x16x8xf32> -> vector<8x16x8xf32>
    "tpu.trace_stop"() : () -> ()
    %24 = vector.broadcast %8 : vector<8x16x1xf32> to vector<8x16x8xf32>
    %25 = arith.addf %23, %24 : vector<8x16x8xf32>
    %cst_13 = arith.constant 0.000000e+00 : f32
    %26 = vector.broadcast %cst_13 : f32 to vector<8x1x8xf32>
    %27 = arith.cmpf one, %5, %26 : vector<8x1x8xf32>
    %cst_14 = arith.constant -1.000000e+10 : f32
    %28 = vector.shape_cast %27 : vector<8x1x8xi1> to vector<8x1x8xi1>
    %29 = vector.broadcast %28 : vector<8x1x8xi1> to vector<8x16x8xi1>
    %30 = vector.broadcast %cst_14 : f32 to vector<8x16x8xf32>
    %31 = arith.select %29, %25, %30 : vector<8x16x8xi1>, vector<8x16x8xf32>
    %cst_15 = arith.constant 0.000000e+00 : f32
    %32 = vector.broadcast %cst_15 : f32 to vector<8x16x1xf32>
    %33 = arith.cmpf one, %9, %32 : vector<8x16x1xf32>
    %cst_16 = arith.constant -1.000000e+10 : f32
    %34 = vector.shape_cast %33 : vector<8x16x1xi1> to vector<8x16x1xi1>
    %35 = vector.broadcast %34 : vector<8x16x1xi1> to vector<8x16x8xi1>
    %36 = vector.broadcast %cst_16 : f32 to vector<8x16x8xf32>
    %37 = arith.select %35, %31, %36 : vector<8x16x8xi1>, vector<8x16x8xf32>
    %cst_17 = arith.constant dense<0xFF800000> : vector<8x16xf32>
    %38 = vector.multi_reduction <maximumf>, %37, %cst_17 [2] : vector<8x16x8xf32> to vector<8x16xf32>
    %39 = vector.shape_cast %38 : vector<8x16xf32> to vector<8x16x1xf32>
    %40 = vector.broadcast %39 : vector<8x16x1xf32> to vector<8x16x8xf32>
    %41 = arith.subf %37, %40 : vector<8x16x8xf32>
    %42 = math.exp %41 : vector<8x16x8xf32>
    %cst_18 = arith.constant dense<0.000000e+00> : vector<8x16xf32>
    %43 = vector.multi_reduction <add>, %42, %cst_18 [2] : vector<8x16x8xf32> to vector<8x16xf32>
    %44 = vector.shape_cast %43 : vector<8x16xf32> to vector<8x16x1xf32>
    %45 = tpu.reciprocal %44 {approx = true} : vector<8x16x1xf32> -> vector<8x16x1xf32>
    %46 = vector.broadcast %45 : vector<8x16x1xf32> to vector<8x16x8xf32>
    %47 = arith.mulf %42, %46 : vector<8x16x8xf32>
    %48 = arith.truncf %47 : vector<8x16x8xf32> to vector<8x16x8xbf16>
    "tpu.trace_start"() <{level = 10 : i32, message = "bkq,bqe->bke"}> : () -> ()
    %cst_19 = arith.constant dense<0.000000e+00> : vector<8x16x32xf32>
    %49 = tpu.matmul %48, %0, %cst_19 {dimension_numbers = #tpu.dot_dimension_numbers<[2], [1], [1], [2], [0, 0, 0, 1, 1, 2], [0], [0]>} : vector<8x16x8xbf16>, vector<8x8x32xbf16>, vector<8x16x32xf32> -> vector<8x16x32xf32>
    "tpu.trace_stop"() : () -> ()
    %c0_20 = arith.constant 0 : index
    %c0_21 = arith.constant 0 : index
    %50 = vector.load %arg5[%c0_20, %c0_21] : memref<64x32xbf16, #tpu.memory_space<vmem>>, vector<64x32xbf16>
    %51 = vector.shape_cast %49 : vector<8x16x32xf32> to vector<128x32xf32>
    %52 = arith.truncf %51 : vector<128x32xf32> to vector<128x32xbf16>
    %53 = vector.shape_cast %3 : vector<8x16x32xf32> to vector<128x32xf32>
    %54 = arith.truncf %53 : vector<128x32xf32> to vector<128x32xbf16>
    %55 = vector.extract_strided_slice %50 {offsets = [0, 0], sizes = [32, 32], strides = [1, 1]} : vector<64x32xbf16> to vector<32x32xbf16>
    %cst_22 = arith.constant dense<0.000000e+00> : vector<128x32xf32>
    %56 = tpu.matmul %52, %55, %cst_22 {dimension_numbers = #tpu.dot_dimension_numbers<[1], [0], [0], [1], [0, 0, 1, 1], [], []>} : vector<128x32xbf16>, vector<32x32xbf16>, vector<128x32xf32> -> vector<128x32xf32>
    %57 = vector.extract_strided_slice %50 {offsets = [32, 0], sizes = [32, 32], strides = [1, 1]} : vector<64x32xbf16> to vector<32x32xbf16>
    %cst_23 = arith.constant dense<0.000000e+00> : vector<128x32xf32>
    %58 = tpu.matmul %54, %57, %cst_23 {dimension_numbers = #tpu.dot_dimension_numbers<[1], [0], [0], [1], [0, 0, 1, 1], [], []>} : vector<128x32xbf16>, vector<32x32xbf16>, vector<128x32xf32> -> vector<128x32xf32>
    %59 = arith.addf %56, %58 : vector<128x32xf32>
    %60 = vector.broadcast %13 : vector<1x32xf32> to vector<128x32xf32>
    %61 = arith.addf %59, %60 : vector<128x32xf32>
    %cst_24 = arith.constant 0.000000e+00 : f32
    %62 = vector.broadcast %cst_24 : f32 to vector<128x32xf32>
    %63 = arith.maximumf %61, %62 : vector<128x32xf32>
    %64 = vector.broadcast %14 : vector<1x32xf32> to vector<128x32xf32>
    %65 = arith.mulf %63, %64 : vector<128x32xf32>
    %cst_25 = arith.constant dense<0.000000e+00> : vector<128xf32>
    %66 = vector.multi_reduction <add>, %65, %cst_25 [1] : vector<128x32xf32> to vector<128xf32>
    %67 = vector.shape_cast %66 : vector<128xf32> to vector<128x1xf32>
    %68 = vector.shape_cast %67 : vector<128x1xf32> to vector<8x16x1xf32>
    %69 = vector.shape_cast %15 : vector<16x3xf32> to vector<1x16x3xf32>
    %70 = vector.broadcast %68 : vector<8x16x1xf32> to vector<8x16x3xf32>
    %71 = vector.broadcast %69 : vector<1x16x3xf32> to vector<8x16x3xf32>
    %72 = arith.mulf %70, %71 : vector<8x16x3xf32>
    %cst_26 = arith.constant dense<0.000000e+00> : vector<8x3xf32>
    %73 = vector.multi_reduction <add>, %72, %cst_26 [1] : vector<8x16x3xf32> to vector<8x3xf32>
    %74 = vector.shape_cast %73 : vector<8x3xf32> to vector<8x1x3xf32>
    %75 = arith.addf %6, %74 : vector<8x1x3xf32>
    %cst_27 = arith.constant 0.000000e+00 : f32
    %76 = vector.broadcast %cst_27 : f32 to vector<8x1x3xf32>
    %77 = arith.cmpf one, %7, %76 : vector<8x1x3xf32>
    %cst_28 = arith.constant -1.000000e+10 : f32
    %78 = vector.broadcast %cst_28 : f32 to vector<8x1x3xf32>
    %79 = arith.select %77, %75, %78 : vector<8x1x3xi1>, vector<8x1x3xf32>
    %80 = vector.extract_strided_slice %37 {offsets = [0, 0, 0], sizes = [8, 4, 8], strides = [1, 1, 1]} : vector<8x16x8xf32> to vector<8x4x8xf32>
    %cst_29 = arith.constant dense<0xFF800000> : vector<8x8xf32>
    %81 = vector.multi_reduction <maximumf>, %80, %cst_29 [1] : vector<8x4x8xf32> to vector<8x8xf32>
    %82 = vector.shape_cast %81 : vector<8x8xf32> to vector<8x1x8xf32>
    %83 = vector.extract_strided_slice %37 {offsets = [0, 4, 0], sizes = [8, 4, 8], strides = [1, 1, 1]} : vector<8x16x8xf32> to vector<8x4x8xf32>
    %cst_30 = arith.constant dense<0xFF800000> : vector<8x8xf32>
    %84 = vector.multi_reduction <maximumf>, %83, %cst_30 [1] : vector<8x4x8xf32> to vector<8x8xf32>
    %85 = vector.shape_cast %84 : vector<8x8xf32> to vector<8x1x8xf32>
    %86 = vector.extract_strided_slice %37 {offsets = [0, 8, 0], sizes = [8, 4, 8], strides = [1, 1, 1]} : vector<8x16x8xf32> to vector<8x4x8xf32>
    %cst_31 = arith.constant dense<0xFF800000> : vector<8x8xf32>
    %87 = vector.multi_reduction <maximumf>, %86, %cst_31 [1] : vector<8x4x8xf32> to vector<8x8xf32>
    %88 = vector.shape_cast %87 : vector<8x8xf32> to vector<8x1x8xf32>
    %89 = tpu.concatenate %82, %85, %88 in 1 : vector<8x1x8xf32>, vector<8x1x8xf32>, vector<8x1x8xf32> -> vector<8x3x8xf32>
    %cst_32 = arith.constant dense<0xFF800000> : vector<8x1xf32>
    %90 = vector.multi_reduction <maximumf>, %79, %cst_32 [2] : vector<8x1x3xf32> to vector<8x1xf32>
    %91 = vector.shape_cast %90 : vector<8x1xf32> to vector<8x1x1xf32>
    %92 = vector.broadcast %91 : vector<8x1x1xf32> to vector<8x1x3xf32>
    %93 = arith.subf %79, %92 : vector<8x1x3xf32>
    %94 = math.exp %93 : vector<8x1x3xf32>
    %cst_33 = arith.constant dense<0.000000e+00> : vector<8x1xf32>
    %95 = vector.multi_reduction <add>, %94, %cst_33 [2] : vector<8x1x3xf32> to vector<8x1xf32>
    %96 = vector.shape_cast %95 : vector<8x1xf32> to vector<8x1x1xf32>
    %97 = tpu.reciprocal %96 {approx = true} : vector<8x1x1xf32> -> vector<8x1x1xf32>
    %98 = vector.broadcast %97 : vector<8x1x1xf32> to vector<8x1x3xf32>
    %99 = arith.mulf %94, %98 : vector<8x1x3xf32>
    "tpu.trace_start"() <{level = 10 : i32, message = "bot,btq->boq"}> : () -> ()
    %cst_34 = arith.constant dense<0.000000e+00> : vector<8x1x8xf32>
    %100 = tpu.matmul %99, %89, %cst_34 {dimension_numbers = #tpu.dot_dimension_numbers<[2], [1], [1], [2], [0, 0, 0, 1, 1, 2], [0], [0]>} : vector<8x1x3xf32>, vector<8x3x8xf32>, vector<8x1x8xf32> -> vector<8x1x8xf32>
    "tpu.trace_stop"() : () -> ()
    %cst_35 = arith.constant dense<0xFF800000> : vector<8x1xf32>
    %101 = vector.multi_reduction <maximumf>, %100, %cst_35 [2] : vector<8x1x8xf32> to vector<8x1xf32>
    %102 = vector.shape_cast %101 : vector<8x1xf32> to vector<8x1x1xf32>
    %103 = vector.broadcast %102 : vector<8x1x1xf32> to vector<8x1x8xf32>
    %104 = arith.subf %100, %103 : vector<8x1x8xf32>
    %105 = math.exp %104 : vector<8x1x8xf32>
    %cst_36 = arith.constant dense<0.000000e+00> : vector<8x1xf32>
    %106 = vector.multi_reduction <add>, %105, %cst_36 [2] : vector<8x1x8xf32> to vector<8x1xf32>
    %107 = vector.shape_cast %106 : vector<8x1xf32> to vector<8x1x1xf32>
    %108 = tpu.reciprocal %107 {approx = true} : vector<8x1x1xf32> -> vector<8x1x1xf32>
    %109 = vector.broadcast %108 : vector<8x1x1xf32> to vector<8x1x8xf32>
    %110 = arith.mulf %105, %109 : vector<8x1x8xf32>
    %cst_37 = arith.constant 0.000000e+00 : f32
    %111 = vector.broadcast %cst_37 : f32 to vector<8x1x117xf32>
    %112 = tpu.concatenate %79, %110, %111 in 2 : vector<8x1x3xf32>, vector<8x1x8xf32>, vector<8x1x117xf32> -> vector<8x1x128xf32>
    %cst_38 = arith.constant dense<0.000000e+00> : vector<8x128xf32>
    %113 = vector.multi_reduction <add>, %112, %cst_38 [1] : vector<8x1x128xf32> to vector<8x128xf32>
    %c0_39 = arith.constant 0 : index
    %c0_40 = arith.constant 0 : index
    %114 = vector.load %arg7[%c0_39, %c0_40] : memref<8x128xf32, #tpu.memory_space<vmem>>, vector<8x128xf32>
    tpu.vector_store %arg7[%c0_39, %c0_40], %113 {strides = array<i32>} : memref<8x128xf32, #tpu.memory_space<vmem>>, vector<8x128xf32>,
    return
  }
  func.func @transform_0(%arg0: i32) -> (i32, i32, i32) {
    %c0_i32 = arith.constant 0 : i32
    %c0_i32_0 = arith.constant 0 : i32
    %c0_i32_1 = arith.constant 0 : i32
    return %arg0, %c0_i32, %c0_i32_0 : i32, i32, i32
  }
  func.func @transform_1(%arg0: i32) -> (i32, i32, i32) {
    %c0_i32 = arith.constant 0 : i32
    %c0_i32_0 = arith.constant 0 : i32
    %c0_i32_1 = arith.constant 0 : i32
    return %arg0, %c0_i32, %c0_i32_0 : i32, i32, i32
  }
  func.func @transform_2(%arg0: i32) -> (i32, i32, i32) {
    %c0_i32 = arith.constant 0 : i32
    %c0_i32_0 = arith.constant 0 : i32
    %c0_i32_1 = arith.constant 0 : i32
    return %arg0, %c0_i32, %c0_i32_0 : i32, i32, i32
  }
  func.func @transform_3(%arg0: i32) -> (i32, i32, i32) {
    %c0_i32 = arith.constant 0 : i32
    %c0_i32_0 = arith.constant 0 : i32
    %c0_i32_1 = arith.constant 0 : i32
    return %arg0, %c0_i32, %c0_i32_0 : i32, i32, i32
  }
  func.func @transform_4(%arg0: i32) -> (i32, i32) {
    %c0_i32 = arith.constant 0 : i32
    %c0_i32_0 = arith.constant 0 : i32
    %c0_i32_1 = arith.constant 0 : i32
    return %c0_i32, %c0_i32_0 : i32, i32
  }
  func.func @transform_5(%arg0: i32) -> (i32, i32) {
    %c0_i32 = arith.constant 0 : i32
    %c0_i32_0 = arith.constant 0 : i32
    %c0_i32_1 = arith.constant 0 : i32
    return %c0_i32, %c0_i32_0 : i32, i32
  }
  func.func @transform_6(%arg0: i32) -> (i32, i32) {
    %c0_i32 = arith.constant 0 : i32
    %c0_i32_0 = arith.constant 0 : i32
    return %arg0, %c0_i32 : i32, i32
  }
}

</mosaic_0001>

<bundles_post_ra>
// kernel: topic_generator_forward.1
= control target key start
LH: loop header
LB: loop body
LE: loop exit
PB: predicated region body
PF: predicated region fallthrough
CT: control target
= control target key end

     0   :  { %v123_v0 = vlaneseq  ;;  %v4086_v1 = vmov 0   ;;  %v5729_v3 = vmov 0.0   ;;  %vm5741_vm0 = vmmov 0   ;;  %s5722_s3 = inlined_call_operand.vmem [shape: f32[8,19,8], index: 3, kind: input, shape index: {}]   ;;  %s5723_s0 = inlined_call_operand.vmem [shape: bf16[8,32,8], index: 0, kind: input, shape index: {}]   ;;  %s5724_s2 = inlined_call_operand.vmem [shape: bf16[8,16,32], index: 2, kind: input, shape index: {}]   ;;  %s5725_s5 = inlined_call_operand.vmem [shape: f32[20,32], index: 5, kind: input, shape index: {}]   ;;  %s5726_s1 = inlined_call_operand.vmem [shape: bf16[8,8,32], index: 1, kind: input, shape index: {}]   ;;  %s5727_s4 = inlined_call_operand.vmem [shape: bf16[64,32], index: 4, kind: input, shape index: {}]   ;;  %s5728_s6 = inlined_call_operand.vmem [shape: f32[8,128], index: 6, kind: output, shape index: {}]  }
   0x1   :  { %3860 = vset.pattern.permute.xlu1 %v4086_v1  ;;  %v4130_v2 = vld [vmem:[%s5722_s3 + $0x10] sm:$0x7]  ;;  %3642 = vmatprep.subr.bf16.mxu0 %v5729_v3  ;;  %v4136_v4 = vld [vmem:[%s5722_s3 + $0x18] sm:$0xff]  ;;  %v4141_v5 = vld [vmem:[%s5722_s3] sm:$0xff]  ;;  %vm5740_vm3 = vcmask 261120   ;;  %v4089_v60 = vmov 1  }
   0x2   :  { %5756 = vst [vmem:[#allocation2_spill] sm:$0xff] %v4136_v4  ;;  %5757 = vst [vmem:[#allocation3_spill] sm:$0xff] %v4141_v5  ;;  %181 = vperm.xlu1 %3860, %v4130_v2   ;;  %3650 = vmatprep.subr.bf16.mxu1 %v5729_v3  ;;  %v3873_v6 = vld [vmem:[%s5723_s0] sm:$0xff]   ;;  %v3874_v7 = vld [vmem:[%s5723_s0 + $0x10] sm:$0xff]   ;;  %v4154_v8 = vshrl.u32 %v123_v0, 7  ;;  %vm5739_vm1 = vcmp.ne.f32.partialorder %v4141_v5, 0.0 }
   0x3   :  { %3859 = vset.pattern.permute.xlu0 %v4086_v1  ;;  %3646 = vmatprep.mubr.msk.bf16.mxu0 %vm5741_vm0, %v5729_v3  ;;  %v4160_v9 = vld [vmem:[%s5722_s3 + $0x8] sm:$0xff]  ;;  %v3876_v13 = vld [vmem:[%s5723_s0 + $0x18] sm:$0xff]   ;;  %v64_v15 = vld [vmem:[%s5724_s2] sm:$0xff]   ;;  %v4195_v18 = vsel %vm5739_vm1, 1, %v4086_v1  ;;  %vm5738_vm2 = vcmp.ne.f32.partialorder %v4136_v4, 0.0  ;;  %vm846_vm5 = vcmp.ne.f32.partialorder %v4130_v2, 0.0 }
   0x4   :  { %5758 = vst [vmem:[#allocation4_spill] sm:$0xff] %v4154_v8  ;;  %173 = vperm.xlu0 %3859, %v4141_v5   ;;  %3643 = vmatpush3.bf16.msra.mxu0 %v3873_v6  ;;  %v3875_v10 = vld [vmem:[%s5723_s0 + $0x8] sm:$0xff]   ;;  %v125_v11 = vsub.s32 1, %v4154_v8  ;;  %v4179_v14 = vsub.s32 0, %v4154_v8  ;;  %v120_v16 = vld [vmem:[%s5725_s5] sm:$0xff]  ;;  %v80_v19 = vunpack.c.l.bf16 %v64_v15  ;;  %v81_v20 = vunpack.c.h.bf16 %v64_v15  ;;  %v4221_v28 = vld [vmem:[%s5722_s3 + $0x38] sm:$0xff] }
   0x5   :  { %3651 = vmatpush3.bf16.msra.mxu1 %v3874_v7  ;;  %3644 = vmatprep.subr.bf16.mxu0 %v5729_v3  ;;  %v4172_v12 = vld [vmem:[%s5722_s3 + $0x28] sm:$0x7]  ;;  %v4208_v25 = vld [vmem:[%s5722_s3 + $0x20] sm:$0xff]  ;;  %v4215_v27 = vsel %vm5738_vm2, 1, %v4086_v1  ;;  %v4233_v34 = vld [vmem:[%s5722_s3 + $0x30] sm:$0xff]  ;;  %vm845_vm10 = vcmp.ne.f32.partialorder %v4160_v9, 0.0 }
   0x6   :  { %185 = vperm.xlu1 %3860, %v4136_v4   ;;  %3652 = vmatprep.subr.bf16.mxu1 %v5729_v3  ;;  %v66_v17 = vld [vmem:[%s5724_s2 + $0x8] sm:$0xff]   ;;  %v4199_v21 = vrot.slane %v120_v16, %v125_v11  ;;  %v4202_v22 = vrot.slane %v120_v16, %v4179_v14  ;;  %v792_v26 = vrot.slane %v4195_v18, %v4179_v14  ;;  %v68_v37 = vld [vmem:[%s5724_s2 + $0x10] sm:$0xff]   ;;  %vm5737_vm4 = vcmp.ne.f32.partialorder %v4233_v34, 0.0  ;;  %v3877_v40 = vld [vmem:[%s5723_s0 + $0x20] sm:$0xff]  }
   0x7   :  { %3654 = vmatprep.mubr.msk.bf16.mxu1 %vm5741_vm0, %v5729_v3  ;;  %v82_v23 = vunpack.c.l.bf16 %v66_v17  ;;  %v83_v24 = vunpack.c.h.bf16 %v66_v17  ;;  %v796_v31 = vrot.slane %v4215_v27, %v4179_v14  ;;  %5759 = vst [vmem:[#allocation5_spill] sm:$0xff] %v4233_v34  ;;  %v84_v41 = vunpack.c.l.bf16 %v68_v37  ;;  %v70_v43 = vld [vmem:[%s5724_s2 + $0x18] sm:$0xff]   ;;  %v3878_v45 = vld [vmem:[%s5723_s0 + $0x30] sm:$0xff]   ;;  %v3879_v53 = vld [vmem:[%s5723_s0 + $0x28] sm:$0xff]  }
   0x8   :  { %177 = vperm.xlu0 %3859, %v4160_v9   ;;  %3645 = vmatpush3.bf16.msra.mxu0 %v3875_v10  ;;  %v127_v29 = vmul.f32 %v4199_v21, %v80_v19  ;;  %v128_v30 = vmul.f32 %v4199_v21, %v81_v20  ;;  %v85_v42 = vunpack.c.h.bf16 %v68_v37  ;;  %v86_v46 = vunpack.c.l.bf16 %v70_v43  ;;  %v3880_v56 = vld [vmem:[%s5723_s0 + $0x38] sm:$0xff]   ;;  %v4280_v59 = vld [vmem:[%s5722_s3 + $0x48] sm:$0xff]  ;;  %v72_v63 = vld [vmem:[%s5724_s2 + $0x20] sm:$0xff]  }
   0x9   :  { %3653 = vmatpush3.bf16.msra.mxu1 %v3876_v13  ;;  %3658 = vmatprep.subr.bf16.mxu0 %v5729_v3  ;;  %v129_v32 = vmul.f32 %v4199_v21, %v82_v23  ;;  %v130_v33 = vmul.f32 %v4199_v21, %v83_v24  ;;  %v87_v47 = vunpack.c.h.bf16 %v70_v43  ;;  %v4257_v48 = vsel %vm5737_vm4, 1, %v4086_v1  ;;  %5760 = vst [vmem:[#allocation6_spill] sm:$0xff] %v4280_v59  ;;  %v74_v0 = vld [vmem:[%s5724_s2 + $0x28] sm:$0xff]   ;;  %v4300_v15 = vld [vmem:[%s5722_s3 + $0x40] sm:$0x7] }
   0xa   :  { %193 = vperm.xlu1 %3860, %v4172_v12   ;;  %3666 = vmatprep.subr.bf16.mxu1 %v5729_v3  ;;  %v147_v35 = vadd.f32 %v4202_v22, %v127_v29  ;;  %v148_v36 = vadd.f32 %v4202_v22, %v128_v30  ;;  %v131_v50 = vmul.f32 %v4199_v21, %v84_v41  ;;  %vm5736_vm6 = vcmp.ne.f32.partialorder %v4280_v59, 0.0  ;;  %v3881_v19 = vld [vmem:[%s5723_s0 + $0x40] sm:$0xff]   ;;  %v3882_v29 = vld [vmem:[%s5723_s0 + $0x50] sm:$0xff]  }
   0xb   :  { %v149_v38 = vadd.f32 %v4202_v22, %v129_v32  ;;  %v150_v39 = vadd.f32 %v4202_v22, %v130_v33  ;;  %v132_v51 = vmul.f32 %v4199_v21, %v85_v42  ;;  %v800_v52 = vrot.slane %v4257_v48, %v4179_v14  ;;  %v76_v33 = vld [vmem:[%s5724_s2 + $0x30] sm:$0xff]  }
   0xc   :  { %189 = vperm.xlu0 %3859, %v4208_v25   ;;  %v163_v44 = vpack.c.bf16 %v148_v36, %v147_v35  ;;  %v133_v54 = vmul.f32 %v4199_v21, %v86_v46  ;;  %v134_v55 = vmul.f32 %v4199_v21, %v87_v47  ;;  %v151_v57 = vadd.f32 %v4202_v22, %v131_v50  ;;  %v78_v35 = vld [vmem:[%s5724_s2 + $0x38] sm:$0xff]   ;;  %v4357_v50 = vld [vmem:[%s5722_s3 + $0x60] sm:$0xff] }
   0xd   :  { %v164_v49 = vpack.c.bf16 %v150_v39, %v149_v38  ;;  %v152_v58 = vadd.f32 %v4202_v22, %v132_v51  ;;  %v88_v6 = vunpack.c.l.bf16 %v72_v63  ;;  %v89_v7 = vunpack.c.h.bf16 %v72_v63  ;;  %5761 = vst [vmem:[#allocation7_spill] sm:$0xff] %v4357_v50  ;;  %v4362_v51 = vld [vmem:[%s5722_s3 + $0x50] sm:$0xff] }
   0xe   :  { %201 = vperm.xlu1 %3860, %v4221_v28   ;;  %3647 = vmatmul.mubr.msk.bf16.vlgmr.msra.gmra.mrb[0].mxu0 %vm5740_vm3, %v163_v44  ;;  %v153_v61 = vadd.f32 %v4202_v22, %v133_v54  ;;  %v154_v62 = vadd.f32 %v4202_v22, %v134_v55  ;;  %v90_v10 = vunpack.c.l.bf16 %v74_v0  ;;  %v862_v16 = vsel %vm846_vm5, 1, %v4086_v1  ;;  %v3885_v54 = vld [vmem:[%s5723_s0 + $0x60] sm:$0xff]  }
   0xf   :  { %3655 = vmatmul.mubr.msk.bf16.vlgmr.msra.gmra.mrb[0].mxu1 %vm5740_vm3, %v164_v49  ;;  %3659 = vmatpush3.bf16.msra.mxu0 %v3877_v40  ;;  %v165_v11 = vpack.c.bf16 %v152_v58, %v151_v57  ;;  %v91_v17 = vunpack.c.h.bf16 %v74_v0  ;;  %v135_v20 = vmul.f32 %v4199_v21, %v88_v6  ;;  %v136_v23 = vmul.f32 %v4199_v21, %v89_v7  ;;  %v3883_v40 = vld [vmem:[%s5723_s0 + $0x48] sm:$0xff]   ;;  %v3886_v57 = vld [vmem:[%s5723_s0 + $0x70] sm:$0xff]  }
  0x10   :  { %197 = vperm.xlu0 %3859, %v4233_v34   ;;  %3667 = vmatpush3.bf16.msra.mxu1 %v3878_v45  ;;  %v166_v13 = vpack.c.bf16 %v154_v62, %v153_v61  ;;  %v137_v24 = vmul.f32 %v4199_v21, %v90_v10  ;;  %v4316_v2 = vsel %vm5736_vm6, 1, %v4086_v1  ;;  %v92_v38 = vunpack.c.l.bf16 %v76_v33  ;;  %v3884_v45 = vld [vmem:[%s5723_s0 + $0x58] sm:$0xff]   ;;  %v4392_v62 = vld [vmem:[%s5722_s3 + $0xa8] sm:$0xff] }
  0x11   :  { %3660 = vmatprep.subr.bf16.mxu0 %v5729_v3  ;;  %3668 = vmatprep.subr.bf16.mxu1 %v5729_v3  ;;  %v138_v30 = vmul.f32 %v4199_v21, %v91_v17  ;;  %v804_v32 = vrot.slane %v4316_v2, %v4179_v14  ;;  %v155_v36 = vadd.f32 %v4202_v22, %v135_v20  ;;  %v93_v39 = vunpack.c.h.bf16 %v76_v33  ;;  %v3887_v6 = vld [vmem:[%s5723_s0 + $0x68] sm:$0xff]   ;;  %v112_v20 = vld [vmem:[%s5722_s3 + $0x80] sm:$0xff] }
  0x12   :  { %3861 = vset.pattern.permute.xlu1 %v4089_v60  ;;  %3662 = vmatprep.mubr.msk.bf16.mxu0 %vm5741_vm0, %v5729_v3  ;;  %v156_v37 = vadd.f32 %v4202_v22, %v136_v23  ;;  %v157_v41 = vadd.f32 %v4202_v22, %v137_v24  ;;  %v94_v43 = vunpack.c.l.bf16 %v78_v35  ;;  %v95_v44 = vunpack.c.h.bf16 %v78_v35  ;;  %5762 = vst [vmem:[#allocation8_spill] sm:$0xff] %v4392_v62  ;;  %v4445_v24 = vld [vmem:[%s5722_s3 + $0xb0] sm:$0xff] }
  0x13   :  { %878 = vperm.xlu1 %3861, %v4195_v18   ;;  %3661 = vmatpush3.bf16.msra.mxu0 %v3879_v53  ;;  %v158_v42 = vadd.f32 %v4202_v22, %v138_v30  ;;  %v139_v47 = vmul.f32 %v4199_v21, %v92_v38  ;;  %v140_v49 = vmul.f32 %v4199_v21, %v93_v39  ;;  %vm5735_vm7 = vcmp.ne.f32.partialorder %v4357_v50, 0.0 }
  0x14   :  { %3670 = vmatprep.mubr.msk.bf16.mxu1 %vm5741_vm0, %v5729_v3  ;;  %3669 = vmatpush3.bf16.msra.mxu1 %v3880_v56  ;;  %v167_v46 = vpack.c.bf16 %v156_v37, %v155_v36  ;;  %v141_v55 = vmul.f32 %v4199_v21, %v94_v43  ;;  %v142_v56 = vmul.f32 %v4199_v21, %v95_v44  ;;  %v4378_v58 = vsel %vm5735_vm7, 1, %v4086_v1  ;;  %v4384_v21 = vld [vmem:[%s5722_s3 + $0x58] sm:$0x7]  ;;  %v116_v43 = vld [vmem:[%s5722_s3 + $0xa0] sm:$0x7] }
  0x15   :  { %3674 = vmatprep.subr.bf16.mxu0 %v5729_v3  ;;  %3682 = vmatprep.subr.bf16.mxu1 %v5729_v3  ;;  %v168_v53 = vpack.c.bf16 %v158_v42, %v157_v41  ;;  %v159_v63 = vadd.f32 %v4202_v22, %v139_v47  ;;  %v160_v0 = vadd.f32 %v4202_v22, %v140_v49  ;;  %vm5731_vm8 = vcmp.ne.f32.partialorder %v4392_v62, 0.0  ;;  %v4489_v41 = vld [vmem:[%s5722_s3 + $0x90] sm:$0xff] }
  0x16   :  { %205 = vperm.xlu0 %3859, %v4300_v15   ;;  %3663 = vmatmul.mubr.msk.bf16.vlgmr.msra.gmra.mrb[4].mxu0 %vm5740_vm3, %v165_v11  ;;  %v161_v7 = vadd.f32 %v4202_v22, %v141_v55  ;;  %v162_v10 = vadd.f32 %v4202_v22, %v142_v56  ;;  %v4407_v11 = vsel %vm5731_vm8, 1, %v4086_v1  ;;  %vm848_vm9 = vcmp.ne.f32.partialorder %v4172_v12, 0.0  ;;  %v115_v12 = vld [vmem:[%s5722_s3 + $0x98] sm:$0xff]  ;;  %5764 = vst [vmem:[#allocation10_spill] sm:$0xff] %v4489_v41 }
  0x17   :  { %884 = vperm.xlu1 %3861, %v862_v16   ;;  %3671 = vmatmul.mubr.msk.bf16.vlgmr.msra.gmra.mrb[4].mxu1 %vm5740_vm3, %v166_v13  ;;  %v3888_v13 = vld [vmem:[%s5723_s0 + $0x78] sm:$0xff]   ;;  %v109_v16 = vld [vmem:[%s5722_s3 + $0x68] sm:$0xff]  ;;  %v169_v22 = vpack.c.bf16 %v160_v0, %v159_v63  ;;  %v864_v23 = vsel %vm848_vm9, 1, %v4086_v1  ;;  %v861_v30 = vsel %vm845_vm10, 1, %v4086_v1  ;;  %vm847_vm11 = vcmp.ne.f32.partialorder %v4208_v25, 0.0 }
  0x18   :  { %3675 = vmatpush3.bf16.msra.mxu0 %v3881_v19  ;;  %3683 = vmatpush3.bf16.msra.mxu1 %v3882_v29  ;;  %v170_v19 = vpack.c.bf16 %v162_v10, %v161_v7  ;;  %v110_v29 = vld [vmem:[%s5722_s3 + $0x70] sm:$0x7]  ;;  %vm850_vm12 = vcmp.ne.f32.partialorder %v4300_v15, 0.0  ;;  %v863_v33 = vsel %vm847_vm11, 1, %v4086_v1  ;;  %vm849_vm13 = vcmp.ne.f32.partialorder %v4221_v28, 0.0  ;;  %v4468_v25 = vld [vmem:[%s5722_s3 + $0x78] sm:$0xff] }
  0x19   :  { %3676 = vmatprep.subr.bf16.mxu0 %v5729_v3  ;;  %3684 = vmatprep.subr.bf16.mxu1 %v5729_v3  ;;  %v866_v9 = vsel %vm850_vm12, 1, %v4086_v1  ;;  %v865_v35 = vsel %vm849_vm13, 1, %v4086_v1  ;;  %vm851_vm14 = vcmp.ne.f32.partialorder %v4362_v51, 0.0  ;;  %5763 = vst [vmem:[#allocation9_spill] sm:$0xff] %v4468_v25  ;;  %vm853_vm15 = vcmp.ne.f32.partialorder %v109_v16, 0.0 }
  0x1a   :  { %3678 = vmatprep.mubr.msk.bf16.mxu0 %vm5741_vm0, %v5729_v3  ;;  %3686 = vmatprep.mubr.msk.bf16.mxu1 %vm5741_vm0, %v5729_v3  ;;  %v867_v15 = vsel %vm851_vm14, 1, %v4086_v1  ;;  %v113_v28 = vld [vmem:[%s5722_s3 + $0x88] sm:$0x7]  ;;  %v869_v36 = vsel %vm853_vm15, 1, %v4086_v1  ;;  %vm855_vm5 = vcmp.ne.f32.partialorder %v112_v20, 0.0  ;;  %vm857_vm9 = vcmp.ne.f32.partialorder %v115_v12, 0.0 }
  0x1b   :  { %3862 = vset.pattern.permute.xlu1 %v4086_v1  ;;  %213 = vperm.xlu0 %3859, %v4362_v51   ;;  %v871_v37 = vsel %vm855_vm5, 1, %v4086_v1  ;;  %vm852_vm10 = vcmp.ne.f32.partialorder %v4384_v21, 0.0  ;;  %v873_v38 = vsel %vm857_vm9, 1, %v4086_v1  ;;  %vm854_vm12 = vcmp.ne.f32.partialorder %v110_v29, 0.0 }
  0x1c   :  { %3677 = vmatpush3.bf16.msra.mxu0 %v3883_v40  ;;  %209 = vperm.xlu1 %3862, %v4280_v59   ;;  %v868_v39 = vsel %vm852_vm10, 1, %v4086_v1  ;;  %v119_v40 = vld [vmem:[%s5722_s3 + $0xb8] sm:$0x7]  ;;  %v870_v44 = vsel %vm854_vm12, 1, %v4086_v1  ;;  %vm5733_vm13 = vcmp.ne.f32.partialorder %v4468_v25, 0.0  ;;  %vm856_vm14 = vcmp.ne.f32.partialorder %v113_v28, 0.0 }
  0x1d   :  { %3685 = vmatpush3.bf16.msra.mxu1 %v3884_v45  ;;  %3690 = vmatprep.subr.bf16.mxu0 %v5729_v3  ;;  %vm860_vm11 = vcmp.ne.f32.partialorder %v119_v40, 0.0  ;;  %v4507_v45 = vsel %vm5733_vm13, 1, %v4086_v1  ;;  %vm5732_vm15 = vcmp.ne.f32.partialorder %v4489_v41, 0.0  ;;  %vm858_vm5 = vcmp.ne.f32.partialorder %v116_v43, 0.0 }
  0x1e   :  { %3698 = vmatprep.subr.bf16.mxu1 %v5729_v3  ;;  %v876_v42 = vsel %vm860_vm11, 1, %v4086_v1  ;;  %v4516_v47 = vsel %vm5732_vm15, 1, %v4086_v1  ;;  %v874_v49 = vsel %vm858_vm5, 1, %v4086_v1  ;;  %vm859_vm9 = vcmp.ne.f32.partialorder %v4445_v24, 0.0 }
  0x1f   :  { %3679 = vmatmul.mubr.msk.bf16.vlgmr.msra.gmra.mrb[8].mxu0 %vm5740_vm3, %v167_v46  ;;  %225 = vperm.xlu0 %3859, %v109_v16   ;;  %v872_v46 = vsel %vm856_vm14, 1, %v4086_v1  ;;  %vm4581_vm10 = vcmp.eq.s32.totalorder %v792_v26, 1  ;;  %vm279_vm11 = vcmask 1044480   ;;  %vm4588_vm12 = vcmp.eq.s32.totalorder %v796_v31, 1 }
  0x20   :  { %3687 = vmatmul.mubr.msk.bf16.vlgmr.msra.gmra.mrb[8].mxu1 %vm5740_vm3, %v168_v53  ;;  %3691 = vmatpush3.bf16.msra.mxu0 %v3885_v54  ;;  %vm4600_vm14 = vcmp.eq.s32.totalorder %v800_v52, 1  ;;  %vm1062_vm5 = vcmask 64515   ;;  %vm1070_vm8 = vcmask 59392   ;;  %vm4610_vm15 = vcmp.eq.s32.totalorder %v804_v32, 1 }
  0x21   :  { %3699 = vmatpush3.bf16.msra.mxu1 %v3886_v57  ;;  %217 = vperm.xlu1 %3862, %v4384_v21   ;;  %vm989_vm13 = vcmask 1042432   ;;  %vm1066_vm4 = vcmask 64512  }
  0x22   :  { %3692 = vmatprep.subr.bf16.mxu0 %v5729_v3  ;;  %3700 = vmatprep.subr.bf16.mxu1 %v5729_v3 }
  0x23   :  { %3694 = vmatprep.mubr.msk.bf16.mxu0 %vm5741_vm0, %v5729_v3  ;;  %3702 = vmatprep.mubr.msk.bf16.mxu1 %vm5741_vm0, %v5729_v3 }
  0x24   :  { %3693 = vmatpush3.bf16.msra.mxu0 %v3887_v6  ;;  %237 = vperm.xlu0 %3859, %v112_v20  }
  0x25   :  { %3701 = vmatpush3.bf16.msra.mxu1 %v3888_v13  ;;  %3863 = vset.pattern.permute.xlu1 %v4089_v60 }
  0x26   :  { %887 = vperm.xlu1 %3863, %v4215_v27   ;;  %3712 = vmatprep.subr.bf16.mxu1 %v5729_v3 }
  0x27   :  { %3695 = vmatmul.mubr.msk.bf16.vlgmr.msra.gmra.mrb[12].mxu0 %vm5740_vm3, %v169_v22  ;;  %3706 = vmatprep.subr.bf16.mxu0 %v5729_v3 }
  0x28   :  { %3703 = vmatmul.mubr.msk.bf16.vlgmr.msra.gmra.mrb[12].mxu1 %vm5740_vm3, %v170_v19  ;;  %3708 = vmatprep.mubr.msk.bf16.mxu0 %vm5741_vm0, %v5729_v3 }
  0x29   :  { %3714 = vmatprep.mubr.msk.bf16.mxu1 %vm5741_vm0, %v5729_v3  ;;  %249 = vperm.xlu0 %3859, %v115_v12  }
  0x2a   :  { %893 = vperm.xlu1 %3863, %v864_v23  }
  0x2d   :  { %261 = vperm.xlu0 %3859, %v4445_v24  }
  0x2e   :  { %3864 = vset.pattern.permute.xlu1 %v4086_v1 }
  0x2f   :  { %221 = vperm.xlu1 %3864, %v4357_v50  }
  0x31   :  { %3871 = vset.pattern.permute.xlu0 %v4089_v60 }
  0x32   :  { %881 = vperm.xlu0 %3871, %v861_v30  }
  0x33   :  { %229 = vperm.xlu1 %3864, %v110_v29  }
  0x36   :  { %890 = vperm.xlu0 %3871, %v863_v33  }
  0x37   :  { %3865 = vset.pattern.permute.xlu1 %v4089_v60 }
  0x38   :  { %896 = vperm.xlu1 %3865, %v4257_v48  }
  0x3a   :  { %899 = vperm.xlu0 %3871, %v865_v35  }
  0x3c   :  { %902 = vperm.xlu1 %3865, %v866_v9  }
  0x3e   :  { %908 = vperm.xlu0 %3871, %v867_v15  }
  0x40   :  { %3866 = vset.pattern.permute.xlu1 %v4086_v1 }
  0x41   :  { %233 = vperm.xlu1 %3866, %v4468_v25  }
  0x42   :  { %917 = vperm.xlu0 %3871, %v869_v36  }
  0x45   :  { %241 = vperm.xlu1 %3866, %v113_v28  }
  0x46   :  { %926 = vperm.xlu0 %3871, %v871_v37  }
  0x49   :  { %3867 = vset.pattern.permute.xlu1 %v4089_v60 }
  0x4a   :  { %905 = vperm.xlu1 %3867, %v4316_v2   ;;  %935 = vperm.xlu0 %3871, %v873_v38  }
  0x4e   :  { %911 = vperm.xlu1 %3867, %v868_v39   ;;  %941 = vperm.xlu0 %3871, %v4407_v11  }
  0x52   :  { %3868 = vset.pattern.permute.xlu1 %v4086_v1  ;;  %947 = vperm.xlu0 %3871, %v876_v42  }
  0x53   :  { %245 = vperm.xlu1 %3868, %v4489_v41  }
  0x57   :  { %253 = vperm.xlu1 %3868, %v116_v43  }
  0x5b   :  { %3869 = vset.pattern.permute.xlu1 %v4089_v60 }
  0x5c   :  { %914 = vperm.xlu1 %3869, %v4378_v58  }
  0x60   :  { %920 = vperm.xlu1 %3869, %v870_v44  }
  0x64   :  { %3870 = vset.pattern.permute.xlu1 %v4086_v1 }
  0x65   :  { %257 = vperm.xlu1 %3870, %v4392_v62  }
  0x69   :  { %265 = vperm.xlu1 %3870, %v119_v40  }
  0x6d   :  { %3872 = vset.pattern.permute.xlu1 %v4089_v60  ;;  %v875_v60 = vsel %vm859_vm9, 1, %v4086_v1  ;;  %vm2392_vm9 = vcmask 63491  }
  0x6e   :  { %923 = vperm.xlu1 %3872, %v4507_v45  }
  0x72   :  { %929 = vperm.xlu1 %3872, %v872_v46  }
  0x76   :  { %932 = vperm.xlu1 %3872, %v4516_v47  }
  0x7a   :  { %938 = vperm.xlu1 %3872, %v874_v49  }
  0x7e   :  { %944 = vperm.xlu1 %3872, %v875_v60  }
  0x81   :  { %v182_v51 = vpop.permute.xlu1 %181 }
  0x82   :  { %v283_v42 = vrot.slane %v182_v51, 3  ;;  %v812_v51 = vrot.slane %v4507_v45, %v4179_v14 }
  0x83   :  { %v174_v6 = vpop.permute.xlu0 %173 }
  0x84   :  { %v280_v40 = vrot.slane %v174_v6, 3 }
  0x85   :  { %v186_v53 = vpop.permute.xlu1 %185 }
  0x86   :  { %v344_v44 = vrot.slane %v186_v53, 3 }
  0x87   :  { %v178_v1 = vpop.permute.xlu0 %177 }
  0x88   :  { %v281_v43 = vrot.slane %v178_v1, 3 }
  0x89   :  { %v4522_v54 = vpop.permute.xlu1 %193 }
  0x8a   :  { %v347_v18 = vrot.slane %v4522_v54, 3  ;;  %v282_v31 = vsel %vm279_vm11, %v280_v40, %v281_v43  ;;  %v284_v40 = vsel %vm279_vm11, %v281_v43, %v283_v42 }
  0x8b   :  { %v190_v13 = vpop.permute.xlu0 %189 }
  0x8c   :  { %v345_v46 = vrot.slane %v190_v13, 3 }
  0x8d   :  { %v4524_v55 = vpop.permute.xlu1 %201 }
  0x8e   :  { %v408_v48 = vrot.slane %v4524_v55, 3  ;;  %v346_v54 = vsel %vm279_vm11, %v344_v44, %v345_v46  ;;  %v348_v42 = vsel %vm279_vm11, %v345_v46, %v347_v18 }
  0x8f   :  { %v4544_v19 = vpop.permute.xlu0 %197 }
  0x90   :  { %v407_v53 = vrot.slane %v4544_v19, 3 }
  0x92   :  { %v4526_v56 = vpop.permute.xlu1 %878 }
  0x93   :  { %vm949_vm7 = vcmp.eq.s32.totalorder %v4526_v56, 1 }
  0x95   :  { %v4548_v23 = vpop.permute.xlu0 %205 }
  0x96   :  { %v4528_v57 = vpop.permute.xlu1 %884  ;;  %v410_v17 = vrot.slane %v4548_v23, 3 }
  0x97   :  { %vm951_vm6 = vcmp.eq.s32.totalorder %v4528_v57, 1 }
  0x9a   :  { %v4552_v24 = vpop.permute.xlu0 %213 }
  0x9b   :  { %v4530_v21 = vpop.permute.xlu1 %209 }
  0x9c   :  { %v470_v2 = vrot.slane %v4530_v21, 3 }
  0x9e   :  { %v4556_v30 = vpop.permute.xlu0 %225 }
  0x9f   :  { %v534_v60 = vrot.slane %v4556_v30, 3 }
  0xa0   :  { %v4532_v63 = vpop.permute.xlu1 %217 }
  0xa1   :  { %v473_v55 = vrot.slane %v4532_v63, 3 }
  0xa3   :  { %v4560_v9 = vpop.permute.xlu0 %237 }
  0xa5   :  { %v4534_v0 = vpop.permute.xlu1 %887 }
  0xa6   :  { %vm952_vm2 = vcmp.eq.s32.totalorder %v4534_v0, 1 }
  0xa8   :  { %v4564_v15 = vpop.permute.xlu0 %249 }
  0xa9   :  { %v4536_v7 = vpop.permute.xlu1 %893 }
  0xac   :  { %v4570_v37 = vpop.permute.xlu0 %261 }
  0xae   :  { %v4538_v10 = vpop.permute.xlu1 %221 }
  0xaf   :  { %v533_v30 = vrot.slane %v4538_v10, 3 }
  0xb1   :  { %v4574_v39 = vpop.permute.xlu0 %881  ;;  %v535_v45 = vsel %vm279_vm11, %v533_v30, %v534_v60 }
  0xb2   :  { %v4540_v16 = vpop.permute.xlu1 %229 }
  0xb5   :  { %v4604_v27 = vpop.permute.xlu0 %890 }
  0xb6   :  { %vm953_vm1 = vcmp.eq.s32.totalorder %v4604_v27, 1 }
  0xb7   :  { %v4542_v22 = vpop.permute.xlu1 %896 }
  0xbb   :  { %v4546_v20 = vpop.permute.xlu1 %902 }
  0xc0   :  { %v4550_v12 = vpop.permute.xlu1 %233 }
  0xc4   :  { %v4554_v29 = vpop.permute.xlu1 %241 }
  0xc9   :  { %v4558_v33 = vpop.permute.xlu1 %905 }
  0xca   :  { %vm958_vm3 = vcmp.eq.s32.totalorder %v4558_v33, 1 }
  0xcd   :  { %v4562_v35 = vpop.permute.xlu1 %911 }
  0xce   :  { %vm960_vm0 = vcmp.eq.s32.totalorder %v4562_v35, 1  ;;  %v5784_v35 = vrot.slane %v4570_v37, 3 }
  0xd2   :  { %v4566_v28 = vpop.permute.xlu1 %245 }
  0xd6   :  { %v4568_v36 = vpop.permute.xlu1 %253 }
  0xdb   :  { %v4572_v38 = vpop.permute.xlu1 %914 }
  0xdf   :  { %v4576_v49 = vpop.permute.xlu1 %920 }
  0xe1   :  { %v325_v6 = vpop.f32.mrb[0].mxu0 }
  0xe2   :  { %v326_v52 = vadd.f32 %v325_v6, %v282_v31  ;;  %v388_v1 = vpop.f32.mrb[0].mxu1  ;;  %v3648_v13 = vpop.f32.mrb[1].mxu0  ;;  %v471_v31 = vrot.slane %v4552_v24, 3 }
  0xe3   :  { %v389_v32 = vadd.f32 %v388_v1, %v346_v54  ;;  %v3656_v61 = vpop.f32.mrb[1].mxu1  ;;  %v328_v6 = vpop.f32.mrb[2].mxu0 }
  0xe4   :  { %v4620_v62 = vpop.permute.xlu1 %257  ;;  %v829_v44 = vsel %vm4581_vm10, %v326_v52, -1e+10  ;;  %v391_v43 = vpop.f32.mrb[2].mxu1  ;;  %v329_v21 = vadd.f32 %v328_v6, %v284_v40  ;;  %v409_v52 = vsel %vm279_vm11, %v407_v53, %v408_v48  ;;  %v472_v3 = vsel %vm279_vm11, %v470_v2, %v471_v31 }
  0xe5   :  { %v990_v19 = vrot.slane %v829_v44, 5  ;;  %v831_v23 = vsel %vm4588_vm12, %v389_v32, -1e+10  ;;  %v392_v54 = vadd.f32 %v391_v43, %v348_v42  ;;  %v3649_v61 = vpop.f32.mrb[3].mxu0  ;;  %v3657_v1 = vpop.f32.mrb[3].mxu1  ;;  %v411_v32 = vsel %vm279_vm11, %v408_v48, %v410_v17 }
  0xe6   :  { %v4631_v63 = vrot.slane %v831_v23, 5  ;;  %v830_v24 = vsel %vm4581_vm10, %v329_v21, -1e+10  ;;  %v4647_v44 = vpop.permute.xlu0 %899  ;;  %v474_v53 = vsel %vm279_vm11, %v471_v31, %v473_v55  ;;  %v5773_v42 = vrot.slane %v4378_v58, %v4179_v14 }
  0xe7   :  { %v832_v46 = vsel %vm4588_vm12, %v392_v54, -1e+10  ;;  %v4637_v18 = vsel %vm949_vm7, %v990_v19, -1e+10  ;;  %v991_v13 = vrot.slane %v830_v24, 5  ;;  %vm4661_vm10 = vcmp.eq.s32.totalorder %v812_v51, 1 }
  0xe8   :  { %v4641_v40 = vpop.permute.xlu1 %265  ;;  %v1063_v56 = vsel %vm1062_vm5, %v4637_v18, -inf  ;;  %v4652_v0 = vsel %vm952_vm2, %v4631_v63, -1e+10  ;;  %vm4657_vm7 = vcmp.eq.s32.totalorder %v5773_v42, 1  ;;  %v597_v48 = vrot.slane %v4560_v9, 3 }
  0xe9   :  { %1064 = vmax.xlane.f32.xlu1 %v1063_v56  ;;  %v451_v6 = vpop.f32.mrb[4].mxu0  ;;  %v4671_v23 = vsel %vm951_vm6, %v991_v13, -1e+10  ;;  %vm950_vm2 = vcmp.eq.s32.totalorder %v4574_v39, 1  ;;  %v2400_v10 = vsel %vm2392_vm9, %v4652_v0, -inf  ;;  %v1074_v1 = vsel %vm1062_vm5, %v4652_v0, -inf }
  0xea   :  { %v514_v2 = vpop.f32.mrb[4].mxu1  ;;  %v4667_v55 = vadd.f32 %v451_v6, %v409_v52  ;;  %v3664_v31 = vpop.f32.mrb[5].mxu0  ;;  %v1071_v51 = vsel %vm1070_vm8, %v4671_v23, -inf  ;;  %v2401_v24 = vrot.slane %v2400_v10, 4  ;;  %v994_v56 = vrot.slane %v832_v46, 5 }
  0xeb   :  { %v515_v58 = vadd.f32 %v514_v2, %v472_v3  ;;  %v3672_v21 = vpop.f32.mrb[5].mxu1  ;;  %v454_v54 = vpop.f32.mrb[6].mxu0  ;;  %1072 = vmax.xlane.f32.xlu0 %v1071_v51  ;;  %v992_v42 = vsel %vm989_vm13, %v990_v19, %v991_v13  ;;  %v596_v31 = vrot.slane %v4550_v12, 3  ;;  %vm954_vm6 = vcmp.eq.s32.totalorder %v4536_v7, 1 }
  0xec   :  { %v833_v9 = vsel %vm4600_vm14, %v4667_v55, -1e+10  ;;  %v517_v61 = vpop.f32.mrb[6].mxu1  ;;  %v4681_v57 = vadd.f32 %v454_v54, %v411_v32  ;;  %v3665_v2 = vpop.f32.mrb[7].mxu0  ;;  %v536_v32 = vrot.slane %v4540_v16, 3  ;;  %v599_v21 = vrot.slane %v4554_v29, 3 }
  0xed   :  { %v4685_v52 = vpop.permute.xlu1 %923  ;;  %v835_v3 = vsel %vm4610_vm15, %v515_v58, -1e+10  ;;  %v4689_v6 = vadd.f32 %v517_v61, %v474_v53  ;;  %1075 = vmax.xlane.f32.xlu1 %v1074_v1  ;;  %v3673_v55 = vpop.f32.mrb[7].mxu1  ;;  %vm2449_vm12 = vcmask 64519   ;;  %v4704_v19 = vsel %vm950_vm2, %v992_v42, -1e+10 }
  0xee   :  { %v834_v46 = vsel %vm4600_vm14, %v4681_v57, -1e+10  ;;  %v660_v16 = vrot.slane %v4564_v15, 3  ;;  %v4708_v12 = vpop.permute.xlu0 %908  ;;  %v2402_v29 = vmax.f32 %v2400_v10, %v2401_v24  ;;  %v1067_v13 = vsel %vm1066_vm4, %v4704_v19, -inf }
  0xef   :  { %v836_v53 = vsel %vm4610_vm15, %v4689_v6, -1e+10  ;;  %v5743_v7 = vrot.slane %v4570_v37, 3  ;;  %1068 = vmax.xlane.f32.xlu0 %v1067_v13  ;;  %v4713_v58 = vsel %vm954_vm6, %v994_v56, -1e+10  ;;  %v995_v51 = vsel %vm989_vm13, %v4631_v63, %v994_v56 }
  0xf0   :  { %v659_v54 = vrot.slane %v4566_v28, 3  ;;  %v598_v10 = vsel %vm279_vm11, %v596_v31, %v597_v48  ;;  %v600_v24 = vsel %vm279_vm11, %v597_v48, %v599_v21  ;;  %v537_v6 = vsel %vm279_vm11, %v534_v60, %v536_v32 }
  0xf1   :  { %v4718_v15 = vpop.permute.xlu1 %929  ;;  %v1080_v30 = vsel %vm1070_vm8, %v4713_v58, -inf  ;;  %v4730_v63 = vsel %vm953_vm1, %v995_v51, -1e+10  ;;  %v662_v56 = vrot.slane %v4568_v36, 3  ;;  %v4733_v31 = vrot.slane %v835_v3, 5 }
  0xf2   :  { %v577_v39 = vpop.f32.mrb[8].mxu0  ;;  %v2403_v13 = vrot.slane %v2402_v29, 2  ;;  %1081 = vmax.xlane.f32.xlu1 %v1080_v30  ;;  %v1077_v60 = vsel %vm1066_vm4, %v4730_v63, -inf  ;;  %v5778_v32 = vrot.slane %v4407_v11, %v4179_v14  ;;  %v5781_v11 = vrot.slane %v4516_v47, %v4179_v14 }
  0xf3   :  { %v640_v61 = vpop.f32.mrb[8].mxu1  ;;  %v3680_v1 = vpop.f32.mrb[9].mxu0  ;;  %v4726_v2 = vadd.f32 %v577_v39, %v535_v45  ;;  %v2460_v45 = vsel %vm1070_vm8, %v4730_v63, -inf  ;;  %1078 = vmax.xlane.f32.xlu0 %v1077_v60  ;;  %vm955_vm2 = vcmp.eq.s32.totalorder %v4542_v22, 1  ;;  %v2529_v14 = vsel %vm2392_vm9, %v4730_v63, -inf }
  0xf4   :  { %v641_v42 = vadd.f32 %v640_v61, %v598_v10  ;;  %v3688_v55 = vpop.f32.mrb[9].mxu1  ;;  %v580_v28 = vpop.f32.mrb[10].mxu0  ;;  %vm4740_vm15 = vcmp.eq.s32.totalorder %v5778_v32, 1  ;;  %vm4756_vm1 = vcmp.eq.s32.totalorder %v5781_v11, 1  ;;  %v722_v10 = vrot.slane %v4620_v62, 3 }
  0xf5   :  { %v643_v48 = vpop.f32.mrb[10].mxu1  ;;  %v837_v36 = vsel %vm4657_vm7, %v4726_v2, -1e+10  ;;  %v3681_v39 = vpop.f32.mrb[11].mxu0  ;;  %v4762_v61 = vrot.slane %v833_v9, 5  ;;  %v2459_v1 = vsel %vm2449_vm12, %v4652_v0, -inf  ;;  %v4771_v47 = vadd.f32 %v580_v28, %v537_v6 }
  0xf6   :  { %v839_v27 = vsel %vm4661_vm10, %v641_v42, -1e+10  ;;  %v4749_v3 = vadd.f32 %v643_v48, %v600_v24  ;;  %v3689_v24 = vpop.f32.mrb[11].mxu1  ;;  %v2461_v30 = vmax.f32 %v2459_v1, %v2460_v45  ;;  %v4773_v2 = vpop.permute.xlu1 %932  ;;  %vm957_vm6 = vcmp.eq.s32.totalorder %v4546_v20, 1 }
  0xf7   :  { %v661_v62 = vsel %vm279_vm11, %v659_v54, %v660_v16  ;;  %v4779_v9 = vpop.permute.xlu0 %917  ;;  %v4781_v17 = vmax.f32 %v2402_v29, %v2403_v13  ;;  %v4787_v6 = vsel %vm958_vm3, %v4733_v31, -1e+10  ;;  %v663_v28 = vsel %vm279_vm11, %v660_v16, %v662_v56 }
  0xf8   :  { %v840_v42 = vsel %vm4661_vm10, %v4749_v3, -1e+10  ;;  %v725_v48 = vrot.slane %v4641_v40, 3  ;;  %v4791_v33 = vrot.slane %v836_v53, 5  ;;  %v2530_v60 = vrot.slane %v2529_v14, 4 }
  0xf9   :  { %v1092_v54 = vsel %vm1062_vm5, %v4787_v6, -inf  ;;  %vm956_vm10 = vcmp.eq.s32.totalorder %v4647_v44, 1  ;;  %v2462_v13 = vrot.slane %v2461_v30, 4  ;;  %v2414_v3 = vsel %vm2392_vm9, %v4787_v6, -inf }
  0xfa   :  { %v703_v29 = vpop.f32.mrb[12].mxu0  ;;  %1093 = vmax.xlane.f32.xlu1 %v1092_v54  ;;  %v4801_v16 = vsel %vm955_vm2, %v4762_v61, -1e+10  ;;  %v724_v40 = vsel %vm279_vm11, %v722_v10, %v5743_v7  ;;  %v997_v45 = vrot.slane %v834_v46, 5  ;;  %v2415_v39 = vrot.slane %v2414_v3, 4  ;;  %v4818_v26 = vpop.permute.xlu1 %938 }
  0xfb   :  { %v766_v32 = vpop.f32.mrb[12].mxu1  ;;  %v3696_v53 = vpop.f32.mrb[13].mxu0  ;;  %v1083_v11 = vsel %vm1062_vm5, %v4801_v16, -inf  ;;  %v2407_v22 = vsel %vm2392_vm9, %v4801_v16, -inf  ;;  %vm964_vm3 = vcmp.eq.s32.totalorder %v4685_v52, 1  ;;  %v4816_v10 = vrot.slane %v839_v27, 5 }
  0xfc   :  { %v3704_v56 = vpop.f32.mrb[13].mxu1  ;;  %v706_v24 = vpop.f32.mrb[14].mxu0  ;;  %v2408_v53 = vrot.slane %v2407_v22, 4  ;;  %1084 = vmax.xlane.f32.xlu0 %v1083_v11  ;;  %vm959_vm14 = vcmp.eq.s32.totalorder %v4708_v12, 1  ;;  %v4821_v46 = vmax.f32 %v2529_v14, %v2530_v60  ;;  %v767_v55 = vadd.f32 %v766_v32, %v724_v40 }
  0xfd   :  { %v769_v1 = vpop.f32.mrb[14].mxu1  ;;  %v2416_v56 = vmax.f32 %v2414_v3, %v2415_v39  ;;  %v4826_v7 = vsel %vm960_vm0, %v4791_v33, -1e+10  ;;  %v3697_v54 = vpop.f32.mrb[15].mxu0  ;;  %v4828_v41 = vrot.slane %v837_v36, 5  ;;  %v4830_v27 = vmax.f32 %v2461_v30, %v2462_v13 }
  0xfe   :  { %v3705_v57 = vpop.f32.mrb[15].mxu1  ;;  %v1098_v11 = vsel %vm1070_vm8, %v4826_v7, -inf  ;;  %v4836_v25 = vpop.permute.xlu0 %926  ;;  %v2409_v14 = vmax.f32 %v2407_v22, %v2408_v53  ;;  %v843_v60 = vsel %vm4740_vm15, %v767_v55, -1e+10  ;;  %v726_v32 = vsel %vm279_vm11, %v5784_v35, %v725_v48 }
  0xff   :  { %v4834_v57 = vadd.f32 %v703_v29, %v661_v62  ;;  %1099 = vmax.xlane.f32.xlu1 %v1098_v11  ;;  %v4845_v36 = vsel %vm957_vm6, %v997_v45, -1e+10  ;;  %v4847_v30 = vrot.slane %v840_v42, 5  ;;  %v2417_v13 = vrot.slane %v2416_v56, 2  ;;  %v945_v22 = vpop.permute.xlu1 %944 }
 0x100   :  { %v770_v29 = vadd.f32 %v769_v1, %v726_v32  ;;  %v2532_v3 = vrot.slane %v4821_v46, 2  ;;  %v2477_v55 = vsel %vm2449_vm12, %v4787_v6, -inf  ;;  %v1089_v37 = vsel %vm1070_vm8, %v4845_v36, -inf }
 0x101   :  { %v841_v62 = vsel %vm4756_vm1, %v4834_v57, -1e+10  ;;  %v707_v48 = vadd.f32 %v706_v24, %v663_v28  ;;  %vm961_vm0 = vcmp.eq.s32.totalorder %v4572_v38, 1  ;;  %v2464_v20 = vrot.slane %v4830_v27, 2  ;;  %1090 = vmax.xlane.f32.xlu0 %v1089_v37 }
 0x102   :  { %v2468_v42 = vsel %vm2449_vm12, %v4801_v16, -inf  ;;  %v844_v40 = vsel %vm4740_vm15, %v770_v29, -1e+10  ;;  %v998_v39 = vsel %vm989_vm13, %v4762_v61, %v997_v45  ;;  %v2410_v1 = vrot.slane %v2409_v14, 2  ;;  %v4881_v45 = vpop.permute.xlu0 %935 }
 0x103   :  { %v4865_v54 = vrot.slane %v844_v40, 5  ;;  %v842_v28 = vsel %vm4756_vm1, %v707_v48, -1e+10  ;;  %v4871_v24 = vsel %vm956_vm10, %v998_v39, -1e+10  ;;  %v4873_v53 = vmax.f32 %v2416_v56, %v2417_v13 }
 0x104   :  { %v4875_v11 = vrot.slane %v843_v60, 5  ;;  %v1086_v21 = vsel %vm1066_vm4, %v4871_v24, -inf  ;;  %v2469_v61 = vsel %vm1070_vm8, %v4871_v24, -inf  ;;  %v2536_v51 = vsel %vm2392_vm9, %v4871_v24, -inf }
 0x105   :  { %v2470_v57 = vmax.f32 %v2468_v42, %v2469_v61  ;;  %1087 = vmax.xlane.f32.xlu1 %v1086_v21  ;;  %v1001_v44 = vsel %vm989_vm13, %v4733_v31, %v4791_v33  ;;  %vm971_vm11 = vcmp.eq.s32.totalorder %v945_v22, 1  ;;  %vm963_vm15 = vcmp.eq.s32.totalorder %v4576_v49, 1 }
 0x106   :  { %v2537_v56 = vrot.slane %v2536_v51, 4  ;;  %v4891_v60 = vsel %vm959_vm14, %v1001_v44, -1e+10  ;;  %v1013_v35 = vsel %vm989_vm13, %v4875_v11, %v4865_v54  ;;  %v4899_v32 = vsel %vm964_vm3, %v4816_v10, -1e+10 }
 0x107   :  { %v2471_v13 = vrot.slane %v2470_v57, 4  ;;  %v1095_v31 = vsel %vm1066_vm4, %v4891_v60, -inf  ;;  %v2478_v33 = vsel %vm1070_vm8, %v4891_v60, -inf  ;;  %v2543_v12 = vsel %vm2392_vm9, %v4891_v60, -inf }
 0x108   :  { %v2538_v29 = vmax.f32 %v2536_v51, %v2537_v56  ;;  %v2479_v37 = vmax.f32 %v2477_v55, %v2478_v33  ;;  %v2544_v48 = vrot.slane %v2543_v12, 4  ;;  %1096 = vmax.xlane.f32.xlu0 %v1095_v31  ;;  %v4907_v42 = vsel %vm971_vm11, %v1013_v35, -1e+10 }
 0x109   :  { %vm962_vm1 = vcmp.eq.s32.totalorder %v4779_v9, 1  ;;  %vm965_vm2 = vcmp.eq.s32.totalorder %v4836_v25, 1  ;;  %v4911_v52 = vmax.f32 %v2409_v14, %v2410_v1  ;;  %v2472_v40 = vmax.f32 %v2470_v57, %v2471_v13  ;;  %v942_v14 = vpop.permute.xlu0 %941 }
 0x10a   :  { %v2571_v39 = vsel %vm2392_vm9, %v4907_v42, -inf  ;;  %v1110_v22 = vsel %vm1062_vm5, %v4899_v32, -inf  ;;  %v4918_v21 = vmax.f32 %v4821_v46, %v2532_v3  ;;  %v5785_v55 = vsel %vm4657_vm7, %v4771_v47, -1e+10 }
 0x10b   :  { %v1003_v61 = vrot.slane %v5785_v55, 5  ;;  %vm966_vm6 = vcmp.eq.s32.totalorder %v4718_v15, 1  ;;  %v2572_v51 = vrot.slane %v2571_v39, 4  ;;  %1111 = vmax.xlane.f32.xlu1 %v1110_v22  ;;  %v4926_v1 = vmax.f32 %v4830_v27, %v2464_v20 }
 0x10c   :  { %v4928_v57 = vrot.slane %v841_v62, 5  ;;  %v2428_v44 = vsel %vm2392_vm9, %v4899_v32, -inf  ;;  %v4935_v43 = vsel %vm961_vm0, %v4828_v41, -1e+10  ;;  %vm970_vm7 = vcmp.eq.s32.totalorder %v942_v14, 1 }
 0x10d   :  { %v2539_v46 = vrot.slane %v2538_v29, 2  ;;  %v2480_v3 = vrot.slane %v2479_v37, 4  ;;  %v4938_v56 = vmax.f32 %v2543_v12, %v2544_v48  ;;  %v2473_v20 = vrot.slane %v2472_v40, 2 }
 0x10e   :  { %v1101_v62 = vsel %vm1062_vm5, %v4935_v43, -inf  ;;  %v2421_v35 = vsel %vm2392_vm9, %v4935_v43, -inf  ;;  %vm967_vm10 = vcmp.eq.s32.totalorder %v4773_v2, 1  ;;  %v4946_v38 = vrot.slane %v842_v28, 5 }
 0x10f   :  { %v2514_v13 = vsel %vm1070_vm8, %v4907_v42, -inf  ;;  %v2573_v31 = vmax.f32 %v2571_v39, %v2572_v51  ;;  %v2429_v33 = vrot.slane %v2428_v44, 4  ;;  %1102 = vmax.xlane.f32.xlu0 %v1101_v62  ;;  %v2495_v12 = vsel %vm2449_vm12, %v4899_v32, -inf }
 0x110   :  { %v2422_v48 = vrot.slane %v2421_v35, 4  ;;  %v4955_v22 = vsel %vm966_vm6, %v4847_v30, -1e+10  ;;  %v4959_v55 = vsel %vm963_vm15, %v1003_v61, -1e+10  ;;  %v4961_v28 = vmax.f32 %v2538_v29, %v2539_v46 }
 0x111   :  { %v2481_v47 = vmax.f32 %v2479_v37, %v2480_v3  ;;  %v2546_v39 = vrot.slane %v4938_v56, 2  ;;  %v1116_v51 = vsel %vm1070_vm8, %v4955_v22, -inf  ;;  %v4966_v62 = vmax.f32 %v2472_v40, %v2473_v20 }
 0x112   :  { %1117 = vmax.xlane.f32.xlu1 %v1116_v51  ;;  %v1107_v15 = vsel %vm1070_vm8, %v4959_v55, -inf  ;;  %v1004_v27 = vsel %vm989_vm13, %v4828_v41, %v1003_v61  ;;  %v1007_v49 = vsel %vm989_vm13, %v4816_v10, %v4847_v30  ;;  %v2574_v29 = vrot.slane %v2573_v31, 2 }
 0x113   :  { %v2430_v37 = vmax.f32 %v2428_v44, %v2429_v33  ;;  %1108 = vmax.xlane.f32.xlu0 %v1107_v15  ;;  %v4977_v46 = vsel %vm962_vm1, %v1004_v27, -1e+10  ;;  %v4981_v40 = vsel %vm965_vm2, %v1007_v49, -1e+10  ;;  %v2423_v3 = vmax.f32 %v2421_v35, %v2422_v48  ;;  %v948_v44 = vpop.permute.xlu0 %947 }
 0x114   :  { %v2486_v20 = vsel %vm2449_vm12, %v4935_v43, -inf  ;;  %v2487_v41 = vsel %vm1070_vm8, %v4977_v46, -inf  ;;  %v2550_v10 = vsel %vm2392_vm9, %v4977_v46, -inf  ;;  %vm968_vm3 = vcmp.eq.s32.totalorder %v4881_v45, 1 }
 0x115   :  { %vm969_vm14 = vcmp.eq.s32.totalorder %v4818_v26, 1  ;;  %v2482_v9 = vrot.slane %v2481_v47, 2  ;;  %v1104_v25 = vsel %vm1066_vm4, %v4977_v46, -inf  ;;  %v2488_v30 = vmax.f32 %v2486_v20, %v2487_v41 }
 0x116   :  { %v2551_v61 = vrot.slane %v2550_v10, 4  ;;  %1105 = vmax.xlane.f32.xlu1 %v1104_v25  ;;  %v1113_v27 = vsel %vm1066_vm4, %v4981_v40, -inf  ;;  %v2496_v35 = vsel %vm1070_vm8, %v4981_v40, -inf  ;;  %v2557_v33 = vsel %vm2392_vm9, %v4981_v40, -inf }
 0x117   :  { %v5001_v48 = vsel %vm970_vm7, %v4875_v11, -1e+10  ;;  %v5003_v51 = vmax.f32 %v2573_v31, %v2574_v29  ;;  %v2431_v15 = vrot.slane %v2430_v37, 2  ;;  %v2489_v49 = vrot.slane %v2488_v30, 4  ;;  %1114 = vmax.xlane.f32.xlu0 %v1113_v27 }
 0x118   :  { %v2497_v20 = vmax.f32 %v2495_v12, %v2496_v35  ;;  %v2424_v41 = vrot.slane %v2423_v3, 2  ;;  %v2552_v25 = vmax.f32 %v2550_v10, %v2551_v61  ;;  %v2558_v50 = vrot.slane %v2557_v33, 4 }
 0x119   :  { %v2442_v59 = vsel %vm2392_vm9, %v5001_v48, -inf  ;;  %vm972_vm0 = vcmp.eq.s32.totalorder %v948_v44, 1  ;;  %v1128_v4 = vsel %vm1062_vm5, %v5001_v48, -inf  ;;  %v2513_v11 = vsel %vm2449_vm12, %v5001_v48, -inf }
 0x11a   :  { %v2498_v34 = vrot.slane %v2497_v20, 4  ;;  %v2443_v14 = vrot.slane %v2442_v59, 4  ;;  %v2490_v31 = vmax.f32 %v2488_v30, %v2489_v49  ;;  %v2515_v29 = vmax.f32 %v2513_v11, %v2514_v13  ;;  %1129 = vmax.xlane.f32.xlu1 %v1128_v4 }
 0x11b   :  { %v5014_v12 = vsel %vm967_vm10, %v4928_v57, -1e+10  ;;  %v1010_v10 = vsel %vm989_vm13, %v4928_v57, %v4946_v38  ;;  %v5019_v61 = vmax.f32 %v2481_v47, %v2482_v9  ;;  %v5022_v27 = vmax.f32 %v4938_v56, %v2546_v39 }
 0x11c   :  { %5786 = vst [vmem:[#allocation11_spill] sm:$0xff] %v5014_v12  ;;  %v2559_v35 = vmax.f32 %v2557_v33, %v2558_v50  ;;  %v2444_v5 = vmax.f32 %v2442_v59, %v2443_v14  ;;  %v2516_v13 = vrot.slane %v2515_v29, 4  ;;  %v1119_v4 = vsel %vm1062_vm5, %v5014_v12, -inf }
 0x11d   :  { %v2435_v2 = vsel %vm2392_vm9, %v5014_v12, -inf  ;;  %v5029_v49 = vmax.f32 %v2430_v37, %v2431_v15  ;;  %v5031_v11 = vmax.f32 %v2423_v3, %v2424_v41  ;;  %v2499_v57 = vmax.f32 %v2497_v20, %v2498_v34  ;;  %1120 = vmax.xlane.f32.xlu0 %v1119_v4 }
 0x11e   :  { %v2436_v47 = vrot.slane %v2435_v2, 4  ;;  %v2491_v56 = vrot.slane %v2490_v31, 2  ;;  %v2553_v39 = vrot.slane %v2552_v25, 2  ;;  %v2445_v50 = vrot.slane %v2444_v5, 2 }
 0x11f   :  { %v5035_v59 = vsel %vm968_vm3, %v1010_v10, -1e+10  ;;  %vm2578_vm11 = vcmask 1040384   ;;  %v2560_v9 = vrot.slane %v2559_v35, 2  ;;  %v2517_v33 = vmax.f32 %v2515_v29, %v2516_v13 }
 0x120   :  { %5787 = vst [vmem:[#allocation12_spill] sm:$0xff] %v5035_v59  ;;  %v2437_v14 = vmax.f32 %v2435_v2, %v2436_v47  ;;  %v1122_v37 = vsel %vm1066_vm4, %v5035_v59, -inf  ;;  %vm2587_vm15 = vcmask 1041408   ;;  %v2504_v34 = vsel %vm2449_vm12, %v5014_v12, -inf }
 0x121   :  { %v2505_v3 = vsel %vm1070_vm8, %v5035_v59, -inf  ;;  %v2564_v15 = vsel %vm2392_vm9, %v5035_v59, -inf  ;;  %1123 = vmax.xlane.f32.xlu1 %v1122_v37  ;;  %v5048_v45 = vsel %vm969_vm14, %v4946_v38, -1e+10  ;;  %v2433_v20 = vrot.slane %v5029_v49, 1 }
 0x122   :  { %5788 = vst [vmem:[#allocation13_spill] sm:$0xff] %v5048_v45  ;;  %v2500_v41 = vrot.slane %v2499_v57, 2  ;;  %v2506_v29 = vmax.f32 %v2504_v34, %v2505_v3  ;;  %v2565_v10 = vrot.slane %v2564_v15, 4  ;;  %v5051_v13 = vmax.f32 %v2444_v5, %v2445_v50 }
 0x123   :  { %v2438_v4 = vrot.slane %v2437_v14, 2  ;;  %v1125_v2 = vsel %vm1070_vm8, %v5048_v45, -inf  ;;  %v5057_v47 = vsel %vm972_vm0, %v4865_v54, -1e+10  ;;  %v2426_v37 = vrot.slane %v5031_v11, 1 }
 0x124   :  { %v2507_v26 = vrot.slane %v2506_v29, 4  ;;  %v2566_v38 = vmax.f32 %v2564_v15, %v2565_v10  ;;  %1126 = vmax.xlane.f32.xlu0 %v1125_v2  ;;  %v1134_v30 = vsel %vm1070_vm8, %v5057_v47, -inf  ;;  %v2492_v34 = vmax.f32 %v2490_v31, %v2491_v56 }
 0x125   :  { %v2554_v3 = vmax.f32 %v2552_v25, %v2553_v39  ;;  %v2561_v5 = vmax.f32 %v2559_v35, %v2560_v9  ;;  %v2518_v50 = vrot.slane %v2517_v33, 2  ;;  %1135 = vmax.xlane.f32.xlu1 %v1134_v30  ;;  %v2501_v8 = vmax.f32 %v2499_v57, %v2500_v41 }
 0x126   :  { %v2508_v59 = vmax.f32 %v2506_v29, %v2507_v26  ;;  %v2567_v45 = vrot.slane %v2566_v38, 2  ;;  %v2466_v44 = vrot.slane %v4926_v1, 1  ;;  %v2447_v54 = vrot.slane %v5051_v13, 1 }
 0x127   :  { %v2439_v12 = vmax.f32 %v2437_v14, %v2438_v4  ;;  %v1131_v15 = vsel %vm1066_vm4, %v4907_v42, -inf  ;;  %v2534_v10 = vrot.slane %v4918_v21, 1  ;;  %v5789_v25 = vrot.slane %v4781_v17, 1 }
 0x128   :  { %v2509_v2 = vrot.slane %v2508_v59, 2  ;;  %1132 = vmax.xlane.f32.xlu0 %v1131_v15  ;;  %v2467_v35 = vmax.f32 %v4926_v1, %v2466_v44  ;;  %v2475_v30 = vrot.slane %v4966_v62, 1  ;;  %v2519_v57 = vmax.f32 %v2517_v33, %v2518_v50 }
 0x129   :  { %v2406_v31 = vmax.f32 %v4781_v17, %v5789_v25  ;;  %v2535_v56 = vmax.f32 %v4918_v21, %v2534_v10  ;;  %v5790_v39 = vrot.slane %v4911_v52, 1  ;;  %v2541_v14 = vrot.slane %v4961_v28, 1 }
 0x12a   :  { %v2510_v41 = vmax.f32 %v2508_v59, %v2509_v2  ;;  %v2568_v29 = vmax.f32 %v2566_v38, %v2567_v45  ;;  %v2476_v26 = vmax.f32 %v4966_v62, %v2475_v30  ;;  %v2484_v33 = vrot.slane %v5019_v61, 1 }
 0x12b   :  { %v2413_v9 = vmax.f32 %v4911_v52, %v5790_v39  ;;  %v2580_v4 = vsel %vm2578_vm11, %v2406_v31, %v2467_v35  ;;  %v2542_v1 = vmax.f32 %v4961_v28, %v2541_v14  ;;  %v2548_v21 = vrot.slane %v5022_v27, 1 }
 0x12c   :  { %v5080_v17 = vsel %vm2587_vm15, %v2580_v4, %v2535_v56  ;;  %v2440_v50 = vrot.slane %v2439_v12, 1  ;;  %v2493_v44 = vrot.slane %v2492_v34, 1  ;;  %v2555_v15 = vrot.slane %v2554_v3, 1 }
 0x12d   :  { %v2581_v52 = vsel %vm2578_vm11, %v2413_v9, %v2476_v26  ;;  %v5791_v45 = vrot.slane %v4873_v53, 1  ;;  %v2485_v38 = vmax.f32 %v5019_v61, %v2484_v33  ;;  %v2427_v28 = vmax.f32 %v5031_v11, %v2426_v37 }
 0x12e   :  { %v5087_v59 = vsel %vm2587_vm15, %v2581_v52, %v2542_v1  ;;  %v2549_v10 = vmax.f32 %v5022_v27, %v2548_v21  ;;  %v2494_v2 = vmax.f32 %v2492_v34, %v2493_v44  ;;  %v2502_v25 = vrot.slane %v2501_v8, 1 }
 0x12f   :  { %v2420_v62 = vmax.f32 %v4873_v53, %v5791_v45  ;;  %v2562_v31 = vrot.slane %v2561_v5, 1  ;;  %v2556_v30 = vmax.f32 %v2554_v3, %v2555_v15  ;;  %v2511_v56 = vrot.slane %v2510_v41, 1 }
 0x130   :  { %v2569_v39 = vrot.slane %v2568_v29, 1  ;;  %v2583_v14 = vsel %vm2578_vm11, %v2427_v28, %v2494_v2  ;;  %v2434_v53 = vmax.f32 %v5029_v49, %v2433_v20  ;;  %v2503_v61 = vmax.f32 %v2501_v8, %v2502_v25 }
 0x131   :  { %v2582_v35 = vsel %vm2578_vm11, %v2420_v62, %v2485_v38  ;;  %v5102_v11 = vsel %vm2587_vm15, %v2583_v14, %v2556_v30  ;;  %v2563_v27 = vmax.f32 %v2561_v5, %v2562_v31  ;;  %v2441_v37 = vmax.f32 %v2439_v12, %v2440_v50 }
 0x132   :  { %v5097_v9 = vsel %vm2587_vm15, %v2582_v35, %v2549_v10  ;;  %v2512_v34 = vmax.f32 %v2510_v41, %v2511_v56  ;;  %v2584_v4 = vsel %vm2578_vm11, %v2434_v53, %v2503_v61  ;;  %v2570_v26 = vmax.f32 %v2568_v29, %v2569_v39 }
 0x133   :  { %v2520_v3 = vrot.slane %v2519_v57, 1  ;;  %v5106_v1 = vsel %vm2587_vm15, %v2584_v4, %v2563_v27  ;;  %v2448_v8 = vmax.f32 %v5051_v13, %v2447_v54  ;;  %v5792_v20 = vrot.slane %v5003_v51, 1 }
 0x134   :  { %v2585_v33 = vsel %vm2578_vm11, %v2441_v37, %v2512_v34  ;;  %vm1345_vm1 = vsmask.f32 6400  ;;  %vm5797_vm2 = vmmov 0  }
 0x135   :  { %v5110_v21 = vsel %vm2587_vm15, %v2585_v33, %v2570_v26  ;;  %v2521_v49 = vmax.f32 %v2519_v57, %v2520_v3  ;;  %v2577_v12 = vmax.f32 %v5003_v51, %v5792_v20 }
 0x137   :  { %v2586_v5 = vsel %vm2578_vm11, %v2448_v8, %v2521_v49 }
 0x138   :  { %v5118_v41 = vsel %vm2587_vm15, %v2586_v5, %v2577_v12 }
 0x176   :  { %v1065_v29 = vpop.xlane.xlu1 %1064 }
 0x177   :  { %v1137_v50 = vsub.f32 %v4637_v18, %v1065_v29 }
 0x178   :  { %v1073_v44 = vpop.xlane.xlu0 %1072 }
 0x179   :  { %v1161_v52 = vmul.f32 1.442695, %v1137_v50  ;;  %v1139_v15 = vsub.f32 %v4671_v23, %v1073_v44 }
 0x17a   :  { %v1076_v45 = vpop.xlane.xlu1 %1075 }
 0x17b   :  { %3909 = vpow2.f32 %v1161_v52  ;;  %v1140_v13 = vsub.f32 %v4652_v0, %v1076_v45  ;;  %v1165_v54 = vmul.f32 1.442695, %v1139_v15 }
 0x17c   :  { %v1069_v51 = vpop.xlane.xlu0 %1068 }
 0x17d   :  { %v1167_v57 = vmul.f32 1.442695, %v1140_v13  ;;  %3911 = vpow2.f32 %v1165_v54  ;;  %v1138_v62 = vsub.f32 %v4704_v19, %v1069_v51 }
 0x17f   :  { %3913 = vpow2.f32 %v1167_v57  ;;  %v1082_v38 = vpop.xlane.xlu1 %1081  ;;  %v1163_v25 = vmul.f32 1.442695, %v1138_v62 }
 0x180   :  { %v1142_v28 = vsub.f32 %v4713_v58, %v1082_v38  ;;  %v1079_v10 = vpop.xlane.xlu0 %1078 }
 0x181   :  { %v1141_v2 = vsub.f32 %v4730_v63, %v1079_v10 }
 0x182   :  { %v1171_v31 = vmul.f32 1.442695, %v1142_v28 }
 0x183   :  { %v1169_v35 = vmul.f32 1.442695, %v1141_v2 }
 0x184   :  { %3915 = vpow2.f32 %v1171_v31 }
 0x185   :  { %v5126_v23 = vpop.eup %3909  ;;  %3917 = vpow2.f32 %v1169_v35 }
 0x186   :  { %v1209_v0 = vsel %vm1062_vm5, %v5126_v23, 0.0  ;;  %3919 = vpow2.f32 %v1163_v25 }
 0x187   :  { %1210 = vadd.xlane.f32.xlu0 %v1209_v0  ;;  %v5130_v30 = vpop.eup %3911  ;;  %v1094_v56 = vpop.xlane.xlu1 %1093 }
 0x188   :  { %v1146_v58 = vsub.f32 %v4787_v6, %v1094_v56  ;;  %v1215_v14 = vsel %vm1070_vm8, %v5130_v30, 0.0 }
 0x189   :  { %v5132_v39 = vpop.eup %3913  ;;  %v1085_v63 = vpop.xlane.xlu0 %1084 }
 0x18a   :  { %v1218_v53 = vsel %vm1062_vm5, %v5132_v39, 0.0  ;;  %v1179_v61 = vmul.f32 1.442695, %v1146_v58  ;;  %v1143_v27 = vsub.f32 %v4801_v16, %v1085_v63 }
 0x18b   :  { %1216 = vadd.xlane.f32.xlu0 %v1215_v14  ;;  %1219 = vadd.xlane.f32.xlu1 %v1218_v53 }
 0x18c   :  { %3921 = vpow2.f32 %v1179_v61  ;;  %v1173_v37 = vmul.f32 1.442695, %v1143_v27  ;;  %v1100_v34 = vpop.xlane.xlu1 %1099 }
 0x18d   :  { %v1148_v4 = vsub.f32 %v4826_v7, %v1100_v34 }
 0x18e   :  { %3923 = vpow2.f32 %v1173_v37  ;;  %v5141_v26 = vpop.eup %3915  ;;  %v1091_v3 = vpop.xlane.xlu0 %1090 }
 0x18f   :  { %v1183_v6 = vmul.f32 1.442695, %v1148_v4  ;;  %v5143_v33 = vpop.eup %3917  ;;  %v1145_v8 = vsub.f32 %v4845_v36, %v1091_v3  ;;  %v1224_v49 = vsel %vm1070_vm8, %v5141_v26, 0.0 }
 0x190   :  { %v5148_v16 = vpop.eup %3919  ;;  %1225 = vadd.xlane.f32.xlu1 %v1224_v49  ;;  %v1221_v20 = vsel %vm1066_vm4, %v5143_v33, 0.0 }
 0x191   :  { %3925 = vpow2.f32 %v1183_v6  ;;  %v1177_v7 = vmul.f32 1.442695, %v1145_v8  ;;  %1222 = vadd.xlane.f32.xlu0 %v1221_v20  ;;  %v1212_v29 = vsel %vm1066_vm4, %v5148_v16, 0.0  ;;  %v5793_v20 = vld [vmem:[#allocation11_spill] sm:$0xff] }
 0x192   :  { %v1088_v12 = vpop.xlane.xlu1 %1087 }
 0x193   :  { %v1144_v5 = vsub.f32 %v4871_v24, %v1088_v12  ;;  %3927 = vpow2.f32 %v1177_v7 }
 0x194   :  { %1213 = vadd.xlane.f32.xlu1 %v1212_v29 }
 0x195   :  { %v1175_v36 = vmul.f32 1.442695, %v1144_v5  ;;  %v1097_v50 = vpop.xlane.xlu0 %1096 }
 0x196   :  { %v5155_v52 = vpop.eup %3921  ;;  %v1147_v44 = vsub.f32 %v4891_v60, %v1097_v50 }
 0x197   :  { %3929 = vpow2.f32 %v1175_v36  ;;  %v1236_v24 = vsel %vm1062_vm5, %v5155_v52, 0.0 }
 0x198   :  { %v1112_v15 = vpop.xlane.xlu1 %1111  ;;  %v5158_v45 = vpop.eup %3923  ;;  %v1181_v13 = vmul.f32 1.442695, %v1147_v44  ;;  %1237 = vadd.xlane.f32.xlu1 %v1236_v24 }
 0x199   :  { %v1152_v54 = vsub.f32 %v4899_v32, %v1112_v15  ;;  %v1227_v57 = vsel %vm1062_vm5, %v5158_v45, 0.0 }
 0x19a   :  { %3931 = vpow2.f32 %v1181_v13  ;;  %1228 = vadd.xlane.f32.xlu0 %v1227_v57  ;;  %v5795_v57 = vld [vmem:[#allocation13_spill] sm:$0xff] }
 0x19b   :  { %v1191_v51 = vmul.f32 1.442695, %v1152_v54  ;;  %v5165_v62 = vpop.eup %3925 }
 0x19c   :  { %v1103_v60 = vpop.xlane.xlu0 %1102  ;;  %v1242_v28 = vsel %vm1070_vm8, %v5165_v62, 0.0 }
 0x19d   :  { %3933 = vpow2.f32 %v1191_v51  ;;  %v1149_v38 = vsub.f32 %v4935_v43, %v1103_v60  ;;  %1243 = vadd.xlane.f32.xlu1 %v1242_v28  ;;  %v5170_v32 = vpop.eup %3927 }
 0x19e   :  { %v1233_v35 = vsel %vm1070_vm8, %v5170_v32, 0.0 }
 0x19f   :  { %v1185_v10 = vmul.f32 1.442695, %v1149_v38  ;;  %v1118_v2 = vpop.xlane.xlu1 %1117  ;;  %1234 = vadd.xlane.f32.xlu0 %v1233_v35 }
 0x1a0   :  { %v1154_v25 = vsub.f32 %v4955_v22, %v1118_v2  ;;  %v1109_v31 = vpop.xlane.xlu0 %1108 }
 0x1a1   :  { %3935 = vpow2.f32 %v1185_v10  ;;  %v1151_v0 = vsub.f32 %v4959_v55, %v1109_v31  ;;  %v5176_v56 = vpop.eup %3929 }
 0x1a2   :  { %v1195_v43 = vmul.f32 1.442695, %v1154_v25  ;;  %v1230_v14 = vsel %vm1066_vm4, %v5176_v56, 0.0 }
 0x1a3   :  { %v1189_v58 = vmul.f32 1.442695, %v1151_v0  ;;  %v1106_v63 = vpop.xlane.xlu1 %1105  ;;  %1231 = vadd.xlane.f32.xlu1 %v1230_v14 }
 0x1a4   :  { %3937 = vpow2.f32 %v1195_v43  ;;  %v1150_v53 = vsub.f32 %v4977_v46, %v1106_v63  ;;  %v1115_v22 = vpop.xlane.xlu0 %1114  ;;  %v5181_v61 = vpop.eup %3931 }
 0x1a5   :  { %3939 = vpow2.f32 %v1189_v58  ;;  %v1153_v27 = vsub.f32 %v4981_v40, %v1115_v22  ;;  %v1239_v37 = vsel %vm1066_vm4, %v5181_v61, 0.0 }
 0x1a6   :  { %v1187_v55 = vmul.f32 1.442695, %v1150_v53  ;;  %1240 = vadd.xlane.f32.xlu0 %v1239_v37 }
 0x1a7   :  { %v5186_v34 = vpop.eup %3933  ;;  %v1193_v4 = vmul.f32 1.442695, %v1153_v27  ;;  %v1130_v6 = vpop.xlane.xlu1 %1129 }
 0x1a8   :  { %3941 = vpow2.f32 %v1187_v55  ;;  %v1158_v3 = vsub.f32 %v5001_v48, %v1130_v6  ;;  %v1254_v46 = vsel %vm1062_vm5, %v5186_v34, 0.0  ;;  %v5794_v48 = vld [vmem:[#allocation12_spill] sm:$0xff] }
 0x1a9   :  { %3943 = vpow2.f32 %v1193_v4  ;;  %1255 = vadd.xlane.f32.xlu1 %v1254_v46  ;;  %v25_v46 = vld [vmem:[%s5726_s1 + $0x4] sm:$0xf] }
 0x1aa   :  { %v1203_v8 = vmul.f32 1.442695, %v1158_v3  ;;  %v1121_v49 = vpop.xlane.xlu0 %1120 }
 0x1ab   :  { %v5191_v40 = vpop.eup %3935  ;;  %v1155_v7 = vsub.f32 %v5793_v20, %v1121_v49  ;;  %v5796_v49 = vmov 0.0   ;;  %v24_v20 = vld [vmem:[%s5726_s1] sm:$0xf] }
 0x1ac   :  { %3945 = vpow2.f32 %v1203_v8  ;;  %v1245_v12 = vsel %vm1062_vm5, %v5191_v40, 0.0 }
 0x1ad   :  { %v1197_v5 = vmul.f32 1.442695, %v1155_v7  ;;  %1246 = vadd.xlane.f32.xlu0 %v1245_v12 }
 0x1ae   :  { %v1124_v29 = vpop.xlane.xlu1 %1123  ;;  %v5196_v36 = vpop.eup %3937 }
 0x1af   :  { %v1156_v50 = vsub.f32 %v5794_v48, %v1124_v29  ;;  %v5199_v44 = vpop.eup %3939  ;;  %3947 = vpow2.f32 %v1197_v5  ;;  %v1260_v15 = vsel %vm1070_vm8, %v5196_v36, 0.0 }
 0x1b0   :  { %v1251_v24 = vsel %vm1070_vm8, %v5199_v44, 0.0  ;;  %1261 = vadd.xlane.f32.xlu1 %v1260_v15 }
 0x1b1   :  { %v1199_v13 = vmul.f32 1.442695, %v1156_v50  ;;  %v1127_v54 = vpop.xlane.xlu0 %1126  ;;  %1252 = vadd.xlane.f32.xlu0 %v1251_v24 }
 0x1b2   :  { %v1157_v51 = vsub.f32 %v5795_v57, %v1127_v54  ;;  %v1136_v60 = vpop.xlane.xlu1 %1135  ;;  %v5206_v38 = vpop.eup %3941 }
 0x1b3   :  { %3949 = vpow2.f32 %v1199_v13  ;;  %v1160_v28 = vsub.f32 %v5057_v47, %v1136_v60  ;;  %v5209_v10 = vpop.eup %3943  ;;  %v1248_v25 = vsel %vm1066_vm4, %v5206_v38, 0.0 }
 0x1b4   :  { %v1201_v2 = vmul.f32 1.442695, %v1157_v51  ;;  %v1257_v0 = vsel %vm1066_vm4, %v5209_v10, 0.0  ;;  %1249 = vadd.xlane.f32.xlu1 %v1248_v25 }
 0x1b5   :  { %v1207_v31 = vmul.f32 1.442695, %v1160_v28  ;;  %v1133_v35 = vpop.xlane.xlu0 %1132  ;;  %1258 = vadd.xlane.f32.xlu0 %v1257_v0 }
 0x1b6   :  { %3951 = vpow2.f32 %v1201_v2  ;;  %v1159_v43 = vsub.f32 %v4907_v42, %v1133_v35  ;;  %v5216_v58 = vpop.eup %3945 }
 0x1b7   :  { %3953 = vpow2.f32 %v1207_v31  ;;  %v1272_v63 = vsel %vm1062_vm5, %v5216_v58, 0.0 }
 0x1b8   :  { %v1205_v47 = vmul.f32 1.442695, %v1159_v43  ;;  %1273 = vadd.xlane.f32.xlu1 %v1272_v63 }
 0x1b9   :  { %v5220_v14 = vpop.eup %3947 }
 0x1ba   :  { %3955 = vpow2.f32 %v1205_v47  ;;  %v1263_v53 = vsel %vm1062_vm5, %v5220_v14, 0.0  ;;  %vm1366_vm5 = vcmask 1043456  }
 0x1bb   :  { %1264 = vadd.xlane.f32.xlu0 %v1263_v53  ;;  %v1432_v8 = vsel %vm1366_vm5, %v25_v46, 0  ;;  %v1368_v7 = vsel %vm1366_vm5, %v24_v20, 0 }
 0x1bc   :  { %3713 = vmatpush3.bf16.msra.mxu1 %v1432_v8  ;;  %3707 = vmatpush3.bf16.msra.mxu0 %v1368_v7 }
 0x1bd   :  { %v5224_v22 = vpop.eup %3949  ;;  %3724 = vmatprep.subr.bf16.mxu1 %v5796_v49  ;;  %3718 = vmatprep.subr.bf16.mxu0 %v5796_v49 }
 0x1be   :  { %v1266_v42 = vsel %vm1066_vm4, %v5224_v22, 0.0 }
 0x1bf   :  { %1267 = vadd.xlane.f32.xlu1 %v1266_v42 }
 0x1c0   :  { %v5228_v27 = vpop.eup %3951 }
 0x1c1   :  { %v5230_v55 = vpop.eup %3953  ;;  %v1269_v37 = vsel %vm1070_vm8, %v5228_v27, 0.0 }
 0x1c2   :  { %1270 = vadd.xlane.f32.xlu0 %v1269_v37  ;;  %v1278_v4 = vsel %vm1070_vm8, %v5230_v55, 0.0 }
 0x1c3   :  { %1279 = vadd.xlane.f32.xlu1 %v1278_v4 }
 0x1c4   :  { %v5236_v6 = vpop.eup %3955 }
 0x1c5   :  { %v1275_v3 = vsel %vm1066_vm4, %v5236_v6, 0.0 }
 0x1c6   :  { %1276 = vadd.xlane.f32.xlu0 %v1275_v3 }
 0x214   :  { %v1211_v12 = vpop.xlane.xlu0 %1210 }
 0x218   :  { %v1217_v5 = vpop.xlane.xlu0 %1216  ;;  %v1220_v29 = vpop.xlane.xlu1 %1219 }
 0x219   :  { %3957 = vrcp.f32 %v1217_v5 }
 0x21a   :  { %3959 = vrcp.f32 %v1211_v12 }
 0x21b   :  { %3961 = vrcp.f32 %v1220_v29  ;;  %v27_v29 = vld [vmem:[%s5726_s1 + $0xc] sm:$0xf] }
 0x21d   :  { %v1226_v48 = vpop.xlane.xlu1 %1225 }
 0x21e   :  { %3963 = vrcp.f32 %v1226_v48  ;;  %v1223_v50 = vpop.xlane.xlu0 %1222 }
 0x21f   :  { %3965 = vrcp.f32 %v1223_v50 }
 0x221   :  { %v1214_v13 = vpop.xlane.xlu1 %1213 }
 0x222   :  { %3967 = vrcp.f32 %v1214_v13 }
 0x223   :  { %v3958_v15 = vpop.eup %3957 }
 0x224   :  { %v1307_v54 = vmul.f32 %v3958_v15, %v5130_v30  ;;  %v3960_v57 = vpop.eup %3959 }
 0x225   :  { %v1238_v24 = vpop.xlane.xlu1 %1237  ;;  %v3962_v60 = vpop.eup %3961  ;;  %v1305_v53 = vmul.f32 %v3960_v57, %v5126_v23 }
 0x226   :  { %v1330_v2 = vpack.c.bf16 %v1307_v54, %v1307_v54  ;;  %v1308_v0 = vmul.f32 %v3962_v60, %v5132_v39  ;;  %v1560_v60 = vsel %vm1366_vm5, %v27_v29, 0 }
 0x227   :  { %v1229_v51 = vpop.xlane.xlu0 %1228 }
 0x228   :  { %v3964_v28 = vpop.eup %3963  ;;  %v1355_v37 = vshrl.u32 %v1330_v2, 16  ;;  %v1358_v4 = vshll.u32 %v1330_v2, 16 }
 0x229   :  { %v3966_v25 = vpop.eup %3965  ;;  %v1310_v31 = vmul.f32 %v3964_v28, %v5141_v26  ;;  %v26_v28 = vld [vmem:[%s5726_s1 + $0x8] sm:$0xf] }
 0x22a   :  { %v1244_v35 = vpop.xlane.xlu1 %1243  ;;  %v1309_v43 = vmul.f32 %v3966_v25, %v5143_v33  ;;  %v1357_v50 = vrot.slane %v1355_v37, 1  ;;  %v1360_v15 = vrot.slane %v1358_v4, 2 }
 0x22b   :  { %3969 = vrcp.f32 %v1244_v35  ;;  %v1332_v47 = vpack.c.bf16 %v1310_v31, %v1310_v31 }
 0x22c   :  { %v3968_v63 = vpop.eup %3967  ;;  %v1331_v30 = vpack.c.bf16 %v1309_v43, %v1308_v0  ;;  %v1235_v42 = vpop.xlane.xlu0 %1234  ;;  %v1361_v0 = vor.u32 %v1360_v15, %v1357_v50 }
 0x22d   :  { %v1306_v3 = vmul.f32 %v3968_v63, %v5148_v16  ;;  %3971 = vrcp.f32 %v1235_v42  ;;  %v1420_v46 = vshrl.u32 %v1332_v47, 16  ;;  %v1423_v8 = vshll.u32 %v1332_v47, 16 }
 0x22e   :  { %3973 = vrcp.f32 %v1229_v51  ;;  %v1412_v26 = vshrl.u32 %v1331_v30, 16  ;;  %v1415_v20 = vshll.u32 %v1331_v30, 16  ;;  %v1496_v47 = vsel %vm1366_vm5, %v26_v28, 0 }
 0x22f   :  { %v1329_v39 = vpack.c.bf16 %v1306_v3, %v1305_v53  ;;  %3975 = vrcp.f32 %v1238_v24  ;;  %v1422_v7 = vrot.slane %v1420_v46, 1  ;;  %v1425_v12 = vrot.slane %v1423_v8, 2 }
 0x230   :  { %v1232_v33 = vpop.xlane.xlu1 %1231  ;;  %v1414_v23 = vrot.slane %v1412_v26, 1  ;;  %v1417_v5 = vrot.slane %v1415_v20, 2 }
 0x231   :  { %3977 = vrcp.f32 %v1232_v33  ;;  %v1347_v16 = vshrl.u32 %v1329_v39, 16  ;;  %v1350_v48 = vshll.u32 %v1329_v39, 16  ;;  %v1426_v57 = vor.u32 %v1425_v12, %v1422_v7 }
 0x232   :  { %v1418_v54 = vor.u32 %v1417_v5, %v1414_v23 }
 0x233   :  { %v1241_v13 = vpop.xlane.xlu0 %1240  ;;  %v1349_v24 = vrot.slane %v1347_v16, 1  ;;  %v1352_v51 = vrot.slane %v1350_v48, 2 }
 0x234   :  { %3979 = vrcp.f32 %v1241_v13  ;;  %v1427_v25 = vsel %vm1345_vm1, %v1418_v54, %v1426_v57 }
 0x235   :  { %v3970_v2 = vpop.eup %3969  ;;  %3715 = vmatmul.mubr.msk.bf16.vlgmr.msra.gmra.mrb[16].mxu1 %vm1066_vm4, %v1427_v25  ;;  %v1353_v35 = vor.u32 %v1352_v51, %v1349_v24 }
 0x236   :  { %v1256_v31 = vpop.xlane.xlu1 %1255  ;;  %v1316_v43 = vmul.f32 %v3970_v2, %v5165_v62  ;;  %3725 = vmatpush3.bf16.msra.mxu1 %v1560_v60  ;;  %3726 = vmatprep.mubr.msk.bf16.mxu1 %vm5797_vm2, %v5796_v49 }
 0x237   :  { %v3972_v63 = vpop.eup %3971  ;;  %v1362_v53 = vsel %vm1345_vm1, %v1353_v35, %v1361_v0  ;;  %3736 = vmatprep.subr.bf16.mxu1 %v5796_v49  ;;  %3981 = vrcp.f32 %v1256_v31 }
 0x238   :  { %v3974_v30 = vpop.eup %3973  ;;  %v1313_v42 = vmul.f32 %v3972_v63, %v5170_v32  ;;  %3709 = vmatmul.mubr.msk.bf16.vlgmr.msra.gmra.mrb[16].mxu0 %vm1066_vm4, %v1362_v53  ;;  %v1336_v46 = vpack.c.bf16 %v1316_v43, %v1316_v43 }
 0x239   :  { %v3976_v4 = vpop.eup %3975  ;;  %3719 = vmatpush3.bf16.msra.mxu0 %v1496_v47  ;;  %3720 = vmatprep.mubr.msk.bf16.mxu0 %vm5797_vm2, %v5796_v49  ;;  %v1311_v8 = vmul.f32 %v3974_v30, %v5158_v45  ;;  %v29_v47 = vld [vmem:[%s5726_s1 + $0x14] sm:$0xf] }
 0x23a   :  { %v1247_v37 = vpop.xlane.xlu0 %1246  ;;  %v1334_v3 = vpack.c.bf16 %v1313_v42, %v1313_v42  ;;  %3730 = vmatprep.subr.bf16.mxu0 %v5796_v49  ;;  %v1314_v12 = vmul.f32 %v3976_v4, %v5155_v52  ;;  %v1548_v29 = vshrl.u32 %v1336_v46, 16  ;;  %v1551_v16 = vshll.u32 %v1336_v46, 16  ;;  %v28_v52 = vld [vmem:[%s5726_s1 + $0x10] sm:$0xf] }
 0x23b   :  { %v3978_v62 = vpop.eup %3977  ;;  %v1624_v43 = vsel %vm1366_vm5, %v28_v52, 0  ;;  %v1688_v46 = vsel %vm1366_vm5, %v29_v47, 0 }
 0x23c   :  { %v1312_v26 = vmul.f32 %v3978_v62, %v5176_v56  ;;  %v1484_v39 = vshrl.u32 %v1334_v3, 16  ;;  %v1487_v33 = vshll.u32 %v1334_v3, 16  ;;  %v1550_v60 = vrot.slane %v1548_v29, 1 }
 0x23d   :  { %v1262_v20 = vpop.xlane.xlu1 %1261  ;;  %v1553_v28 = vrot.slane %v1551_v16, 2 }
 0x23e   :  { %v1253_v32 = vpop.xlane.xlu0 %1252  ;;  %3983 = vrcp.f32 %v1262_v20  ;;  %v3980_v7 = vpop.eup %3979  ;;  %v1333_v23 = vpack.c.bf16 %v1312_v26, %v1311_v8  ;;  %v1486_v56 = vrot.slane %v1484_v39, 1  ;;  %v1489_v15 = vrot.slane %v1487_v33, 2 }
 0x23f   :  { %3985 = vrcp.f32 %v1253_v32  ;;  %v1315_v5 = vmul.f32 %v3980_v7, %v5181_v61  ;;  %v1554_v4 = vor.u32 %v1553_v28, %v1550_v60 }
 0x240   :  { %3987 = vrcp.f32 %v1247_v37  ;;  %v1476_v45 = vshrl.u32 %v1333_v23, 16  ;;  %v1479_v50 = vshll.u32 %v1333_v23, 16  ;;  %v1490_v31 = vor.u32 %v1489_v15, %v1486_v56 }
 0x241   :  { %v1250_v48 = vpop.xlane.xlu1 %1249  ;;  %v1335_v13 = vpack.c.bf16 %v1315_v5, %v1314_v12  ;;  %v3982_v63 = vpop.eup %3981  ;;  %v2450_v56 = vsel %vm2449_vm12, %v4637_v18, -inf }
 0x242   :  { %v1259_v54 = vpop.xlane.xlu0 %1258  ;;  %3989 = vrcp.f32 %v1250_v48  ;;  %v1478_v57 = vrot.slane %v1476_v45, 1  ;;  %v1481_v24 = vrot.slane %v1479_v50, 2  ;;  %v1320_v7 = vmul.f32 %v3982_v63, %v5186_v34  ;;  %v31_v63 = vld [vmem:[%s5726_s1 + $0x1c] sm:$0xf] }
 0x243   :  { %3991 = vrcp.f32 %v1259_v54  ;;  %v1540_v51 = vshrl.u32 %v1335_v13, 16  ;;  %v1543_v61 = vshll.u32 %v1335_v13, 16 }
 0x244   :  { %v1482_v25 = vor.u32 %v1481_v24, %v1478_v57 }
 0x245   :  { %v1274_v2 = vpop.xlane.xlu1 %1273  ;;  %v1542_v35 = vrot.slane %v1540_v51, 1  ;;  %v1545_v0 = vrot.slane %v1543_v61, 2 }
 0x246   :  { %v1491_v53 = vsel %vm1345_vm1, %v1482_v25, %v1490_v31 }
 0x247   :  { %v1546_v37 = vor.u32 %v1545_v0, %v1542_v35  ;;  %3721 = vmatmul.mubr.msk.bf16.vlgmr.msra.gmra.mrb[20].mxu0 %vm1066_vm4, %v1491_v53  ;;  %v30_v35 = vld [vmem:[%s5726_s1 + $0x18] sm:$0xf] }
 0x248   :  { %v3984_v30 = vpop.eup %3983  ;;  %v1265_v42 = vpop.xlane.xlu0 %1264  ;;  %3731 = vmatpush3.bf16.msra.mxu0 %v1624_v43  ;;  %3732 = vmatprep.mubr.msk.bf16.mxu0 %vm5797_vm2, %v5796_v49 }
 0x249   :  { %v3986_v62 = vpop.eup %3985  ;;  %v1322_v3 = vmul.f32 %v3984_v30, %v5196_v36  ;;  %3993 = vrcp.f32 %v1265_v42  ;;  %v1555_v20 = vsel %vm1345_vm1, %v1546_v37, %v1554_v4  ;;  %3742 = vmatprep.subr.bf16.mxu0 %v5796_v49  ;;  %v2451_v36 = vsel %vm1070_vm8, %v4704_v19, -inf }
 0x24a   :  { %v3988_v8 = vpop.eup %3987  ;;  %v1319_v26 = vmul.f32 %v3986_v62, %v5199_v44  ;;  %3727 = vmatmul.mubr.msk.bf16.vlgmr.msra.gmra.mrb[20].mxu1 %vm1066_vm4, %v1555_v20  ;;  %v2452_v54 = vmax.f32 %v2450_v56, %v2451_v36  ;;  %vm5798_vm8 = vcmask 261120  }
 0x24b   :  { %v1340_v32 = vpack.c.bf16 %v1322_v3, %v1322_v3  ;;  %3737 = vmatpush3.bf16.msra.mxu1 %v1688_v46  ;;  %3738 = vmatprep.mubr.msk.bf16.mxu1 %vm5797_vm2, %v5796_v49  ;;  %v1317_v23 = vmul.f32 %v3988_v8, %v5191_v40  ;;  %v1752_v3 = vsel %vm1366_vm5, %v30_v35, 0 }
 0x24c   :  { %v1268_v39 = vpop.xlane.xlu1 %1267  ;;  %v3990_v33 = vpop.eup %3989  ;;  %v1338_v12 = vpack.c.bf16 %v1319_v26, %v1319_v26  ;;  %3748 = vmatprep.subr.bf16.mxu1 %v5796_v49  ;;  %v2453_v53 = vrot.slane %v2452_v54, 4 }
 0x24d   :  { %3995 = vrcp.f32 %v1268_v39  ;;  %v3992_v44 = vpop.eup %3991  ;;  %v1318_v5 = vmul.f32 %v3990_v33, %v5206_v38  ;;  %v1676_v29 = vshrl.u32 %v1340_v32, 16  ;;  %v1679_v45 = vshll.u32 %v1340_v32, 16  ;;  %v5324_v39 = vld [vmem:[%s5727_s4 + $0x10] sm:$0xff]  }
 0x24e   :  { %3997 = vrcp.f32 %v1274_v2  ;;  %v1321_v16 = vmul.f32 %v3992_v44, %v5209_v10  ;;  %v1612_v34 = vshrl.u32 %v1338_v12, 16  ;;  %v1615_v50 = vshll.u32 %v1338_v12, 16 }
 0x24f   :  { %v1271_v48 = vpop.xlane.xlu0 %1270  ;;  %v1337_v15 = vpack.c.bf16 %v1318_v5, %v1317_v23  ;;  %v1678_v60 = vrot.slane %v1676_v29, 1  ;;  %v1681_v28 = vrot.slane %v1679_v45, 2  ;;  %v2393_v2 = vsel %vm2392_vm9, %v4637_v18, -inf }
 0x250   :  { %3999 = vrcp.f32 %v1271_v48  ;;  %v1280_v13 = vpop.xlane.xlu1 %1279  ;;  %v1339_v40 = vpack.c.bf16 %v1321_v16, %v1320_v7  ;;  %v1614_v24 = vrot.slane %v1612_v34, 1  ;;  %v1617_v52 = vrot.slane %v1615_v50, 2 }
 0x251   :  { %4001 = vrcp.f32 %v1280_v13  ;;  %v1604_v38 = vshrl.u32 %v1337_v15, 16  ;;  %v1607_v57 = vshll.u32 %v1337_v15, 16  ;;  %v2394_v4 = vrot.slane %v2393_v2, 4 }
 0x252   :  { %v1668_v61 = vshrl.u32 %v1339_v40, 16  ;;  %v1671_v10 = vshll.u32 %v1339_v40, 16  ;;  %v1618_v42 = vor.u32 %v1617_v52, %v1614_v24  ;;  %v1682_v62 = vor.u32 %v1681_v28, %v1678_v60 }
 0x253   :  { %v1277_v51 = vpop.xlane.xlu0 %1276  ;;  %v1606_v25 = vrot.slane %v1604_v38, 1  ;;  %v1609_v31 = vrot.slane %v1607_v57, 2  ;;  %v3994_v0 = vpop.eup %3993  ;;  %v1816_v32 = vsel %vm1366_vm5, %v31_v63, 0  ;;  %v2522_v33 = vsel %vm2392_vm9, %v4704_v19, -inf  ;;  %vm5799_vm9 = vmmov %vm5798_vm8 }
 0x254   :  { %4003 = vrcp.f32 %v1277_v51  ;;  %v1670_v43 = vrot.slane %v1668_v61, 1  ;;  %v1673_v47 = vrot.slane %v1671_v10, 2  ;;  %v1323_v8 = vmul.f32 %v3994_v0, %v5220_v14 }
 0x255   :  { %v1610_v30 = vor.u32 %v1609_v31, %v1606_v25  ;;  %v2454_v14 = vmax.f32 %v2452_v54, %v2453_v53  ;;  %v2395_v44 = vmax.f32 %v2393_v2, %v2394_v4  ;;  %v2523_v5 = vrot.slane %v2522_v33, 4 }
 0x256   :  { %v1674_v18 = vor.u32 %v1673_v47, %v1670_v43 }
 0x257   :  { %v3996_v37 = vpop.eup %3995  ;;  %v1619_v20 = vsel %vm1345_vm1, %v1610_v30, %v1618_v42  ;;  %v2455_v34 = vrot.slane %v2454_v14, 2  ;;  %v2396_v40 = vrot.slane %v2395_v44, 2  ;;  %v2524_v38 = vmax.f32 %v2522_v33, %v2523_v5  ;;  %v3890_v30 = vld [vmem:[%s5727_s4 + $0x18] sm:$0xff]   ;;  %v4073_v33 = vld [vmem:[%s5724_s2 + $0x28] sm:$0xff]  }
 0x258   :  { %v3998_v46 = vpop.eup %3997  ;;  %v1324_v26 = vmul.f32 %v3996_v37, %v5224_v22  ;;  %v1683_v36 = vsel %vm1345_vm1, %v1674_v18, %v1682_v62  ;;  %3733 = vmatmul.mubr.msk.bf16.vlgmr.msra.gmra.mrb[24].mxu0 %vm1066_vm4, %v1619_v20  ;;  %v4070_v37 = vld [vmem:[%s5724_s2 + $0x20] sm:$0xff]   ;;  %v4072_v20 = vld [vmem:[%s5724_s2 + $0x10] sm:$0xff]  }
 0x259   :  { %3739 = vmatmul.mubr.msk.bf16.vlgmr.msra.gmra.mrb[24].mxu1 %vm1066_vm4, %v1683_v36  ;;  %3743 = vmatpush3.bf16.msra.mxu0 %v1752_v3  ;;  %v1326_v15 = vmul.f32 %v3998_v46, %v5216_v58  ;;  %v2456_v60 = vmax.f32 %v2454_v14, %v2455_v34  ;;  %v4069_v58 = vld [vmem:[%s5724_s2] sm:$0xff]   ;;  %v2525_v0 = vrot.slane %v2524_v38, 2  ;;  %v4074_v14 = vld [vmem:[%s5724_s2 + $0x18] sm:$0xff]  }
 0x25a   :  { %v4000_v7 = vpop.eup %3999  ;;  %v1341_v12 = vpack.c.bf16 %v1324_v26, %v1323_v8  ;;  %3749 = vmatpush3.bf16.msra.mxu1 %v1816_v32  ;;  %3744 = vmatprep.mubr.msk.bf16.mxu0 %vm5797_vm2, %v5796_v49  ;;  %v4071_v8 = vld [vmem:[%s5724_s2 + $0x8] sm:$0xff]  }
 0x25b   :  { %v4002_v22 = vpop.eup %4001  ;;  %v1325_v23 = vmul.f32 %v4000_v7, %v5228_v27  ;;  %3750 = vmatprep.mubr.msk.bf16.mxu1 %vm5797_vm2, %v5796_v49  ;;  %3834 = vmatprep.subr.bf16.mxu1 %v5324_v39  ;;  %v2457_v4 = vrot.slane %v2456_v60, 1  ;;  %v2526_v18 = vmax.f32 %v2524_v38, %v2525_v0 }
 0x25c   :  { %v1328_v19 = vmul.f32 %v4002_v22, %v5230_v55  ;;  %v1732_v29 = vshrl.u32 %v1341_v12, 16  ;;  %v1735_v16 = vshll.u32 %v1341_v12, 16  ;;  %3754 = vmatprep.subr.bf16.mxu0 %v5324_v39  ;;  %v3897_v12 = vld [vmem:[%s5727_s4] sm:$0xff]   ;;  %v3898_v22 = vld [vmem:[%s5727_s4 + $0x8] sm:$0xff]  }
 0x25d   :  { %v1342_v48 = vpack.c.bf16 %v1325_v23, %v1325_v23  ;;  %v2458_v46 = vmax.f32 %v2456_v60, %v2457_v4  ;;  %v2527_v26 = vrot.slane %v2526_v18, 1  ;;  %v4076_v23 = vld [vmem:[%s5724_s2 + $0x38] sm:$0xff]  }
 0x25e   :  { %v4004_v45 = vpop.eup %4003  ;;  %v1344_v27 = vpack.c.bf16 %v1328_v19, %v1328_v19  ;;  %v1734_v50 = vrot.slane %v1732_v29, 1  ;;  %v1737_v56 = vrot.slane %v1735_v16, 2 }
 0x25f   :  { %v1327_v13 = vmul.f32 %v4004_v45, %v5236_v6  ;;  %v1740_v55 = vshrl.u32 %v1342_v48, 16  ;;  %v1743_v54 = vshll.u32 %v1342_v48, 16  ;;  %v2397_v6 = vmax.f32 %v2395_v44, %v2396_v40  ;;  %v4075_v44 = vld [vmem:[%s5724_s2 + $0x30] sm:$0xff]  }
 0x260   :  { %v1804_v57 = vshrl.u32 %v1344_v27, 16  ;;  %v1807_v24 = vshll.u32 %v1344_v27, 16  ;;  %v1738_v51 = vor.u32 %v1737_v56, %v1734_v50  ;;  %v2528_v36 = vmax.f32 %v2526_v18, %v2527_v26 }
 0x261   :  { %v1343_v52 = vpack.c.bf16 %v1327_v13, %v1326_v15  ;;  %v1742_v61 = vrot.slane %v1740_v55, 1  ;;  %v1745_v10 = vrot.slane %v1743_v54, 2  ;;  %v2398_v62 = vrot.slane %v2397_v6, 1 }
 0x262   :  { %v1806_v28 = vrot.slane %v1804_v57, 1  ;;  %v1809_v2 = vrot.slane %v1807_v24, 2 }
 0x263   :  { %v1746_v25 = vor.u32 %v1745_v10, %v1742_v61  ;;  %v1796_v31 = vshrl.u32 %v1343_v52, 16  ;;  %v1799_v35 = vshll.u32 %v1343_v52, 16  ;;  %v2399_v32 = vmax.f32 %v2397_v6, %v2398_v62 }
 0x264   :  { %v1810_v53 = vor.u32 %v1809_v2, %v1806_v28 }
 0x265   :  { %v1747_v43 = vsel %vm1345_vm1, %v1738_v51, %v1746_v25  ;;  %v1798_v47 = vrot.slane %v1796_v31, 1  ;;  %v1801_v63 = vrot.slane %v1799_v35, 2 }
 0x266   :  { %3745 = vmatmul.mubr.msk.bf16.vlgmr.msra.gmra.mrb[28].mxu0 %vm1066_vm4, %v1747_v43 }
 0x267   :  { %v1802_v42 = vor.u32 %v1801_v63, %v1798_v47  ;;  %3755 = vmatpush3.bf16.msra.mxu0 %v5324_v39  ;;  %3758 = vmatprep.mubr.msk.bf16.mxu0 %vm5798_vm8, %v4069_v58 }
 0x268   :  { %3756 = vmatprep.subr.bf16.mxu0 %v3890_v30 }
 0x269   :  { %v1811_v3 = vsel %vm1345_vm1, %v1802_v42, %v1810_v53 }
 0x26a   :  { %3751 = vmatmul.mubr.msk.bf16.vlgmr.msra.gmra.mrb[28].mxu1 %vm1066_vm4, %v1811_v3  ;;  %vm5800_vm4 = vmmov %vm5798_vm8 }
 0x26b   :  { %3836 = vmatpush3.bf16.msra.mxu1 %v5324_v39  ;;  %3766 = vmatprep.mubr.msk.bf16.mxu1 %vm5799_vm9, %v4070_v37  ;;  %v2579_v39 = vsel %vm2578_vm11, %v2399_v32, %v2458_v46  ;;  %vm5801_vm12 = vmmov %vm5800_vm4 }
 0x26c   :  { %3835 = vmatprep.subr.bf16.mxu1 %v3890_v30  ;;  %3757 = vmatpush3.bf16.msra.mxu0 %v3890_v30  ;;  %vm5802_vm6 = vmmov %vm5800_vm4  ;;  %v2588_v7 = vsel %vm2587_vm15, %v2579_v39, %v2528_v36  ;;  %v5814_v39 = vld [vmem:[#allocation4_spill] sm:$0xff] }
 0x26d   :  { %vm5803_vm7 = vmmov %vm5800_vm4  ;;  %3774 = vmatprep.subr.bf16.mxu0 %v3897_v12  ;;  %v2151_v36 = vsub.s32 2, %v5814_v39 }
 0x26e   :  { %vm5804_vm10 = vmmov %vm5800_vm4 }
 0x26f   :  { %3837 = vmatpush3.bf16.msra.mxu1 %v3890_v30  ;;  %3759 = vmatmul.mubr.msk.bf16.vlgmr.msra.gmra.mrb[32].mxu0 %vm5800_vm4, %v4071_v8  ;;  %vm5805_vm3 = vmmov %vm5800_vm4 }
 0x270   :  { %3794 = vmatprep.subr.mxu1 %v5796_v49  ;;  %3762 = vmatprep.mubr.msk.bf16.mxu0 %vm5801_vm12, %v4072_v20  ;;  %vm5806_vm14 = vmmov %vm5805_vm3 }
 0x271   :  { %3775 = vmatpush3.bf16.msra.mxu0 %v3897_v12  ;;  %vm5807_vm0 = vmmov %vm5805_vm3  ;;  %v2187_v12 = vsub.s32 3, %v5814_v39 }
 0x272   :  { %3767 = vmatmul.mubr.msk.bf16.vlgmr.msra.gmra.mrb[32].mxu1 %vm5802_vm6, %v4073_v33  ;;  %3776 = vmatprep.subr.bf16.mxu0 %v3898_v22  ;;  %vm5808_vm11 = vmmov %vm5807_vm0 }
 0x273   :  { %3795 = vmatpush3.msk.msra.mxu1 %vm989_vm13, %v2588_v7  ;;  %3770 = vmatprep.mubr.msk.bf16.mxu1 %vm5804_vm10, %v4075_v44  ;;  %vm5809_vm15 = vmmov %vm5807_vm0  ;;  %v5421_v7 = vld [vmem:[%s5725_s5] sm:$0xff] }
 0x274   :  { %3799 = vmatprep.subr.mxu1 %v5796_v49  ;;  %vm5810_vm1 = vmmov %vm5807_vm0 }
 0x275   :  { %3777 = vmatpush3.bf16.msra.mxu0 %v3898_v22  ;;  %vm5811_vm8 = vmmov %vm5807_vm0 }
 0x276   :  { %vm5812_vm9 = vmmov %vm5807_vm0 }
 0x277   :  { %3763 = vmatmul.mubr.msk.bf16.gmra.mrb[36].mxu0 %vm5803_vm7, %v4074_v14  ;;  %vm5813_vm4 = vmmov %vm5807_vm0  ;;  %v5424_v14 = vrot.slane %v5421_v7, %v2151_v36 }
 0x278   :  { %vm5815_vm12 = vmmov %vm5807_vm0 }
 0x279   :  { %vm5816_vm6 = vmmov %vm5807_vm0 }
 0x27a   :  { %3771 = vmatmul.mubr.msk.bf16.gmra.mrb[36].mxu1 %vm5805_vm3, %v4076_v23  ;;  %vm5817_vm7 = vmmov %vm5807_vm0 }
 0x27b   :  { %3796 = vmatprep.mubr.msk.f32.mxu1 %vm5797_vm2, %v5796_v49  ;;  %vm5818_vm10 = vmmov %vm5807_vm0 }
 0x27c   :  { %vm5819_vm3 = vmmov %vm5807_vm0 }
 0x308   :  { %v1468_v5 = vpop.f32.mrb[16].mxu1 }
 0x309   :  { %v3716_v19 = vpop.f32.mrb[17].mxu1 }
 0x30a   :  { %v1471_v29 = vpop.f32.mrb[18].mxu1 }
 0x30b   :  { %v1404_v16 = vpop.f32.mrb[16].mxu0  ;;  %v1868_v48 = vpack.c.bf16 %v1471_v29, %v1468_v5  ;;  %v3717_v45 = vpop.f32.mrb[19].mxu1  ;;  %v5430_v29 = vrot.slane %v5421_v7, %v2187_v12 }
 0x30c   :  { %v3710_v34 = vpop.f32.mrb[17].mxu0 }
 0x30d   :  { %v1407_v27 = vpop.f32.mrb[18].mxu0 }
 0x30e   :  { %v1867_v50 = vpack.c.bf16 %v1407_v27, %v1404_v16  ;;  %v3711_v56 = vpop.f32.mrb[19].mxu0 }
 0x310   :  { %3778 = vmatprep.mubr.msk.bf16.mxu0 %vm5806_vm14, %v1867_v50  ;;  %vm5820_vm14 = vmmov %vm5807_vm0 }
 0x311   :  { %3779 = vmatmul.mubr.msk.bf16.vlgmr.msra.gmra.mrb[32].mxu0 %vm5807_vm0, %v1868_v48 }
 0x31a   :  { %v1532_v15 = vpop.f32.mrb[20].mxu0 }
 0x31b   :  { %v3722_v13 = vpop.f32.mrb[21].mxu0 }
 0x31c   :  { %v1535_v55 = vpop.f32.mrb[22].mxu0 }
 0x31d   :  { %v1596_v54 = vpop.f32.mrb[20].mxu1  ;;  %v1869_v40 = vpack.c.bf16 %v1535_v55, %v1532_v15  ;;  %v3723_v38 = vpop.f32.mrb[23].mxu0 }
 0x31e   :  { %v3728_v57 = vpop.f32.mrb[21].mxu1 }
 0x31f   :  { %v1599_v24 = vpop.f32.mrb[22].mxu1  ;;  %3782 = vmatprep.mubr.msk.bf16.mxu0 %vm5808_vm11, %v1869_v40  ;;  %vm5821_vm11 = vmmov %vm5807_vm0 }
 0x320   :  { %v1870_v52 = vpack.c.bf16 %v1599_v24, %v1596_v54  ;;  %v3729_v51 = vpop.f32.mrb[23].mxu1 }
 0x322   :  { %3783 = vmatmul.mubr.msk.bf16.gmra.mrb[36].mxu0 %vm5809_vm15, %v1870_v52  ;;  %vm5822_vm15 = vmmov %vm5807_vm0 }
 0x32b   :  { %v1660_v61 = vpop.f32.mrb[24].mxu0 }
 0x32c   :  { %v1724_v10 = vpop.f32.mrb[24].mxu1  ;;  %v3734_v60 = vpop.f32.mrb[25].mxu0 }
 0x32d   :  { %v3740_v28 = vpop.f32.mrb[25].mxu1  ;;  %v1663_v2 = vpop.f32.mrb[26].mxu0 }
 0x32e   :  { %v1727_v25 = vpop.f32.mrb[26].mxu1  ;;  %v1871_v31 = vpack.c.bf16 %v1663_v2, %v1660_v61  ;;  %v3735_v35 = vpop.f32.mrb[27].mxu0 }
 0x32f   :  { %v1872_v58 = vpack.c.bf16 %v1727_v25, %v1724_v10  ;;  %v3741_v6 = vpop.f32.mrb[27].mxu1 }
 0x330   :  { %3786 = vmatprep.mubr.msk.bf16.mxu0 %vm5810_vm1, %v1871_v31  ;;  %vm5823_vm1 = vmmov %vm5807_vm0 }
 0x331   :  { %3787 = vmatmul.mubr.msk.bf16.gmra.mrb[40].mxu0 %vm5811_vm8, %v1872_v58  ;;  %vm5824_vm8 = vmmov %vm5807_vm0 }
 0x339   :  { %v1788_v0 = vpop.f32.mrb[28].mxu0 }
 0x33a   :  { %v3746_v43 = vpop.f32.mrb[29].mxu0 }
 0x33b   :  { %v1791_v47 = vpop.f32.mrb[30].mxu0 }
 0x33c   :  { %v1873_v63 = vpack.c.bf16 %v1791_v47, %v1788_v0  ;;  %v3747_v53 = vpop.f32.mrb[31].mxu0 }
 0x33d   :  { %v1852_v30 = vpop.f32.mrb[28].mxu1 }
 0x33e   :  { %v3752_v42 = vpop.f32.mrb[29].mxu1  ;;  %3790 = vmatprep.mubr.msk.bf16.mxu0 %vm5812_vm9, %v1873_v63  ;;  %vm5825_vm9 = vmmov %vm5807_vm0 }
 0x33f   :  { %v1855_v37 = vpop.f32.mrb[30].mxu1 }
 0x340   :  { %v1874_v4 = vpack.c.bf16 %v1855_v37, %v1852_v30  ;;  %v3753_v18 = vpop.f32.mrb[31].mxu1 }
 0x342   :  { %3791 = vmatmul.mubr.msk.bf16.gmra.mrb[44].mxu0 %vm5813_vm4, %v1874_v4  ;;  %vm5826_vm4 = vmmov %vm5807_vm0 }
 0x345   :  { %v3768_v62 = vpop.f32.mrb[32].mxu1 }
 0x346   :  { %v5403_v3 = vpop.f32.mrb[33].mxu1 }
 0x347   :  { %v5405_v46 = vpop.f32.mrb[34].mxu1 }
 0x348   :  { %v5407_v8 = vpop.f32.mrb[35].mxu1 }
 0x34d   :  { %v5409_v26 = vpop.f32.mrb[36].mxu1 }
 0x34e   :  { %v5411_v20 = vpop.f32.mrb[37].mxu1 }
 0x34f   :  { %v5413_v32 = vpop.f32.mrb[38].mxu1 }
 0x350   :  { %v5415_v33 = vpop.f32.mrb[39].mxu1 }
 0x3e4   :  { %v3780_v22 = vpop.f32.mrb[32].mxu0 }
 0x3e5   :  { %v2155_v44 = vadd.f32 %v3780_v22, %v5424_v14  ;;  %v2086_v23 = vpop.f32.mrb[33].mxu0 }
 0x3e6   :  { %v2153_v5 = vadd.f32 %v5424_v14, %v2086_v23  ;;  %v3781_v19 = vpop.f32.mrb[34].mxu0 }
 0x3e7   :  { %v2156_v16 = vadd.f32 %v3781_v19, %v5424_v14  ;;  %v2089_v48 = vpop.f32.mrb[35].mxu0  ;;  %v2171_v45 = vmax.f32 %v2155_v44, 0.0 }
 0x3e8   :  { %v2169_v34 = vmax.f32 %v2153_v5, 0.0  ;;  %v2154_v27 = vadd.f32 %v5424_v14, %v2089_v48 }
 0x3e9   :  { %v2172_v50 = vmax.f32 %v2156_v16, 0.0  ;;  %v2191_v54 = vmul.f32 %v5430_v29, %v2171_v45 }
 0x3ea   :  { %v2170_v56 = vmax.f32 %v2154_v27, 0.0  ;;  %v2189_v15 = vmul.f32 %v5430_v29, %v2169_v34 }
 0x3eb   :  { %v2192_v40 = vmul.f32 %v5430_v29, %v2172_v50  ;;  %v2211_v57 = vsel %vm5817_vm7, %v2191_v54, 0.0  ;;  %vm5829_vm7 = vmmov %vm5807_vm0 }
 0x3ec   :  { %v2190_v13 = vmul.f32 %v5430_v29, %v2170_v56  ;;  %v2205_v55 = vsel %vm5815_vm12, %v2189_v15, 0.0  ;;  %vm5827_vm12 = vmmov %vm5807_vm0 }
 0x3ed   :  { %2206 = vadd.xlane.f32.xlu0 %v2205_v55  ;;  %v2214_v24 = vsel %vm5818_vm10, %v2192_v40, 0.0  ;;  %vm2279_vm10 = vcmask 23552  }
 0x3ee   :  { %v2208_v38 = vsel %vm5816_vm6, %v2190_v13, 0.0  ;;  %vm5828_vm6 = vmmov %vm5807_vm0 }
 0x3ef   :  { %2209 = vadd.xlane.f32.xlu1 %v2208_v38 }
 0x3f1   :  { %2212 = vadd.xlane.f32.xlu0 %v2211_v57 }
 0x3f3   :  { %2215 = vadd.xlane.f32.xlu1 %v2214_v24 }
 0x3f5   :  { %v3784_v52 = vpop.f32.mrb[36].mxu0 }
 0x3f6   :  { %v2159_v51 = vadd.f32 %v3784_v52, %v5424_v14  ;;  %v2102_v61 = vpop.f32.mrb[37].mxu0 }
 0x3f7   :  { %v2157_v10 = vadd.f32 %v5424_v14, %v2102_v61  ;;  %v3785_v60 = vpop.f32.mrb[38].mxu0 }
 0x3f8   :  { %v2160_v28 = vadd.f32 %v3785_v60, %v5424_v14  ;;  %v2105_v2 = vpop.f32.mrb[39].mxu0  ;;  %v2175_v25 = vmax.f32 %v2159_v51, 0.0 }
 0x3f9   :  { %v2173_v31 = vmax.f32 %v2157_v10, 0.0  ;;  %v2158_v35 = vadd.f32 %v5424_v14, %v2105_v2 }
 0x3fa   :  { %v2176_v58 = vmax.f32 %v2160_v28, 0.0  ;;  %v2195_v63 = vmul.f32 %v5430_v29, %v2175_v25 }
 0x3fb   :  { %v2174_v6 = vmax.f32 %v2158_v35, 0.0  ;;  %v2193_v0 = vmul.f32 %v5430_v29, %v2173_v31 }
 0x3fc   :  { %v2196_v53 = vmul.f32 %v5430_v29, %v2176_v58  ;;  %v2223_v42 = vsel %vm5807_vm0, %v2195_v63, 0.0  ;;  %v122_v63 = vld [vmem:[%s5725_s5 + $0x10] sm:$0xf] }
 0x3fd   :  { %v2194_v43 = vmul.f32 %v5430_v29, %v2174_v6  ;;  %v2217_v47 = vsel %vm5819_vm3, %v2193_v0, 0.0 }
 0x3fe   :  { %2218 = vadd.xlane.f32.xlu0 %v2217_v47  ;;  %v2226_v4 = vsel %vm5821_vm11, %v2196_v53, 0.0  ;;  %v121_v47 = vld [vmem:[%s5725_s5 + $0x8] sm:$0xff]  ;;  %v2256_v53 = vrot.slane %v5421_v7, 4 }
 0x3ff   :  { %v2220_v30 = vsel %vm5820_vm14, %v2194_v43, 0.0 }
 0x400   :  { %2221 = vadd.xlane.f32.xlu1 %v2220_v30  ;;  %v2257_v30 = vrot.slane %v121_v47, 4 }
 0x402   :  { %2224 = vadd.xlane.f32.xlu0 %v2223_v42  ;;  %v2259_v42 = vrot.slane %v122_v63, 4 }
 0x404   :  { %v3788_v37 = vpop.f32.mrb[40].mxu0  ;;  %2227 = vadd.xlane.f32.xlu1 %v2226_v4  ;;  %v5496_v4 = vsel %vm1366_vm5, %v2257_v30, %v2259_v42  ;;  %v5832_v42 = vld [vmem:[#allocation2_spill] sm:$0xff] }
 0x405   :  { %v2127_v18 = vadd.f32 %v3788_v37, %v3768_v62  ;;  %v2118_v39 = vpop.f32.mrb[41].mxu0  ;;  %vm5833_vm14 = vcmp.ne.f32.partialorder %v5832_v42, 0.0  ;;  %v4082_v42 = vld [vmem:[%s5722_s3 + $0x60] sm:$0xff] }
 0x406   :  { %v2119_v36 = vadd.f32 %v2118_v39, %v5403_v3  ;;  %v3789_v12 = vpop.f32.mrb[42].mxu0 }
 0x407   :  { %v2163_v22 = vadd.f32 %v5424_v14, %v2127_v18  ;;  %v2130_v44 = vadd.f32 %v3789_v12, %v5405_v46  ;;  %v2121_v23 = vpop.f32.mrb[43].mxu0 }
 0x408   :  { %v2161_v5 = vadd.f32 %v5424_v14, %v2119_v36  ;;  %v2122_v19 = vadd.f32 %v2121_v23, %v5407_v8 }
 0x409   :  { %v2164_v16 = vadd.f32 %v5424_v14, %v2130_v44  ;;  %v2179_v48 = vmax.f32 %v2163_v22, 0.0 }
 0x40a   :  { %v2177_v45 = vmax.f32 %v2161_v5, 0.0  ;;  %v2162_v62 = vadd.f32 %v5424_v14, %v2122_v19 }
 0x40b   :  { %v2180_v34 = vmax.f32 %v2164_v16, 0.0  ;;  %v2199_v46 = vmul.f32 %v5430_v29, %v2179_v48 }
 0x40c   :  { %v2178_v27 = vmax.f32 %v2162_v62, 0.0  ;;  %v2197_v3 = vmul.f32 %v5430_v29, %v2177_v45 }
 0x40d   :  { %v2200_v8 = vmul.f32 %v5430_v29, %v2180_v34  ;;  %v2235_v13 = vsel %vm5824_vm8, %v2199_v46, 0.0 }
 0x40e   :  { %v2229_v50 = vsel %vm5822_vm15, %v2197_v3, 0.0  ;;  %v2198_v56 = vmul.f32 %v5430_v29, %v2178_v27 }
 0x40f   :  { %2230 = vadd.xlane.f32.xlu0 %v2229_v50  ;;  %v2238_v54 = vsel %vm5825_vm9, %v2200_v8, 0.0 }
 0x410   :  { %v2232_v15 = vsel %vm5823_vm1, %v2198_v56, 0.0 }
 0x411   :  { %2233 = vadd.xlane.f32.xlu1 %v2232_v15 }
 0x413   :  { %2236 = vadd.xlane.f32.xlu0 %v2235_v13 }
 0x415   :  { %v3792_v55 = vpop.f32.mrb[44].mxu0  ;;  %2239 = vadd.xlane.f32.xlu1 %v2238_v54 }
 0x416   :  { %v2143_v40 = vadd.f32 %v3792_v55, %v5409_v26  ;;  %v2134_v38 = vpop.f32.mrb[45].mxu0 }
 0x417   :  { %v2135_v57 = vadd.f32 %v2134_v38, %v5411_v20  ;;  %v3793_v24 = vpop.f32.mrb[46].mxu0 }
 0x418   :  { %v2167_v52 = vadd.f32 %v5424_v14, %v2143_v40  ;;  %v2146_v51 = vadd.f32 %v3793_v24, %v5413_v32  ;;  %v2137_v61 = vpop.f32.mrb[47].mxu0 }
 0x419   :  { %v2165_v10 = vadd.f32 %v5424_v14, %v2135_v57  ;;  %v2138_v60 = vadd.f32 %v2137_v61, %v5415_v33 }
 0x41a   :  { %v2168_v28 = vadd.f32 %v5424_v14, %v2146_v51  ;;  %v2183_v2 = vmax.f32 %v2167_v52, 0.0  ;;  %v4078_v52 = vld [vmem:[%s5722_s3] sm:$0xff] }
 0x41b   :  { %v2181_v25 = vmax.f32 %v2165_v10, 0.0  ;;  %v2166_v26 = vadd.f32 %v5424_v14, %v2138_v60 }
 0x41c   :  { %v2184_v31 = vmax.f32 %v2168_v28, 0.0  ;;  %v2203_v32 = vmul.f32 %v5430_v29, %v2183_v2 }
 0x41d   :  { %v2182_v35 = vmax.f32 %v2166_v26, 0.0  ;;  %v2201_v20 = vmul.f32 %v5430_v29, %v2181_v25 }
 0x41e   :  { %v2204_v33 = vmul.f32 %v5430_v29, %v2184_v31  ;;  %v2247_v43 = vsel %vm5828_vm6, %v2203_v32, 0.0  ;;  %vm3470_vm6 = vcmask 1045509  }
 0x41f   :  { %v2241_v58 = vsel %vm5826_vm4, %v2201_v20, 0.0  ;;  %v2202_v6 = vmul.f32 %v5430_v29, %v2182_v35  ;;  %v5493_v29 = vsel %vm1366_vm5, %v2256_v53, %v2257_v30  ;;  %vm2596_vm5 = vcmask 18434   ;;  %v5830_v20 = vld [vmem:[#allocation3_spill] sm:$0xff] }
 0x420   :  { %2242 = vadd.xlane.f32.xlu0 %v2241_v58  ;;  %v2250_v14 = vsel %vm5829_vm7, %v2204_v33, 0.0  ;;  %vm5831_vm3 = vcmp.ne.f32.partialorder %v5830_v20, 0.0  ;;  %vm3301_vm4 = vcmask 57344   ;;  %vm3473_vm7 = vcmask 1046534  }
 0x421   :  { %v2244_v0 = vsel %vm5827_vm12, %v2202_v6, 0.0  ;;  %v4079_v6 = vld [vmem:[%s5722_s3 + $0x18] sm:$0xff]  ;;  %vm3467_vm12 = vcmask 1044484  }
 0x422   :  { %2245 = vadd.xlane.f32.xlu1 %v2244_v0 }
 0x424   :  { %2248 = vadd.xlane.f32.xlu0 %v2247_v43 }
 0x426   :  { %2251 = vadd.xlane.f32.xlu1 %v2250_v14 }
 0x47a   :  { %v2207_v37 = vpop.xlane.xlu0 %2206 }
 0x47b   :  { %v2263_v18 = vmul.f32 %v5493_v29, %v2207_v37 }
 0x47c   :  { %v2210_v39 = vpop.xlane.xlu1 %2209 }
 0x47d   :  { %v2264_v36 = vmul.f32 %v5496_v4, %v2210_v39  ;;  %v2280_v22 = vsel %vm2279_vm10, %v2263_v18, 0.0 }
 0x47e   :  { %v2213_v12 = vpop.xlane.xlu0 %2212 }
 0x47f   :  { %v2281_v7 = vsel %vm2279_vm10, %v2264_v36, 0.0  ;;  %v2265_v44 = vmul.f32 %v5493_v29, %v2213_v12 }
 0x480   :  { %v2282_v23 = vadd.f32 %v2281_v7, %v2280_v22  ;;  %v2216_v5 = vpop.xlane.xlu1 %2215 }
 0x481   :  { %v2266_v19 = vmul.f32 %v5496_v4, %v2216_v5  ;;  %v2289_v48 = vsel %vm2279_vm10, %v2265_v44, 0.0 }
 0x482   :  { %v2283_v16 = vrot.slane %v2282_v23, 4 }
 0x483   :  { %v2290_v45 = vsel %vm2279_vm10, %v2266_v19, 0.0 }
 0x484   :  { %v2284_v62 = vadd.f32 %v2283_v16, %v2282_v23  ;;  %v2291_v34 = vadd.f32 %v2290_v45, %v2289_v48 }
 0x486   :  { %v2285_v27 = vrot.slane %v2284_v62, 2  ;;  %v2292_v3 = vrot.slane %v2291_v34, 4 }
 0x488   :  { %v2286_v50 = vadd.f32 %v2285_v27, %v2284_v62  ;;  %v2293_v56 = vadd.f32 %v2292_v3, %v2291_v34  ;;  %v4080_v62 = vld [vmem:[%s5722_s3 + $0x30] sm:$0xff] }
 0x48a   :  { %v2287_v46 = vrot.slane %v2286_v50, 1  ;;  %v2294_v15 = vrot.slane %v2293_v56, 2 }
 0x48b   :  { %v2219_v8 = vpop.xlane.xlu0 %2218 }
 0x48c   :  { %v2267_v13 = vmul.f32 %v5493_v29, %v2219_v8  ;;  %v2295_v55 = vadd.f32 %v2294_v15, %v2293_v56  ;;  %v2288_v40 = vadd.f32 %v2287_v46, %v2286_v50 }
 0x48d   :  { %v2222_v54 = vpop.xlane.xlu1 %2221 }
 0x48e   :  { %v2268_v38 = vmul.f32 %v5496_v4, %v2222_v54  ;;  %v2296_v57 = vrot.slane %v2295_v55, 1  ;;  %v2352_v51 = vadd.f32 %v4078_v52, %v2288_v40  ;;  %v2298_v61 = vsel %vm2279_vm10, %v2267_v13, 0.0  ;;  %v5834_v54 = vld [vmem:[#allocation5_spill] sm:$0xff] }
 0x48f   :  { %v2225_v24 = vpop.xlane.xlu0 %2224  ;;  %vm5835_vm0 = vcmp.ne.f32.partialorder %v5834_v54, 0.0 }
 0x490   :  { %v2299_v10 = vsel %vm2279_vm10, %v2268_v38, 0.0  ;;  %v2269_v60 = vmul.f32 %v5493_v29, %v2225_v24  ;;  %v2368_v25 = vrot.slane %v2352_v51, 7  ;;  %v2297_v26 = vadd.f32 %v2296_v57, %v2295_v55  ;;  %v4081_v38 = vld [vmem:[%s5722_s3 + $0x48] sm:$0xff] }
 0x491   :  { %v2300_v28 = vadd.f32 %v2299_v10, %v2298_v61  ;;  %v2228_v2 = vpop.xlane.xlu1 %2227 }
 0x492   :  { %v2270_v31 = vmul.f32 %v5496_v4, %v2228_v2  ;;  %v5517_v58 = vsel %vm5831_vm3, %v2368_v25, -1e+10  ;;  %v2353_v32 = vadd.f32 %v4079_v6, %v2297_v26  ;;  %v2307_v0 = vsel %vm2279_vm10, %v2269_v60, 0.0  ;;  %v5836_v25 = vld [vmem:[#allocation6_spill] sm:$0xff] }
 0x493   :  { %v2301_v35 = vrot.slane %v2300_v28, 4  ;;  %v2597_v43 = vsel %vm2596_vm5, %v5517_v58, -inf  ;;  %vm5837_vm11 = vcmp.ne.f32.partialorder %v5836_v25, 0.0  ;;  %vm3480_vm3 = vcmask 1041409  }
 0x494   :  { %v2308_v33 = vsel %vm2279_vm10, %v2270_v31, 0.0  ;;  %2598 = vmax.xlane.f32.xlu0 %v2597_v43  ;;  %v2369_v63 = vrot.slane %v2353_v32, 7 }
 0x495   :  { %v2302_v14 = vadd.f32 %v2301_v35, %v2300_v28  ;;  %v2309_v47 = vadd.f32 %v2308_v33, %v2307_v0 }
 0x496   :  { %v5528_v37 = vsel %vm5833_vm14, %v2369_v63, -1e+10 }
 0x497   :  { %v2303_v53 = vrot.slane %v2302_v14, 2  ;;  %v2310_v30 = vrot.slane %v2309_v47, 4  ;;  %v2600_v18 = vsel %vm2596_vm5, %v5528_v37, -inf }
 0x498   :  { %2601 = vmax.xlane.f32.xlu1 %v2600_v18 }
 0x499   :  { %v2304_v39 = vadd.f32 %v2303_v53, %v2302_v14  ;;  %v2311_v36 = vadd.f32 %v2310_v30, %v2309_v47 }
 0x49b   :  { %v2305_v12 = vrot.slane %v2304_v39, 1  ;;  %v2312_v22 = vrot.slane %v2311_v36, 2 }
 0x49c   :  { %v2231_v7 = vpop.xlane.xlu0 %2230 }
 0x49d   :  { %v2271_v44 = vmul.f32 %v5493_v29, %v2231_v7  ;;  %v2313_v23 = vadd.f32 %v2312_v22, %v2311_v36  ;;  %v2306_v19 = vadd.f32 %v2305_v12, %v2304_v39 }
 0x49e   :  { %v2234_v5 = vpop.xlane.xlu1 %2233 }
 0x49f   :  { %v2272_v16 = vmul.f32 %v5496_v4, %v2234_v5  ;;  %v2314_v48 = vrot.slane %v2313_v23, 1  ;;  %v2354_v34 = vadd.f32 %v4080_v62, %v2306_v19  ;;  %v2316_v27 = vsel %vm2279_vm10, %v2271_v44, 0.0 }
 0x4a0   :  { %v2237_v45 = vpop.xlane.xlu0 %2236 }
 0x4a1   :  { %v2317_v3 = vsel %vm2279_vm10, %v2272_v16, 0.0  ;;  %v2273_v50 = vmul.f32 %v5493_v29, %v2237_v45  ;;  %v2370_v15 = vrot.slane %v2354_v34, 7  ;;  %v2315_v8 = vadd.f32 %v2314_v48, %v2313_v23  ;;  %v5838_v16 = vld [vmem:[#allocation7_spill] sm:$0xff]  ;;  %v4083_v45 = vld [vmem:[%s5722_s3 + $0x78] sm:$0xff] }
 0x4a2   :  { %v2318_v56 = vadd.f32 %v2317_v3, %v2316_v27  ;;  %v2240_v46 = vpop.xlane.xlu1 %2239  ;;  %vm5839_vm15 = vcmp.ne.f32.partialorder %v5838_v16, 0.0 }
 0x4a3   :  { %v2274_v13 = vmul.f32 %v5496_v4, %v2240_v46  ;;  %v5543_v40 = vsel %vm5835_vm0, %v2370_v15, -1e+10  ;;  %v2355_v57 = vadd.f32 %v4081_v38, %v2315_v8  ;;  %v2325_v24 = vsel %vm2279_vm10, %v2273_v50, 0.0  ;;  %v5840_v15 = vld [vmem:[#allocation9_spill] sm:$0xff] }
 0x4a4   :  { %v2319_v55 = vrot.slane %v2318_v56, 4  ;;  %v2603_v51 = vsel %vm2596_vm5, %v5543_v40, -inf  ;;  %vm5841_vm1 = vcmp.ne.f32.partialorder %v5840_v15, 0.0 }
 0x4a5   :  { %v2326_v52 = vsel %vm2279_vm10, %v2274_v13, 0.0  ;;  %2604 = vmax.xlane.f32.xlu0 %v2603_v51  ;;  %v2371_v60 = vrot.slane %v2355_v57, 7 }
 0x4a6   :  { %v2320_v61 = vadd.f32 %v2319_v55, %v2318_v56  ;;  %v2327_v10 = vadd.f32 %v2326_v52, %v2325_v24 }
 0x4a7   :  { %v5554_v26 = vsel %vm5837_vm11, %v2371_v60, -1e+10 }
 0x4a8   :  { %v2321_v28 = vrot.slane %v2320_v61, 2  ;;  %v2328_v2 = vrot.slane %v2327_v10, 4  ;;  %v2606_v31 = vsel %vm2596_vm5, %v5554_v26, -inf }
 0x4a9   :  { %2607 = vmax.xlane.f32.xlu1 %v2606_v31  ;;  %v4085_v31 = vld [vmem:[%s5722_s3 + $0xa8] sm:$0xff] }
 0x4aa   :  { %v2322_v35 = vadd.f32 %v2321_v28, %v2320_v61  ;;  %v2329_v20 = vadd.f32 %v2328_v2, %v2327_v10  ;;  %v4084_v61 = vld [vmem:[%s5722_s3 + $0x90] sm:$0xff]  ;;  %v5842_v2 = vld [vmem:[#allocation10_spill] sm:$0xff]  ;;  %s4090_s3 = smov 3  }
 0x4ab   :  { %vm5843_vm8 = vcmp.ne.f32.partialorder %v5842_v2, 0.0 }
 0x4ac   :  { %v2323_v6 = vrot.slane %v2322_v35, 1  ;;  %v2330_v32 = vrot.slane %v2329_v20, 2 }
 0x4ad   :  { %v2243_v0 = vpop.xlane.xlu0 %2242 }
 0x4ae   :  { %v2275_v33 = vmul.f32 %v5493_v29, %v2243_v0  ;;  %v2331_v43 = vadd.f32 %v2330_v32, %v2329_v20  ;;  %v2324_v47 = vadd.f32 %v2323_v6, %v2322_v35  ;;  %v5844_v32 = vld [vmem:[#allocation8_spill] sm:$0xff] }
 0x4af   :  { %v2246_v14 = vpop.xlane.xlu1 %2245  ;;  %vm5845_vm9 = vcmp.ne.f32.partialorder %v5844_v32, 0.0 }
 0x4b0   :  { %v2276_v63 = vmul.f32 %v5496_v4, %v2246_v14  ;;  %v2332_v53 = vrot.slane %v2331_v43, 1  ;;  %v2356_v18 = vadd.f32 %v4082_v42, %v2324_v47  ;;  %v2334_v39 = vsel %vm2279_vm10, %v2275_v33, 0.0 }
 0x4b1   :  { %v2249_v30 = vpop.xlane.xlu0 %2248 }
 0x4b2   :  { %v2335_v36 = vsel %vm2279_vm10, %v2276_v63, 0.0  ;;  %v2277_v12 = vmul.f32 %v5493_v29, %v2249_v30  ;;  %v2372_v44 = vrot.slane %v2356_v18, 7  ;;  %v2333_v23 = vadd.f32 %v2332_v53, %v2331_v43 }
 0x4b3   :  { %v2336_v22 = vadd.f32 %v2335_v36, %v2334_v39  ;;  %v2252_v7 = vpop.xlane.xlu1 %2251 }
 0x4b4   :  { %v2278_v5 = vmul.f32 %v5496_v4, %v2252_v7  ;;  %v5569_v48 = vsel %vm5839_vm15, %v2372_v44, -1e+10  ;;  %v2357_v62 = vadd.f32 %v4083_v45, %v2333_v23  ;;  %v2343_v34 = vsel %vm2279_vm10, %v2277_v12, 0.0 }
 0x4b5   :  { %v2337_v19 = vrot.slane %v2336_v22, 4  ;;  %v2609_v27 = vsel %vm2596_vm5, %v5569_v48, -inf }
 0x4b6   :  { %v2344_v29 = vsel %vm2279_vm10, %v2278_v5, 0.0  ;;  %2610 = vmax.xlane.f32.xlu0 %v2609_v27  ;;  %v2373_v4 = vrot.slane %v2357_v62, 7 }
 0x4b7   :  { %v2338_v3 = vadd.f32 %v2337_v19, %v2336_v22  ;;  %v2345_v50 = vadd.f32 %v2344_v29, %v2343_v34 }
 0x4b8   :  { %v5580_v8 = vsel %vm5841_vm1, %v2373_v4, -1e+10 }
 0x4b9   :  { %v2339_v56 = vrot.slane %v2338_v3, 2  ;;  %v2346_v46 = vrot.slane %v2345_v50, 4  ;;  %v2612_v13 = vsel %vm2596_vm5, %v5580_v8, -inf }
 0x4ba   :  { %2613 = vmax.xlane.f32.xlu1 %v2612_v13 }
 0x4bb   :  { %v2340_v55 = vadd.f32 %v2339_v56, %v2338_v3  ;;  %v2347_v54 = vadd.f32 %v2346_v46, %v2345_v50 }
 0x4bd   :  { %v2341_v38 = vrot.slane %v2340_v55, 1  ;;  %v2348_v57 = vrot.slane %v2347_v54, 2 }
 0x4bf   :  { %v2349_v24 = vadd.f32 %v2348_v57, %v2347_v54  ;;  %v2342_v52 = vadd.f32 %v2341_v38, %v2340_v55 }
 0x4c1   :  { %v2350_v51 = vrot.slane %v2349_v24, 1  ;;  %v2358_v10 = vadd.f32 %v4084_v61, %v2342_v52 }
 0x4c3   :  { %v2374_v60 = vrot.slane %v2358_v10, 7  ;;  %v2351_v28 = vadd.f32 %v2350_v51, %v2349_v24 }
 0x4c5   :  { %v5589_v25 = vsel %vm5843_vm8, %v2374_v60, -1e+10  ;;  %v2359_v35 = vadd.f32 %v4085_v31, %v2351_v28 }
 0x4c6   :  { %v2615_v20 = vsel %vm2596_vm5, %v5589_v25, -inf }
 0x4c7   :  { %2616 = vmax.xlane.f32.xlu0 %v2615_v20  ;;  %v2375_v6 = vrot.slane %v2359_v35, 7 }
 0x4c9   :  { %v5598_v0 = vsel %vm5845_vm9, %v2375_v6, -1e+10 }
 0x4ca   :  { %v2618_v33 = vsel %vm2596_vm5, %v5598_v0, -inf }
 0x4cb   :  { %2619 = vmax.xlane.f32.xlu1 %v2618_v33 }
 0x521   :  { %v2599_v43 = vpop.xlane.xlu0 %2598 }
 0x522   :  { %v2621_v14 = vsub.f32 %v5517_v58, %v2599_v43 }
 0x524   :  { %v2629_v47 = vmul.f32 1.442695, %v2621_v14 }
 0x525   :  { %v2602_v63 = vpop.xlane.xlu1 %2601 }
 0x526   :  { %4005 = vpow2.f32 %v2629_v47  ;;  %v2622_v53 = vsub.f32 %v5528_v37, %v2602_v63 }
 0x528   :  { %v2631_v30 = vmul.f32 1.442695, %v2622_v53 }
 0x52a   :  { %4007 = vpow2.f32 %v2631_v30 }
 0x530   :  { %v4006_v42 = vpop.eup %4005 }
 0x531   :  { %v2645_v39 = vsel %vm2596_vm5, %v4006_v42, 0.0 }
 0x532   :  { %v2605_v18 = vpop.xlane.xlu0 %2604  ;;  %2646 = vadd.xlane.f32.xlu0 %v2645_v39 }
 0x533   :  { %v2623_v36 = vsub.f32 %v5543_v40, %v2605_v18 }
 0x534   :  { %v4008_v12 = vpop.eup %4007 }
 0x535   :  { %v2633_v22 = vmul.f32 1.442695, %v2623_v36  ;;  %v2648_v44 = vsel %vm2596_vm5, %v4008_v12, 0.0 }
 0x536   :  { %v2608_v7 = vpop.xlane.xlu1 %2607  ;;  %2649 = vadd.xlane.f32.xlu1 %v2648_v44 }
 0x537   :  { %4009 = vpow2.f32 %v2633_v22  ;;  %v2624_v23 = vsub.f32 %v5554_v26, %v2608_v7 }
 0x539   :  { %v2635_v5 = vmul.f32 1.442695, %v2624_v23 }
 0x53b   :  { %4011 = vpow2.f32 %v2635_v5 }
 0x541   :  { %v4010_v19 = vpop.eup %4009 }
 0x542   :  { %v2651_v45 = vsel %vm2596_vm5, %v4010_v19, 0.0 }
 0x543   :  { %v2611_v16 = vpop.xlane.xlu0 %2610  ;;  %2652 = vadd.xlane.f32.xlu0 %v2651_v45 }
 0x544   :  { %v2625_v62 = vsub.f32 %v5569_v48, %v2611_v16 }
 0x545   :  { %v4012_v34 = vpop.eup %4011 }
 0x546   :  { %v2637_v29 = vmul.f32 1.442695, %v2625_v62  ;;  %v2654_v3 = vsel %vm2596_vm5, %v4012_v34, 0.0 }
 0x547   :  { %v2614_v27 = vpop.xlane.xlu1 %2613  ;;  %2655 = vadd.xlane.f32.xlu1 %v2654_v3 }
 0x548   :  { %4013 = vpow2.f32 %v2637_v29  ;;  %v2626_v50 = vsub.f32 %v5580_v8, %v2614_v27 }
 0x54a   :  { %v2639_v4 = vmul.f32 1.442695, %v2626_v50 }
 0x54c   :  { %4015 = vpow2.f32 %v2639_v4 }
 0x552   :  { %v4014_v56 = vpop.eup %4013 }
 0x553   :  { %v2657_v15 = vsel %vm2596_vm5, %v4014_v56, 0.0 }
 0x554   :  { %v2617_v46 = vpop.xlane.xlu0 %2616  ;;  %2658 = vadd.xlane.f32.xlu0 %v2657_v15 }
 0x555   :  { %v2627_v13 = vsub.f32 %v5589_v25, %v2617_v46 }
 0x556   :  { %v4016_v55 = vpop.eup %4015 }
 0x557   :  { %v2641_v54 = vmul.f32 1.442695, %v2627_v13  ;;  %v2660_v57 = vsel %vm2596_vm5, %v4016_v55, 0.0 }
 0x558   :  { %v2620_v38 = vpop.xlane.xlu1 %2619  ;;  %2661 = vadd.xlane.f32.xlu1 %v2660_v57 }
 0x559   :  { %4017 = vpow2.f32 %v2641_v54  ;;  %v2628_v24 = vsub.f32 %v5598_v0, %v2620_v38 }
 0x55b   :  { %v2643_v52 = vmul.f32 1.442695, %v2628_v24 }
 0x55d   :  { %4019 = vpow2.f32 %v2643_v52 }
 0x563   :  { %v5616_v51 = vpop.eup %4017 }
 0x564   :  { %v2663_v61 = vsel %vm2596_vm5, %v5616_v51, 0.0 }
 0x565   :  { %2664 = vadd.xlane.f32.xlu0 %v2663_v61 }
 0x567   :  { %v5620_v10 = vpop.eup %4019 }
 0x568   :  { %v2666_v60 = vsel %vm2596_vm5, %v5620_v10, 0.0  ;;  %vm3476_vm5 = vcmask 1047559  }
 0x569   :  { %2667 = vadd.xlane.f32.xlu1 %v2666_v60 }
 0x5bf   :  { %v2647_v28 = vpop.xlane.xlu0 %2646 }
 0x5c0   :  { %4021 = vrcp.f32 %v2647_v28 }
 0x5c3   :  { %v2650_v2 = vpop.xlane.xlu1 %2649 }
 0x5c4   :  { %4023 = vrcp.f32 %v2650_v2 }
 0x5ca   :  { %v4022_v31 = vpop.eup %4021 }
 0x5cb   :  { %v2677_v35 = vmul.f32 %v4022_v31, %v4006_v42 }
 0x5cd   :  { %v2686_v20 = vrot.slane %v2677_v35, 2 }
 0x5ce   :  { %v4024_v6 = vpop.eup %4023 }
 0x5cf   :  { %v2678_v32 = vmul.f32 %v4024_v6, %v4008_v12  ;;  %3797 = vmatmul.mubr.msk.f32.vlgmr.msra.gmra.mrb[40].mxu1 %vm2279_vm10, %v2686_v20 }
 0x5d0   :  { %v2653_v33 = vpop.xlane.xlu0 %2652  ;;  %3800 = vmatpush3.msk.msra.mxu1 %vm989_vm13, %v5080_v17  ;;  %3801 = vmatprep.mubr.msk.f32.mxu1 %vm5797_vm2, %v5796_v49 }
 0x5d1   :  { %4025 = vrcp.f32 %v2653_v33  ;;  %3804 = vmatprep.subr.mxu1 %v5796_v49  ;;  %v2763_v43 = vrot.slane %v2678_v32, 2 }
 0x5d3   :  { %3802 = vmatmul.mubr.msk.f32.vlgmr.msra.gmra.mrb[42].mxu1 %vm2279_vm10, %v2763_v43 }
 0x5d4   :  { %v2656_v14 = vpop.xlane.xlu1 %2655  ;;  %3805 = vmatpush3.msk.msra.mxu1 %vm989_vm13, %v5087_v59  ;;  %3806 = vmatprep.mubr.msk.f32.mxu1 %vm5797_vm2, %v5796_v49 }
 0x5d5   :  { %4027 = vrcp.f32 %v2656_v14  ;;  %3809 = vmatprep.subr.mxu1 %v5796_v49 }
 0x5db   :  { %v4026_v47 = vpop.eup %4025 }
 0x5dc   :  { %v2679_v17 = vmul.f32 %v4026_v47, %v4010_v19 }
 0x5de   :  { %v2840_v63 = vrot.slane %v2679_v17, 2 }
 0x5df   :  { %v4028_v53 = vpop.eup %4027 }
 0x5e0   :  { %v2680_v30 = vmul.f32 %v4028_v53, %v4012_v34  ;;  %3807 = vmatmul.mubr.msk.f32.vlgmr.msra.gmra.mrb[44].mxu1 %vm2279_vm10, %v2840_v63 }
 0x5e1   :  { %v2659_v42 = vpop.xlane.xlu0 %2658  ;;  %3810 = vmatpush3.msk.msra.mxu1 %vm989_vm13, %v5097_v9  ;;  %3811 = vmatprep.mubr.msk.f32.mxu1 %vm5797_vm2, %v5796_v49 }
 0x5e2   :  { %4029 = vrcp.f32 %v2659_v42  ;;  %3814 = vmatprep.subr.mxu1 %v5796_v49  ;;  %v2917_v59 = vrot.slane %v2680_v30, 2 }
 0x5e4   :  { %3812 = vmatmul.mubr.msk.f32.vlgmr.msra.gmra.mrb[46].mxu1 %vm2279_vm10, %v2917_v59 }
 0x5e5   :  { %v2662_v18 = vpop.xlane.xlu1 %2661  ;;  %3815 = vmatpush3.msk.msra.mxu1 %vm989_vm13, %v5102_v11  ;;  %3816 = vmatprep.mubr.msk.f32.mxu1 %vm5797_vm2, %v5796_v49 }
 0x5e6   :  { %4031 = vrcp.f32 %v2662_v18  ;;  %3819 = vmatprep.subr.mxu1 %v5796_v49 }
 0x5ec   :  { %v4030_v39 = vpop.eup %4029 }
 0x5ed   :  { %v2681_v9 = vmul.f32 %v4030_v39, %v4014_v56 }
 0x5ef   :  { %v2994_v36 = vrot.slane %v2681_v9, 2 }
 0x5f0   :  { %v4032_v12 = vpop.eup %4031 }
 0x5f1   :  { %v2682_v22 = vmul.f32 %v4032_v12, %v4016_v55  ;;  %3817 = vmatmul.mubr.msk.f32.vlgmr.msra.gmra.mrb[48].mxu1 %vm2279_vm10, %v2994_v36 }
 0x5f2   :  { %v2665_v7 = vpop.xlane.xlu0 %2664  ;;  %3820 = vmatpush3.msk.msra.mxu1 %vm989_vm13, %v5106_v1  ;;  %3821 = vmatprep.mubr.msk.f32.mxu1 %vm5797_vm2, %v5796_v49 }
 0x5f3   :  { %4033 = vrcp.f32 %v2665_v7  ;;  %3824 = vmatprep.subr.mxu1 %v5796_v49  ;;  %v3071_v11 = vrot.slane %v2682_v22, 2 }
 0x5f5   :  { %3822 = vmatmul.mubr.msk.f32.vlgmr.msra.gmra.mrb[50].mxu1 %vm2279_vm10, %v3071_v11 }
 0x5f6   :  { %v2668_v44 = vpop.xlane.xlu1 %2667  ;;  %3825 = vmatpush3.msk.msra.mxu1 %vm989_vm13, %v5110_v21  ;;  %3826 = vmatprep.mubr.msk.f32.mxu1 %vm5797_vm2, %v5796_v49 }
 0x5f7   :  { %4035 = vrcp.f32 %v2668_v44  ;;  %3829 = vmatprep.subr.mxu1 %v5796_v49 }
 0x5fd   :  { %v4034_v23 = vpop.eup %4033 }
 0x5fe   :  { %v2683_v1 = vmul.f32 %v4034_v23, %v5616_v51 }
 0x600   :  { %v3148_v5 = vrot.slane %v2683_v1, 2 }
 0x601   :  { %v4036_v19 = vpop.eup %4035 }
 0x602   :  { %v2684_v16 = vmul.f32 %v4036_v19, %v5620_v10  ;;  %3827 = vmatmul.mubr.msk.f32.vlgmr.msra.gmra.mrb[52].mxu1 %vm2279_vm10, %v3148_v5 }
 0x603   :  { %3830 = vmatpush3.msk.msra.mxu1 %vm989_vm13, %v5118_v41  ;;  %3831 = vmatprep.mubr.msk.f32.mxu1 %vm5797_vm2, %v5796_v49  ;;  %vm3438_vm13 = vcmask 89088   ;;  %vm3464_vm2 = vcmask 1043459  }
 0x604   :  { %v3225_v21 = vrot.slane %v2684_v16, 2 }
 0x606   :  { %3832 = vmatmul.mubr.msk.f32.vlgmr.msra.gmra.mrb[54].mxu1 %vm2279_vm10, %v3225_v21 }
 0x6a2   :  { %v2758_v45 = vpop.f32.mrb[40].mxu1 }
 0x6a3   :  { %v3798_v62 = vpop.f32.mrb[41].mxu1  ;;  %v3302_v34 = vsel %vm3301_vm4, %v2758_v45, -inf }
 0x6a4   :  { %3303 = vmax.xlane.f32.xlu0 %v3302_v34 }
 0x6a6   :  { %v2835_v29 = vpop.f32.mrb[42].mxu1 }
 0x6a7   :  { %v3803_v27 = vpop.f32.mrb[43].mxu1  ;;  %v3305_v3 = vsel %vm3301_vm4, %v2835_v29, -inf }
 0x6a8   :  { %3306 = vmax.xlane.f32.xlu0 %v3305_v3 }
 0x6b3   :  { %v2912_v50 = vpop.f32.mrb[44].mxu1 }
 0x6b4   :  { %v3808_v4 = vpop.f32.mrb[45].mxu1  ;;  %v3308_v41 = vsel %vm3301_vm4, %v2912_v50, -inf }
 0x6b5   :  { %3309 = vmax.xlane.f32.xlu1 %v3308_v41 }
 0x6b7   :  { %v2989_v49 = vpop.f32.mrb[46].mxu1 }
 0x6b8   :  { %v3813_v56 = vpop.f32.mrb[47].mxu1  ;;  %v3311_v46 = vsel %vm3301_vm4, %v2989_v49, -inf }
 0x6b9   :  { %3312 = vmax.xlane.f32.xlu1 %v3311_v46 }
 0x6c4   :  { %v3066_v15 = vpop.f32.mrb[48].mxu1 }
 0x6c5   :  { %v3818_v13 = vpop.f32.mrb[49].mxu1  ;;  %v3314_v55 = vsel %vm3301_vm4, %v3066_v15, -inf }
 0x6c6   :  { %3315 = vmax.xlane.f32.xlu0 %v3314_v55 }
 0x6c8   :  { %v3143_v54 = vpop.f32.mrb[50].mxu1 }
 0x6c9   :  { %v3823_v38 = vpop.f32.mrb[51].mxu1  ;;  %v3317_v57 = vsel %vm3301_vm4, %v3143_v54, -inf }
 0x6ca   :  { %3318 = vmax.xlane.f32.xlu1 %v3317_v57 }
 0x6d5   :  { %v3220_v24 = vpop.f32.mrb[52].mxu1 }
 0x6d6   :  { %v3828_v52 = vpop.f32.mrb[53].mxu1  ;;  %v3320_v51 = vsel %vm3301_vm4, %v3220_v24, -inf }
 0x6d7   :  { %3321 = vmax.xlane.f32.xlu0 %v3320_v51 }
 0x6d9   :  { %v3297_v61 = vpop.f32.mrb[54].mxu1 }
 0x6da   :  { %v3833_v10 = vpop.f32.mrb[55].mxu1  ;;  %v3323_v60 = vsel %vm3301_vm4, %v3297_v61, -inf }
 0x6db   :  { %3324 = vmax.xlane.f32.xlu1 %v3323_v60 }
 0x731   :  { %v3304_v28 = vpop.xlane.xlu0 %3303 }
 0x732   :  { %v3326_v2 = vsub.f32 %v2758_v45, %v3304_v28 }
 0x734   :  { %v3334_v31 = vmul.f32 1.442695, %v3326_v2 }
 0x735   :  { %v3307_v35 = vpop.xlane.xlu0 %3306 }
 0x736   :  { %4037 = vpow2.f32 %v3334_v31  ;;  %v3327_v20 = vsub.f32 %v2835_v29, %v3307_v35 }
 0x738   :  { %v3336_v6 = vmul.f32 1.442695, %v3327_v20 }
 0x73a   :  { %4039 = vpow2.f32 %v3336_v6 }
 0x740   :  { %v4038_v32 = vpop.eup %4037 }
 0x741   :  { %v3350_v43 = vsel %vm3301_vm4, %v4038_v32, 0.0 }
 0x742   :  { %v3310_v33 = vpop.xlane.xlu1 %3309  ;;  %3351 = vadd.xlane.f32.xlu0 %v3350_v43 }
 0x743   :  { %v3328_v14 = vsub.f32 %v2912_v50, %v3310_v33 }
 0x744   :  { %v4040_v47 = vpop.eup %4039 }
 0x745   :  { %v3338_v17 = vmul.f32 1.442695, %v3328_v14  ;;  %v3353_v53 = vsel %vm3301_vm4, %v4040_v47, 0.0 }
 0x746   :  { %v3313_v63 = vpop.xlane.xlu1 %3312  ;;  %3354 = vadd.xlane.f32.xlu0 %v3353_v53 }
 0x747   :  { %4041 = vpow2.f32 %v3338_v17  ;;  %v3329_v30 = vsub.f32 %v2989_v49, %v3313_v63 }
 0x749   :  { %v3340_v42 = vmul.f32 1.442695, %v3329_v30 }
 0x74b   :  { %4043 = vpow2.f32 %v3340_v42 }
 0x751   :  { %v4042_v59 = vpop.eup %4041 }
 0x752   :  { %v3356_v39 = vsel %vm3301_vm4, %v4042_v59, 0.0 }
 0x753   :  { %v3316_v18 = vpop.xlane.xlu0 %3315  ;;  %3357 = vadd.xlane.f32.xlu1 %v3356_v39 }
 0x754   :  { %v3330_v9 = vsub.f32 %v3066_v15, %v3316_v18 }
 0x755   :  { %v4044_v36 = vpop.eup %4043 }
 0x756   :  { %v3342_v12 = vmul.f32 1.442695, %v3330_v9  ;;  %v3359_v7 = vsel %vm3301_vm4, %v4044_v36, 0.0 }
 0x757   :  { %v3319_v22 = vpop.xlane.xlu1 %3318  ;;  %3360 = vadd.xlane.f32.xlu1 %v3359_v7 }
 0x758   :  { %4045 = vpow2.f32 %v3342_v12  ;;  %v3331_v11 = vsub.f32 %v3143_v54, %v3319_v22 }
 0x75a   :  { %v3344_v44 = vmul.f32 1.442695, %v3331_v11 }
 0x75c   :  { %4047 = vpow2.f32 %v3344_v44 }
 0x762   :  { %v4046_v23 = vpop.eup %4045 }
 0x763   :  { %v3362_v5 = vsel %vm3301_vm4, %v4046_v23, 0.0 }
 0x764   :  { %v3322_v1 = vpop.xlane.xlu0 %3321  ;;  %3363 = vadd.xlane.f32.xlu0 %v3362_v5 }
 0x765   :  { %v3332_v19 = vsub.f32 %v3220_v24, %v3322_v1 }
 0x766   :  { %v4048_v16 = vpop.eup %4047 }
 0x767   :  { %v3346_v21 = vmul.f32 1.442695, %v3332_v19  ;;  %v3365_v62 = vsel %vm3301_vm4, %v4048_v16, 0.0 }
 0x768   :  { %v3325_v45 = vpop.xlane.xlu1 %3324  ;;  %3366 = vadd.xlane.f32.xlu1 %v3365_v62 }
 0x769   :  { %4049 = vpow2.f32 %v3346_v21  ;;  %v3333_v34 = vsub.f32 %v3297_v61, %v3325_v45 }
 0x76b   :  { %v3348_v29 = vmul.f32 1.442695, %v3333_v34 }
 0x76d   :  { %4051 = vpow2.f32 %v3348_v29 }
 0x773   :  { %v4050_v27 = vpop.eup %4049 }
 0x774   :  { %v3368_v3 = vsel %vm3301_vm4, %v4050_v27, 0.0 }
 0x775   :  { %3369 = vadd.xlane.f32.xlu0 %v3368_v3 }
 0x777   :  { %v4052_v50 = vpop.eup %4051 }
 0x778   :  { %v3371_v4 = vsel %vm3301_vm4, %v4052_v50, 0.0 }
 0x779   :  { %3372 = vadd.xlane.f32.xlu1 %v3371_v4 }
 0x7cf   :  { %v3352_v41 = vpop.xlane.xlu0 %3351 }
 0x7d0   :  { %4053 = vrcp.f32 %v3352_v41 }
 0x7d3   :  { %v3355_v49 = vpop.xlane.xlu0 %3354 }
 0x7d4   :  { %4055 = vrcp.f32 %v3355_v49 }
 0x7da   :  { %v4054_v56 = vpop.eup %4053 }
 0x7db   :  { %v3382_v46 = vmul.f32 %v4054_v56, %v4038_v32 }
 0x7dd   :  { %v3398_v15 = vrot.slane %v3382_v46, 6 }
 0x7de   :  { %v4056_v13 = vpop.eup %4055 }
 0x7df   :  { %3406 = vrot.lane.b32.xlu1 %v3398_v15, %s4090_s3  ;;  %v3383_v54 = vmul.f32 %v4056_v13, %v4040_v47 }
 0x7e0   :  { %v3358_v55 = vpop.xlane.xlu1 %3357 }
 0x7e1   :  { %4057 = vrcp.f32 %v3358_v55  ;;  %v3399_v38 = vrot.slane %v3383_v54, 6 }
 0x7e3   :  { %3408 = vrot.lane.b32.xlu0 %v3399_v38, %s4090_s3 }
 0x7e4   :  { %v3361_v57 = vpop.xlane.xlu1 %3360 }
 0x7e5   :  { %4059 = vrcp.f32 %v3361_v57 }
 0x7eb   :  { %v4058_v24 = vpop.eup %4057 }
 0x7ec   :  { %v3384_v52 = vmul.f32 %v4058_v24, %v4042_v59 }
 0x7ee   :  { %v3400_v51 = vrot.slane %v3384_v52, 6 }
 0x7ef   :  { %v4060_v61 = vpop.eup %4059 }
 0x7f0   :  { %3410 = vrot.lane.b32.xlu1 %v3400_v51, %s4090_s3  ;;  %v3385_v60 = vmul.f32 %v4060_v61, %v4044_v36 }
 0x7f1   :  { %v3364_v10 = vpop.xlane.xlu0 %3363 }
 0x7f2   :  { %4061 = vrcp.f32 %v3364_v10  ;;  %v3401_v28 = vrot.slane %v3385_v60, 6 }
 0x7f4   :  { %3412 = vrot.lane.b32.xlu0 %v3401_v28, %s4090_s3 }
 0x7f5   :  { %v3367_v2 = vpop.xlane.xlu1 %3366 }
 0x7f6   :  { %4063 = vrcp.f32 %v3367_v2 }
 0x7fc   :  { %v4062_v31 = vpop.eup %4061 }
 0x7fd   :  { %v3386_v35 = vmul.f32 %v4062_v31, %v4046_v23 }
 0x7ff   :  { %v3402_v20 = vrot.slane %v3386_v35, 6 }
 0x800   :  { %v4064_v6 = vpop.eup %4063 }
 0x801   :  { %3414 = vrot.lane.b32.xlu1 %v3402_v20, %s4090_s3  ;;  %v3387_v33 = vmul.f32 %v4064_v6, %v4048_v16 }
 0x802   :  { %v3370_v32 = vpop.xlane.xlu0 %3369 }
 0x803   :  { %4065 = vrcp.f32 %v3370_v32  ;;  %v3403_v43 = vrot.slane %v3387_v33, 6 }
 0x805   :  { %3416 = vrot.lane.b32.xlu0 %v3403_v43, %s4090_s3 }
 0x806   :  { %v3373_v14 = vpop.xlane.xlu1 %3372 }
 0x807   :  { %4067 = vrcp.f32 %v3373_v14 }
 0x80d   :  { %v4066_v47 = vpop.eup %4065 }
 0x80e   :  { %v3388_v17 = vmul.f32 %v4066_v47, %v4050_v27 }
 0x810   :  { %v3404_v63 = vrot.slane %v3388_v17, 6 }
 0x811   :  { %v4068_v53 = vpop.eup %4067 }
 0x812   :  { %3418 = vrot.lane.b32.xlu1 %v3404_v63, %s4090_s3  ;;  %v3389_v30 = vmul.f32 %v4068_v53, %v4052_v50 }
 0x814   :  { %v3405_v42 = vrot.slane %v3389_v30, 6 }
 0x816   :  { %3420 = vrot.lane.b32.xlu0 %v3405_v42, %s4090_s3 }
 0x851   :  { %v3407_v59 = vpop.permute.xlu1 %3406 }
 0x852   :  { %v3430_v1 = vsel %vm2279_vm10, %v5517_v58, %v3407_v59 }
 0x853   :  { %v3439_v16 = vsel %vm3438_vm13, %v3430_v1, 0.0 }
 0x855   :  { %v3409_v18 = vpop.permute.xlu0 %3408 }
 0x856   :  { %v3431_v36 = vsel %vm2279_vm10, %v5528_v37, %v3409_v18 }
 0x857   :  { %v3440_v7 = vsel %vm3438_vm13, %v3431_v36, 0.0 }
 0x858   :  { %v3463_v5 = vrot.slane %v3440_v7, 7 }
 0x85a   :  { %v3465_v62 = vsel %vm3464_vm2, %v3463_v5, %v3439_v16 }
 0x862   :  { %v3411_v39 = vpop.permute.xlu1 %3410 }
 0x863   :  { %v3432_v12 = vsel %vm2279_vm10, %v5543_v40, %v3411_v39 }
 0x864   :  { %v3441_v11 = vsel %vm3438_vm13, %v3432_v12, 0.0 }
 0x865   :  { %v3466_v40 = vrot.slane %v3441_v11, 6 }
 0x866   :  { %v3413_v9 = vpop.permute.xlu0 %3412 }
 0x867   :  { %v3433_v22 = vsel %vm2279_vm10, %v5554_v26, %v3413_v9  ;;  %v3468_v34 = vsel %vm3467_vm12, %v3466_v40, %v3465_v62 }
 0x868   :  { %v3442_v44 = vsel %vm3438_vm13, %v3433_v22, 0.0 }
 0x869   :  { %v3469_v26 = vrot.slane %v3442_v44, 5 }
 0x86b   :  { %v3471_v29 = vsel %vm3470_vm6, %v3469_v26, %v3468_v34 }
 0x873   :  { %v3415_v23 = vpop.permute.xlu1 %3414 }
 0x874   :  { %v3434_v37 = vsel %vm2279_vm10, %v5569_v48, %v3415_v23 }
 0x875   :  { %v3443_v19 = vsel %vm3438_vm13, %v3434_v37, 0.0 }
 0x876   :  { %v3472_v21 = vrot.slane %v3443_v19, 4 }
 0x877   :  { %v3417_v45 = vpop.permute.xlu0 %3416 }
 0x878   :  { %v3435_v58 = vsel %vm2279_vm10, %v5580_v8, %v3417_v45  ;;  %v3474_v3 = vsel %vm3473_vm7, %v3472_v21, %v3471_v29 }
 0x879   :  { %v3444_v48 = vsel %vm3438_vm13, %v3435_v58, 0.0 }
 0x87a   :  { %v3475_v27 = vrot.slane %v3444_v48, 3 }
 0x87c   :  { %v3477_v50 = vsel %vm3476_vm5, %v3475_v27, %v3474_v3 }
 0x87d   :  { %3484 = vst [vmem:[%s5728_s6 - $0x2] sm:$0xfc] %v3477_v50 }
 0x884   :  { %v3419_v4 = vpop.permute.xlu1 %3418 }
 0x885   :  { %v3436_v41 = vsel %vm2279_vm10, %v5589_v25, %v3419_v4 }
 0x886   :  { %v3445_v49 = vsel %vm3438_vm13, %v3436_v41, 0.0 }
 0x887   :  { %v3478_v15 = vrot.slane %v3445_v49, 2 }
 0x888   :  { %v3421_v56 = vpop.permute.xlu0 %3420 }
 0x889   :  { %v3437_v8 = vsel %vm2279_vm10, %v5598_v0, %v3421_v56 }
 0x88a   :  { %v3446_v46 = vsel %vm3438_vm13, %v3437_v8, 0.0 }
 0x88b   :  { %v3479_v13 = vrot.slane %v3446_v46, 1 }
 0x88d   :  { %v3481_v55 = vsel %vm3480_vm3, %v3479_v13, %v3478_v15 }
 0x88e   :  { %3485 = vst [vmem:[%s5728_s6 + $0x6] sm:$0x3] %v3481_v55 }

</bundles_post_ra>
